<compile_context>
chip_gen: v5e
topology: v5e:2x2
jax: 0.10.0
libtpu: 0.0.40
codegen_flags: <defaults>
</compile_context>

<pallas_src>
import math
from functools import partial

import jax
import jax.numpy as jnp
from jax.experimental import pallas as pl
from jax.experimental.pallas import tpu as pltpu


# ----------------------------- tiling helpers ---------------------------------

_VMEM_LIMIT = 32 * 1024 * 1024


def _round_up(v, m):
    return ((v + m - 1) // m) * m


def _tile(dim, align, target):
    """Return (tile, padded_dim). target must be a multiple of align."""
    p = _round_up(dim, align)
    if p <= target:
        return p, p
    return target, _round_up(dim, target)


# ----------------------------- Pallas kernels ---------------------------------

def _matmul_kernel(x_ref, w_ref, b_ref, o_ref, acc_ref, *, relu: bool):
    # grid = (M tiles, N tiles, K tiles); K is the reduction axis (last / "arbitrary").
    @pl.when(pl.program_id(2) == 0)
    def _init():
        acc_ref[...] = jnp.zeros_like(acc_ref)

    acc_ref[...] += jnp.dot(x_ref[...], w_ref[...], preferred_element_type=jnp.float32)

    @pl.when(pl.program_id(2) == pl.num_programs(2) - 1)
    def _fin():
        y = acc_ref[...] + b_ref[...]
        if relu:
            y = jnp.maximum(y, 0.0)
        o_ref[...] = y.astype(o_ref.dtype)


def _layer_norm(y, g, bt):
    mean = jnp.mean(y, axis=-1, keepdims=True)
    var = jnp.mean(jnp.square(y - mean), axis=-1, keepdims=True)
    yn = (y - mean) * jax.lax.rsqrt(var + 1e-5)
    return yn * g + bt


def _ffn_ln_kernel(x_ref, w1_ref, b1_ref, w2_ref, b2_ref, g_ref, bt_ref, o_ref):
    # Fused position-wise FFN block:  LayerNorm(x + (relu(x@W1+b1) @ W2 + b2)).
    # grid = (M tiles,); full hidden / pf dims in-block (tiny for this model).
    x = x_ref[...]                                                # [tm, H] f32 (also residual)
    h = jnp.dot(x.astype(jnp.bfloat16), w1_ref[...],
                preferred_element_type=jnp.float32) + b1_ref[...]
    h = jnp.maximum(h, 0.0)
    y = jnp.dot(h.astype(jnp.bfloat16), w2_ref[...],
                preferred_element_type=jnp.float32) + b2_ref[...] + x
    o_ref[...] = _layer_norm(y, g_ref[...], bt_ref[...]).astype(o_ref.dtype)


def _attn_core(q, k, v, mask, a_ref, *, n_heads, scale):
    # q: [Lq, H] bf16, k/v: [Lk, H] bf16, mask: [Lq, Lk] bool. All heads handled in-block.
    dh = q.shape[-1] // n_heads
    outs = []
    for h in range(n_heads):
        sl = slice(h * dh, (h + 1) * dh)
        qh, kh, vh = q[:, sl], k[:, sl], v[:, sl]
        # contract the last dim of both operands (no in-kernel transpose of K)
        e = jax.lax.dot_general(qh, kh, (((1,), (1,)), ((), ())),
                                preferred_element_type=jnp.float32) * scale
        e = jnp.where(mask, e, jnp.float32(-1e10))
        e = e - jnp.max(e, axis=-1, keepdims=True)
        p = jnp.exp(e)
        inv = pl.reciprocal(jnp.sum(p, axis=-1, keepdims=True), approx=True)
        attn = p * inv
        if a_ref is not None:
            a_ref[0, h] = attn.astype(a_ref.dtype)
        outs.append(jnp.dot(attn.astype(vh.dtype), vh, preferred_element_type=jnp.float32))
    return jnp.concatenate(outs, axis=-1)                         # [Lq, H] f32


def _out_proj_ln(ctx, wo, bo, res, g, bt, o_ref):
    # context @ Wo + bo + residual  ->  LayerNorm * gamma + beta.
    y = jnp.dot(ctx.astype(wo.dtype), wo, preferred_element_type=jnp.float32)
    y = y + bo + res
    o_ref[0] = _layer_norm(y, g, bt).astype(o_ref.dtype)


def _make_self_attn_block_kernel(n_heads, scale, hid, with_attn):
    def kernel(qkv_ref, m_ref, res_ref, wo_ref, bo_ref, g_ref, bt_ref, o_ref, *rest):
        a_ref = rest[0] if with_attn else None
        x = qkv_ref[0]                      # [L, 3H], fused Q|K|V projection
        q = x[:, 0 * hid:1 * hid]
        k = x[:, 1 * hid:2 * hid]
        v = x[:, 2 * hid:3 * hid]
        ctx = _attn_core(q, k, v, m_ref[0] != 0, a_ref, n_heads=n_heads, scale=scale)
        _out_proj_ln(ctx, wo_ref[...], bo_ref[...], res_ref[0].astype(jnp.float32),
                     g_ref[...], bt_ref[...], o_ref)
    return kernel


def _make_cross_attn_block_kernel(n_heads, scale, hid, with_attn):
    def kernel(q_ref, kv_ref, m_ref, res_ref, wo_ref, bo_ref, g_ref, bt_ref, o_ref, *rest):
        a_ref = rest[0] if with_attn else None
        kvx = kv_ref[0]                     # [Lk, 2H], fused K|V projection
        ctx = _attn_core(q_ref[0], kvx[:, :hid], kvx[:, hid:], m_ref[0] != 0, a_ref,
                         n_heads=n_heads, scale=scale)
        _out_proj_ln(ctx, wo_ref[...], bo_ref[...], res_ref[0].astype(jnp.float32),
                     g_ref[...], bt_ref[...], o_ref)
    return kernel


# ----------------------------- kernel wrappers ---------------------------------

def pallas_linear(x, w, b, *, relu=False, out_dtype=jnp.float32):
    """y = x @ w + b (optional ReLU). x: [..., K]; w: [K, N]; b: [N]."""
    K = x.shape[-1]
    N = w.shape[1]
    lead = x.shape[:-1]
    x2 = x.reshape(-1, K)
    M = x2.shape[0]

    tm, Mp = _tile(M, 16, 256)
    tk, Kp = _tile(K, 128, 512)
    tn, Np = _tile(N, 128, 256)

    xb = jnp.pad(x2, ((0, Mp - M), (0, Kp - K))).astype(jnp.bfloat16)
    wb = jnp.pad(w, ((0, Kp - K), (0, Np - N))).astype(jnp.bfloat16)
    bb = jnp.pad(b.astype(jnp.float32), (0, Np - N)).reshape(1, Np)

    grid = (Mp // tm, Np // tn, Kp // tk)
    out = pl.pallas_call(
        partial(_matmul_kernel, relu=relu),
        out_shape=jax.ShapeDtypeStruct((Mp, Np), out_dtype),
        grid=grid,
        in_specs=[pl.BlockSpec((tm, tk), lambda i, j, k: (i, k)),
                  pl.BlockSpec((tk, tn), lambda i, j, k: (k, j)),
                  pl.BlockSpec((1, tn), lambda i, j, k: (0, j))],
        out_specs=pl.BlockSpec((tm, tn), lambda i, j, k: (i, j)),
        scratch_shapes=[pltpu.VMEM((tm, tn), jnp.float32)],
        compiler_params=pltpu.CompilerParams(
            dimension_semantics=("parallel", "parallel", "arbitrary"),
            vmem_limit_bytes=_VMEM_LIMIT),
        cost_estimate=pl.CostEstimate(
            flops=2 * Mp * Np * Kp, transcendentals=0,
            bytes_accessed=2 * Mp * Kp + 2 * Kp * Np + 4 * Mp * Np),
    )(xb, wb, bb)
    return out[:M, :N].reshape(*lead, N)


def pallas_ffn_ln(x, w1, b1, w2, b2, gamma, beta):
    """LayerNorm(x + (relu(x @ w1 + b1) @ w2 + b2)), fused in one kernel."""
    lead = x.shape[:-1]
    H = x.shape[-1]
    PF = w1.shape[1]
    x2 = x.reshape(-1, H).astype(jnp.float32)
    M = x2.shape[0]

    tm, Mp = _tile(M, 8, 512)
    xp = jnp.pad(x2, ((0, Mp - M), (0, 0)))

    out = pl.pallas_call(
        _ffn_ln_kernel,
        out_shape=jax.ShapeDtypeStruct((Mp, H), jnp.float32),
        grid=(Mp // tm,),
        in_specs=[pl.BlockSpec((tm, H), lambda i: (i, 0)),
                  pl.BlockSpec((H, PF), lambda i: (0, 0)),
                  pl.BlockSpec((1, PF), lambda i: (0, 0)),
                  pl.BlockSpec((PF, H), lambda i: (0, 0)),
                  pl.BlockSpec((1, H), lambda i: (0, 0)),
                  pl.BlockSpec((1, H), lambda i: (0, 0)),
                  pl.BlockSpec((1, H), lambda i: (0, 0))],
        out_specs=pl.BlockSpec((tm, H), lambda i: (i, 0)),
        compiler_params=pltpu.CompilerParams(
            dimension_semantics=("parallel",),
            vmem_limit_bytes=_VMEM_LIMIT),
    )(xp,
      w1.astype(jnp.bfloat16), b1.astype(jnp.float32).reshape(1, PF),
      w2.astype(jnp.bfloat16), b2.astype(jnp.float32).reshape(1, H),
      gamma.astype(jnp.float32).reshape(1, H), beta.astype(jnp.float32).reshape(1, H))
    return out[:M].reshape(*lead, H)


def attention_block(x_q, x_kv, mask, p, ln_g, ln_b, n_heads, *, need_attn, is_self):
    """Fused MHA sub-block: LayerNorm(x_q + MHA(x_q, x_kv) @ Wo + bo).

    Returns (new_x [B, Lq, H] f32, attention [B, heads, Lq, Lk] f32 or None)."""
    B, Lq, H = x_q.shape
    Lk = x_kv.shape[1]
    dh = H // n_heads
    scale = 1.0 / math.sqrt(dh)

    if is_self:
        qkv = pallas_linear(x_q, p['w_qkv'], p['b_qkv'], out_dtype=jnp.bfloat16)   # [B, L, 3H]
        ins = [qkv]
        in_specs = [pl.BlockSpec((1, Lq, 3 * H), lambda i: (i, 0, 0))]
        kernel = _make_self_attn_block_kernel(n_heads, scale, H, need_attn)
    else:
        q = pallas_linear(x_q, p['wq'], p['bq'], out_dtype=jnp.bfloat16)           # [B, Lq, H]
        kv = pallas_linear(x_kv, p['w_kv'], p['b_kv'], out_dtype=jnp.bfloat16)     # [B, Lk, 2H]
        ins = [q, kv]
        in_specs = [pl.BlockSpec((1, Lq, H), lambda i: (i, 0, 0)),
                    pl.BlockSpec((1, Lk, 2 * H), lambda i: (i, 0, 0))]
        kernel = _make_cross_attn_block_kernel(n_heads, scale, H, need_attn)

    # one mask copy per batch element, shared across all heads
    m = jnp.broadcast_to(mask[:, 0], (B, Lq, Lk)).astype(jnp.int32)
    ins.append(m)
    in_specs.append(pl.BlockSpec((1, Lq, Lk), lambda i: (i, 0, 0)))

    # residual / out-proj weights / LN params
    ins.extend([x_q.astype(jnp.float32),
                p['wo'].astype(jnp.bfloat16),
                p['bo'].astype(jnp.float32).reshape(1, H),
                ln_g.astype(jnp.float32).reshape(1, H),
                ln_b.astype(jnp.float32).reshape(1, H)])
    in_specs.extend([pl.BlockSpec((1, Lq, H), lambda i: (i, 0, 0)),
                     pl.BlockSpec((H, H), lambda i: (0, 0)),
                     pl.BlockSpec((1, H), lambda i: (0, 0)),
                     pl.BlockSpec((1, H), lambda i: (0, 0)),
                     pl.BlockSpec((1, H), lambda i: (0, 0))])

    out_shape = [jax.ShapeDtypeStruct((B, Lq, H), jnp.float32)]
    out_specs = [pl.BlockSpec((1, Lq, H), lambda i: (i, 0, 0))]
    if need_attn:
        out_shape.append(jax.ShapeDtypeStruct((B, n_heads, Lq, Lk), jnp.float32))
        out_specs.append(pl.BlockSpec((1, n_heads, Lq, Lk), lambda i: (i, 0, 0, 0)))

    outs = pl.pallas_call(
        kernel,
        out_shape=tuple(out_shape),
        grid=(B,),
        in_specs=in_specs,
        out_specs=tuple(out_specs),
        compiler_params=pltpu.CompilerParams(
            dimension_semantics=("parallel",),
            vmem_limit_bytes=_VMEM_LIMIT),
    )(*ins)

    new_x = outs[0]
    attn = outs[1] if need_attn else None
    return new_x, attn


# ----------------------------- model forward ---------------------------------
# TODO(synk): dropout layers are identity here (inference / eval mode); training-mode dropout
#             (RNG masks) is not implemented.

def encoder_forward(params, src, src_mask, *, n_heads):
    B, S, _ = src.shape
    H = params['pos_emb'].shape[1]
    x = pallas_linear(src, params['fc_in_w'], params['fc_in_b'])
    x = x * math.sqrt(H) + params['pos_emb'][:S][None, :, :]
    n_layers = len(params['layers'])
    enc_attn = None
    for li, lp in enumerate(params['layers']):
        last = li == n_layers - 1
        x, a = attention_block(x, x, src_mask, lp['self_attn'], lp['ln1_g'], lp['ln1_b'],
                               n_heads, need_attn=last, is_self=True)
        if last:
            enc_attn = a
        x = pallas_ffn_ln(x, lp['ff_w1'], lp['ff_b1'], lp['ff_w2'], lp['ff_b2'],
                          lp['ln2_g'], lp['ln2_b'])
    return x, enc_attn


def decoder_forward(params, trg, enc_src, trg_mask, src_mask, *, n_heads):
    B, T = trg.shape
    H = params['pos_emb'].shape[1]
    # TODO(synk): token-embedding gather is left to XLA (no Pallas gather needed at this size).
    x = params['tok_emb'][trg] * math.sqrt(H) + params['pos_emb'][:T][None, :, :]
    n_layers = len(params['layers'])
    self_attn = None
    cross_attn = None
    for li, lp in enumerate(params['layers']):
        last = li == n_layers - 1
        x, a = attention_block(x, x, trg_mask, lp['self_attn'], lp['ln1_g'], lp['ln1_b'],
                               n_heads, need_attn=last, is_self=True)
        if last:
            self_attn = a
        x, a = attention_block(x, enc_src, src_mask, lp['cross_attn'], lp['ln2_g'], lp['ln2_b'],
                               n_heads, need_attn=last, is_self=False)
        if last:
            cross_attn = a
        x = pallas_ffn_ln(x, lp['ff_w1'], lp['ff_b1'], lp['ff_w2'], lp['ff_b2'],
                          lp['ln3_g'], lp['ln3_b'])
    logits = pallas_linear(x, params['fc_out_w'], params['fc_out_b'])
    return logits, cross_attn, self_attn


@partial(jax.jit, static_argnames=("n_heads",))
def transformer_forward(enc_params, dec_params, src, trg, src_mask, trg_mask, *, n_heads):
    enc_src, enc_attn = encoder_forward(enc_params, src, src_mask, n_heads=n_heads)
    dec = decoder_forward(dec_params, trg, enc_src, trg_mask, src_mask, n_heads=n_heads)
    return dec, enc_attn


# ----------------------------- mask helpers (match PyTorch) --------------------

def make_src_mask(src, src_pad_idx):
    pad = jnp.zeros(src.shape[1:], src.dtype) + src_pad_idx
    m = jnp.logical_not(jnp.all(pad == src, axis=2))
    return m[:, None, None, :]            # [B, 1, 1, S_src]


def make_trg_mask(trg, trg_pad_idx):
    pad_mask = (trg != trg_pad_idx)[:, None, None, :]    # [B, 1, 1, T]
    T = trg.shape[1]
    sub = jnp.tril(jnp.ones((T, T), dtype=bool))
    return pad_mask & sub                  # [B, 1, T, T]


# ----------------------------- deterministic init ------------------------------
# Matmul weights stored in bf16 (MXU inputs); biases / LayerNorm params / embeddings in f32.

def _init_linear(key, din, dout):
    w = (jax.random.normal(key, (din, dout), jnp.float32) * 0.02).astype(jnp.bfloat16)
    b = jnp.zeros((dout,), jnp.float32)
    return w, b


def _init_attn(key, hid):
    ks = jax.random.split(key, 4)
    wq, bq = _init_linear(ks[0], hid, hid)
    wk, bk = _init_linear(ks[1], hid, hid)
    wv, bv = _init_linear(ks[2], hid, hid)
    wo, bo = _init_linear(ks[3], hid, hid)
    return dict(
        w_qkv=jnp.concatenate([wq, wk, wv], axis=1), b_qkv=jnp.concatenate([bq, bk, bv]),
        wq=wq, bq=bq,
        w_kv=jnp.concatenate([wk, wv], axis=1), b_kv=jnp.concatenate([bk, bv]),
        wo=wo, bo=bo)


def init_encoder(key, feat_dim, hid, pf, n_layers, max_len):
    keys = jax.random.split(key, 2 + n_layers)
    fc_in_w, fc_in_b = _init_linear(keys[0], feat_dim, hid)
    pos_emb = jax.random.normal(keys[1], (max_len, hid), jnp.float32) * 0.02
    layers = []
    for li in range(n_layers):
        lk = jax.random.split(keys[2 + li], 3)
        ff_w1, ff_b1 = _init_linear(lk[1], hid, pf)
        ff_w2, ff_b2 = _init_linear(lk[2], pf, hid)
        layers.append(dict(
            self_attn=_init_attn(lk[0], hid),
            ln1_g=jnp.ones((hid,), jnp.float32), ln1_b=jnp.zeros((hid,), jnp.float32),
            ff_w1=ff_w1, ff_b1=ff_b1, ff_w2=ff_w2, ff_b2=ff_b2,
            ln2_g=jnp.ones((hid,), jnp.float32), ln2_b=jnp.zeros((hid,), jnp.float32),
        ))
    return dict(fc_in_w=fc_in_w, fc_in_b=fc_in_b, pos_emb=pos_emb, layers=layers)


def init_decoder(key, vocab, hid, pf, n_layers, max_len):
    keys = jax.random.split(key, 3 + n_layers)
    tok_emb = jax.random.normal(keys[0], (vocab, hid), jnp.float32) * 0.02
    pos_emb = jax.random.normal(keys[1], (max_len, hid), jnp.float32) * 0.02
    fc_out_w, fc_out_b = _init_linear(keys[2], hid, vocab)
    layers = []
    for li in range(n_layers):
        lk = jax.random.split(keys[3 + li], 4)
        ff_w1, ff_b1 = _init_linear(lk[2], hid, pf)
        ff_w2, ff_b2 = _init_linear(lk[3], pf, hid)
        layers.append(dict(
            self_attn=_init_attn(lk[0], hid),
            ln1_g=jnp.ones((hid,), jnp.float32), ln1_b=jnp.zeros((hid,), jnp.float32),
            cross_attn=_init_attn(lk[1], hid),
            ln2_g=jnp.ones((hid,), jnp.float32), ln2_b=jnp.zeros((hid,), jnp.float32),
            ff_w1=ff_w1, ff_b1=ff_b1, ff_w2=ff_w2, ff_b2=ff_b2,
            ln3_g=jnp.ones((hid,), jnp.float32), ln3_b=jnp.zeros((hid,), jnp.float32),
        ))
    return dict(tok_emb=tok_emb, pos_emb=pos_emb, fc_out_w=fc_out_w, fc_out_b=fc_out_b,
                layers=layers)


# ----------------------------- demo ---------------------------------

if __name__ == "__main__":
    B, S_SRC, FEAT = 2, 8, 4          # src: batch of continuous feature-vector sequences
    S_TRG = 8
    HID, HEADS, PF = 32, 4, 64
    VOCAB = 16
    ENC_LAYERS = DEC_LAYERS = 2
    MAX_LEN = 16
    SRC_PAD_IDX = 0.0
    TRG_PAD_IDX = 0

    key = jax.random.PRNGKey(0)
    k_enc, k_dec, k_src, k_trg = jax.random.split(key, 4)

    enc_params = init_encoder(k_enc, FEAT, HID, PF, ENC_LAYERS, MAX_LEN)
    dec_params = init_decoder(k_dec, VOCAB, HID, PF, DEC_LAYERS, MAX_LEN)

    src = jax.random.normal(k_src, (B, S_SRC, FEAT), jnp.float32)
    src = src.at[1, -2:, :].set(SRC_PAD_IDX)                       # padded src positions
    trg = jax.random.randint(k_trg, (B, S_TRG), 2, VOCAB, dtype=jnp.int32)
    trg = trg.at[1, -3:].set(TRG_PAD_IDX)                          # padded trg positions

    src_mask = make_src_mask(src, SRC_PAD_IDX)                     # [B, 1, 1, S_src] bool
    trg_mask = make_trg_mask(trg, TRG_PAD_IDX)                     # [B, 1, T, T] bool

    (dec_out, cross_attn, dec_self_attn), enc_attn = transformer_forward(
        enc_params, dec_params, src, trg, src_mask, trg_mask, n_heads=HEADS)

    jax.block_until_ready((dec_out, cross_attn, dec_self_attn, enc_attn))

    assert dec_out.shape == (B, S_TRG, VOCAB)
    assert enc_attn.shape == (B, HEADS, S_SRC, S_SRC)
    assert cross_attn.shape == (B, HEADS, S_TRG, S_SRC)
    assert dec_self_attn.shape == (B, HEADS, S_TRG, S_TRG)
    assert bool(jnp.all(jnp.isfinite(dec_out)))
    assert bool(jnp.all(jnp.isfinite(enc_attn)))

    print("KERNEL_OK")
</pallas_src>

<mosaic_0001>
module attributes {stable_mosaic.version = 11 : i64} {
  func.func @_matmul_kernel(%arg0: i32, %arg1: i32, %arg2: i32, %arg3: memref<16x128xbf16, #tpu.memory_space<vmem>>, %arg4: memref<128x128xbf16, #tpu.memory_space<vmem>>, %arg5: memref<1x128xf32, #tpu.memory_space<vmem>>, %arg6: memref<16x128xf32, #tpu.memory_space<vmem>>, %arg7: memref<16x128xf32, #tpu.memory_space<vmem>>) attributes {dimension_semantics = [#tpu.dimension_semantics<parallel>, #tpu.dimension_semantics<parallel>, #tpu.dimension_semantics<arbitrary>], iteration_bounds = array<i64: 1, 1, 1>, scalar_prefetch = 0 : i64, scratch_operands = 1 : i64, tpu.core_type = #tpu.core_type<tc>, window_params = [{transform_indices = @transform_0, window_bounds = array<i64: 16, 128>}, {transform_indices = @transform_1, window_bounds = array<i64: 128, 128>}, {transform_indices = @transform_2, window_bounds = array<i64: 1, 128>}, {transform_indices = @transform_3, window_bounds = array<i64: 16, 128>}]} {
    %c0_i32 = arith.constant 0 : i32
    %0 = arith.cmpi eq, %arg2, %c0_i32 : i32
    %1 = arith.extui %0 : i1 to i32
    %c0_i32_0 = arith.constant 0 : i32
    %2 = arith.cmpi ne, %1, %c0_i32_0 : i32
    scf.if %2 {
      %cst_10 = arith.constant 0.000000e+00 : f32
      %12 = vector.broadcast %cst_10 : f32 to vector<16x128xf32>
      %c0_11 = arith.constant 0 : index
      %c0_12 = arith.constant 0 : index
      %13 = vector.load %arg7[%c0_11, %c0_12] : memref<16x128xf32, #tpu.memory_space<vmem>>, vector<16x128xf32>
      tpu.vector_store %arg7[%c0_11, %c0_12], %12 {strides = array<i32>} : memref<16x128xf32, #tpu.memory_space<vmem>>, vector<16x128xf32>,
    } else {
    }
    %c0 = arith.constant 0 : index
    %c0_1 = arith.constant 0 : index
    %3 = vector.load %arg7[%c0, %c0_1] : memref<16x128xf32, #tpu.memory_space<vmem>>, vector<16x128xf32>
    %c0_2 = arith.constant 0 : index
    %c0_3 = arith.constant 0 : index
    %4 = vector.load %arg3[%c0_2, %c0_3] : memref<16x128xbf16, #tpu.memory_space<vmem>>, vector<16x128xbf16>
    %c0_4 = arith.constant 0 : index
    %c0_5 = arith.constant 0 : index
    %5 = vector.load %arg4[%c0_4, %c0_5] : memref<128x128xbf16, #tpu.memory_space<vmem>>, vector<128x128xbf16>
    %cst = arith.constant dense<0.000000e+00> : vector<16x128xf32>
    %6 = tpu.matmul %4, %5, %cst {dimension_numbers = #tpu.dot_dimension_numbers<[1], [0], [0], [1], [0, 0, 1, 1], [], []>} : vector<16x128xbf16>, vector<128x128xbf16>, vector<16x128xf32> -> vector<16x128xf32>
    %7 = arith.addf %3, %6 : vector<16x128xf32>
    %c0_6 = arith.constant 0 : index
    %c0_7 = arith.constant 0 : index
    %8 = vector.load %arg7[%c0_6, %c0_7] : memref<16x128xf32, #tpu.memory_space<vmem>>, vector<16x128xf32>
    tpu.vector_store %arg7[%c0_6, %c0_7], %7 {strides = array<i32>} : memref<16x128xf32, #tpu.memory_space<vmem>>, vector<16x128xf32>,
    %c0_i32_8 = arith.constant 0 : i32
    %9 = arith.cmpi eq, %arg2, %c0_i32_8 : i32
    %10 = arith.extui %9 : i1 to i32
    %c0_i32_9 = arith.constant 0 : i32
    %11 = arith.cmpi ne, %10, %c0_i32_9 : i32
    scf.if %11 {
      %c0_10 = arith.constant 0 : index
      %c0_11 = arith.constant 0 : index
      %12 = vector.load %arg7[%c0_10, %c0_11] : memref<16x128xf32, #tpu.memory_space<vmem>>, vector<16x128xf32>
      %c0_12 = arith.constant 0 : index
      %c0_13 = arith.constant 0 : index
      %13 = vector.load %arg5[%c0_12, %c0_13] : memref<1x128xf32, #tpu.memory_space<vmem>>, vector<1x128xf32>
      %14 = vector.broadcast %13 : vector<1x128xf32> to vector<16x128xf32>
      %15 = arith.addf %12, %14 : vector<16x128xf32>
      %c0_14 = arith.constant 0 : index
      %c0_15 = arith.constant 0 : index
      %16 = vector.load %arg6[%c0_14, %c0_15] : memref<16x128xf32, #tpu.memory_space<vmem>>, vector<16x128xf32>
      tpu.vector_store %arg6[%c0_14, %c0_15], %15 {strides = array<i32>} : memref<16x128xf32, #tpu.memory_space<vmem>>, vector<16x128xf32>,
    } else {
    }
    return
  }
  func.func @transform_0(%arg0: i32, %arg1: i32, %arg2: i32) -> (i32, i32) {
    %c0_i32 = arith.constant 0 : i32
    return %arg0, %arg2 : i32, i32
  }
  func.func @transform_1(%arg0: i32, %arg1: i32, %arg2: i32) -> (i32, i32) {
    %c0_i32 = arith.constant 0 : i32
    return %arg2, %arg1 : i32, i32
  }
  func.func @transform_2(%arg0: i32, %arg1: i32, %arg2: i32) -> (i32, i32) {
    %c0_i32 = arith.constant 0 : i32
    %c0_i32_0 = arith.constant 0 : i32
    return %c0_i32, %arg1 : i32, i32
  }
  func.func @transform_3(%arg0: i32, %arg1: i32, %arg2: i32) -> (i32, i32) {
    %c0_i32 = arith.constant 0 : i32
    return %arg0, %arg1 : i32, i32
  }
}

module attributes {stable_mosaic.version = 11 : i64} {
  func.func @_matmul_kernel(%arg0: i32, %arg1: i32, %arg2: i32, %arg3: memref<16x128xbf16, #tpu.memory_space<vmem>>, %arg4: memref<128x128xbf16, #tpu.memory_space<vmem>>, %arg5: memref<1x128xf32, #tpu.memory_space<vmem>>, %arg6: memref<16x128xbf16, #tpu.memory_space<vmem>>, %arg7: memref<16x128xf32, #tpu.memory_space<vmem>>) attributes {dimension_semantics = [#tpu.dimension_semantics<parallel>, #tpu.dimension_semantics<parallel>, #tpu.dimension_semantics<arbitrary>], iteration_bounds = array<i64: 1, 1, 1>, scalar_prefetch = 0 : i64, scratch_operands = 1 : i64, tpu.core_type = #tpu.core_type<tc>, window_params = [{transform_indices = @transform_0, window_bounds = array<i64: 16, 128>}, {transform_indices = @transform_1, window_bounds = array<i64: 128, 128>}, {transform_indices = @transform_2, window_bounds = array<i64: 1, 128>}, {transform_indices = @transform_3, window_bounds = array<i64: 16, 128>}]} {
    %c0_i32 = arith.constant 0 : i32
    %0 = arith.cmpi eq, %arg2, %c0_i32 : i32
    %1 = arith.extui %0 : i1 to i32
    %c0_i32_0 = arith.constant 0 : i32
    %2 = arith.cmpi ne, %1, %c0_i32_0 : i32
    scf.if %2 {
      %cst_10 = arith.constant 0.000000e+00 : f32
      %12 = vector.broadcast %cst_10 : f32 to vector<16x128xf32>
      %c0_11 = arith.constant 0 : index
      %c0_12 = arith.constant 0 : index
      %13 = vector.load %arg7[%c0_11, %c0_12] : memref<16x128xf32, #tpu.memory_space<vmem>>, vector<16x128xf32>
      tpu.vector_store %arg7[%c0_11, %c0_12], %12 {strides = array<i32>} : memref<16x128xf32, #tpu.memory_space<vmem>>, vector<16x128xf32>,
    } else {
    }
    %c0 = arith.constant 0 : index
    %c0_1 = arith.constant 0 : index
    %3 = vector.load %arg7[%c0, %c0_1] : memref<16x128xf32, #tpu.memory_space<vmem>>, vector<16x128xf32>
    %c0_2 = arith.constant 0 : index
    %c0_3 = arith.constant 0 : index
    %4 = vector.load %arg3[%c0_2, %c0_3] : memref<16x128xbf16, #tpu.memory_space<vmem>>, vector<16x128xbf16>
    %c0_4 = arith.constant 0 : index
    %c0_5 = arith.constant 0 : index
    %5 = vector.load %arg4[%c0_4, %c0_5] : memref<128x128xbf16, #tpu.memory_space<vmem>>, vector<128x128xbf16>
    %cst = arith.constant dense<0.000000e+00> : vector<16x128xf32>
    %6 = tpu.matmul %4, %5, %cst {dimension_numbers = #tpu.dot_dimension_numbers<[1], [0], [0], [1], [0, 0, 1, 1], [], []>} : vector<16x128xbf16>, vector<128x128xbf16>, vector<16x128xf32> -> vector<16x128xf32>
    %7 = arith.addf %3, %6 : vector<16x128xf32>
    %c0_6 = arith.constant 0 : index
    %c0_7 = arith.constant 0 : index
    %8 = vector.load %arg7[%c0_6, %c0_7] : memref<16x128xf32, #tpu.memory_space<vmem>>, vector<16x128xf32>
    tpu.vector_store %arg7[%c0_6, %c0_7], %7 {strides = array<i32>} : memref<16x128xf32, #tpu.memory_space<vmem>>, vector<16x128xf32>,
    %c0_i32_8 = arith.constant 0 : i32
    %9 = arith.cmpi eq, %arg2, %c0_i32_8 : i32
    %10 = arith.extui %9 : i1 to i32
    %c0_i32_9 = arith.constant 0 : i32
    %11 = arith.cmpi ne, %10, %c0_i32_9 : i32
    scf.if %11 {
      %c0_10 = arith.constant 0 : index
      %c0_11 = arith.constant 0 : index
      %12 = vector.load %arg7[%c0_10, %c0_11] : memref<16x128xf32, #tpu.memory_space<vmem>>, vector<16x128xf32>
      %c0_12 = arith.constant 0 : index
      %c0_13 = arith.constant 0 : index
      %13 = vector.load %arg5[%c0_12, %c0_13] : memref<1x128xf32, #tpu.memory_space<vmem>>, vector<1x128xf32>
      %14 = vector.broadcast %13 : vector<1x128xf32> to vector<16x128xf32>
      %15 = arith.addf %12, %14 : vector<16x128xf32>
      %16 = arith.truncf %15 : vector<16x128xf32> to vector<16x128xbf16>
      %c0_14 = arith.constant 0 : index
      %c0_15 = arith.constant 0 : index
      %17 = vector.load %arg6[%c0_14, %c0_15] : memref<16x128xbf16, #tpu.memory_space<vmem>>, vector<16x128xbf16>
      tpu.vector_store %arg6[%c0_14, %c0_15], %16 {strides = array<i32>} : memref<16x128xbf16, #tpu.memory_space<vmem>>, vector<16x128xbf16>,
    } else {
    }
    return
  }
  func.func @transform_0(%arg0: i32, %arg1: i32, %arg2: i32) -> (i32, i32) {
    %c0_i32 = arith.constant 0 : i32
    return %arg0, %arg2 : i32, i32
  }
  func.func @transform_1(%arg0: i32, %arg1: i32, %arg2: i32) -> (i32, i32) {
    %c0_i32 = arith.constant 0 : i32
    return %arg2, %arg1 : i32, i32
  }
  func.func @transform_2(%arg0: i32, %arg1: i32, %arg2: i32) -> (i32, i32) {
    %c0_i32 = arith.constant 0 : i32
    %c0_i32_0 = arith.constant 0 : i32
    return %c0_i32, %arg1 : i32, i32
  }
  func.func @transform_3(%arg0: i32, %arg1: i32, %arg2: i32) -> (i32, i32) {
    %c0_i32 = arith.constant 0 : i32
    return %arg0, %arg1 : i32, i32
  }
}

module attributes {stable_mosaic.version = 11 : i64} {
  func.func @_ffn_ln_kernel(%arg0: i32, %arg1: memref<16x32xf32, #tpu.memory_space<vmem>>, %arg2: memref<32x64xbf16, #tpu.memory_space<vmem>>, %arg3: memref<1x64xf32, #tpu.memory_space<vmem>>, %arg4: memref<64x32xbf16, #tpu.memory_space<vmem>>, %arg5: memref<1x32xf32, #tpu.memory_space<vmem>>, %arg6: memref<1x32xf32, #tpu.memory_space<vmem>>, %arg7: memref<1x32xf32, #tpu.memory_space<vmem>>, %arg8: memref<16x32xf32, #tpu.memory_space<vmem>>) attributes {dimension_semantics = [#tpu.dimension_semantics<parallel>], iteration_bounds = array<i64: 1>, scalar_prefetch = 0 : i64, scratch_operands = 0 : i64, tpu.core_type = #tpu.core_type<tc>, window_params = [{transform_indices = @transform_0, window_bounds = array<i64: 16, 32>}, {pipeline_mode = #tpu.pipeline_mode<synchronous>, transform_indices = @transform_1, window_bounds = array<i64: 32, 64>}, {pipeline_mode = #tpu.pipeline_mode<synchronous>, transform_indices = @transform_2, window_bounds = array<i64: 1, 64>}, {pipeline_mode = #tpu.pipeline_mode<synchronous>, transform_indices = @transform_3, window_bounds = array<i64: 64, 32>}, {pipeline_mode = #tpu.pipeline_mode<synchronous>, transform_indices = @transform_4, window_bounds = array<i64: 1, 32>}, {pipeline_mode = #tpu.pipeline_mode<synchronous>, transform_indices = @transform_5, window_bounds = array<i64: 1, 32>}, {pipeline_mode = #tpu.pipeline_mode<synchronous>, transform_indices = @transform_6, window_bounds = array<i64: 1, 32>}, {transform_indices = @transform_7, window_bounds = array<i64: 16, 32>}]} {
    %c0 = arith.constant 0 : index
    %c0_0 = arith.constant 0 : index
    %0 = vector.load %arg1[%c0, %c0_0] : memref<16x32xf32, #tpu.memory_space<vmem>>, vector<16x32xf32>
    %1 = arith.truncf %0 : vector<16x32xf32> to vector<16x32xbf16>
    %c0_1 = arith.constant 0 : index
    %c0_2 = arith.constant 0 : index
    %2 = vector.load %arg2[%c0_1, %c0_2] : memref<32x64xbf16, #tpu.memory_space<vmem>>, vector<32x64xbf16>
    %cst = arith.constant dense<0.000000e+00> : vector<16x64xf32>
    %3 = tpu.matmul %1, %2, %cst {dimension_numbers = #tpu.dot_dimension_numbers<[1], [0], [0], [1], [0, 0, 1, 1], [], []>} : vector<16x32xbf16>, vector<32x64xbf16>, vector<16x64xf32> -> vector<16x64xf32>
    %c0_3 = arith.constant 0 : index
    %c0_4 = arith.constant 0 : index
    %4 = vector.load %arg3[%c0_3, %c0_4] : memref<1x64xf32, #tpu.memory_space<vmem>>, vector<1x64xf32>
    %5 = vector.broadcast %4 : vector<1x64xf32> to vector<16x64xf32>
    %6 = arith.addf %3, %5 : vector<16x64xf32>
    %cst_5 = arith.constant 0.000000e+00 : f32
    %7 = vector.broadcast %cst_5 : f32 to vector<16x64xf32>
    %8 = arith.maximumf %6, %7 : vector<16x64xf32>
    %9 = arith.truncf %8 : vector<16x64xf32> to vector<16x64xbf16>
    %c0_6 = arith.constant 0 : index
    %c0_7 = arith.constant 0 : index
    %10 = vector.load %arg4[%c0_6, %c0_7] : memref<64x32xbf16, #tpu.memory_space<vmem>>, vector<64x32xbf16>
    %cst_8 = arith.constant dense<0.000000e+00> : vector<16x32xf32>
    %11 = tpu.matmul %9, %10, %cst_8 {dimension_numbers = #tpu.dot_dimension_numbers<[1], [0], [0], [1], [0, 0, 1, 1], [], []>} : vector<16x64xbf16>, vector<64x32xbf16>, vector<16x32xf32> -> vector<16x32xf32>
    %c0_9 = arith.constant 0 : index
    %c0_10 = arith.constant 0 : index
    %12 = vector.load %arg5[%c0_9, %c0_10] : memref<1x32xf32, #tpu.memory_space<vmem>>, vector<1x32xf32>
    %13 = vector.broadcast %12 : vector<1x32xf32> to vector<16x32xf32>
    %14 = arith.addf %11, %13 : vector<16x32xf32>
    %15 = arith.addf %14, %0 : vector<16x32xf32>
    %c0_11 = arith.constant 0 : index
    %c0_12 = arith.constant 0 : index
    %16 = vector.load %arg6[%c0_11, %c0_12] : memref<1x32xf32, #tpu.memory_space<vmem>>, vector<1x32xf32>
    %c0_13 = arith.constant 0 : index
    %c0_14 = arith.constant 0 : index
    %17 = vector.load %arg7[%c0_13, %c0_14] : memref<1x32xf32, #tpu.memory_space<vmem>>, vector<1x32xf32>
    %cst_15 = arith.constant dense<0.000000e+00> : vector<16xf32>
    %18 = vector.multi_reduction <add>, %15, %cst_15 [1] : vector<16x32xf32> to vector<16xf32>
    %19 = vector.shape_cast %18 : vector<16xf32> to vector<16x1xf32>
    %cst_16 = arith.constant 3.200000e+01 : f32
    %20 = vector.broadcast %cst_16 : f32 to vector<16x1xf32>
    %21 = arith.divf %19, %20 : vector<16x1xf32>
    %22 = vector.broadcast %21 : vector<16x1xf32> to vector<16x32xf32>
    %23 = arith.subf %15, %22 : vector<16x32xf32>
    %24 = arith.mulf %23, %23 : vector<16x32xf32>
    %cst_17 = arith.constant dense<0.000000e+00> : vector<16xf32>
    %25 = vector.multi_reduction <add>, %24, %cst_17 [1] : vector<16x32xf32> to vector<16xf32>
    %26 = vector.shape_cast %25 : vector<16xf32> to vector<16x1xf32>
    %cst_18 = arith.constant 3.200000e+01 : f32
    %27 = vector.broadcast %cst_18 : f32 to vector<16x1xf32>
    %28 = arith.divf %26, %27 : vector<16x1xf32>
    %29 = vector.broadcast %21 : vector<16x1xf32> to vector<16x32xf32>
    %30 = arith.subf %15, %29 : vector<16x32xf32>
    %cst_19 = arith.constant 9.99999974E-6 : f32
    %31 = vector.broadcast %cst_19 : f32 to vector<16x1xf32>
    %32 = arith.addf %28, %31 : vector<16x1xf32>
    %33 = math.rsqrt %32 : vector<16x1xf32>
    %34 = vector.broadcast %33 : vector<16x1xf32> to vector<16x32xf32>
    %35 = arith.mulf %30, %34 : vector<16x32xf32>
    %36 = vector.broadcast %16 : vector<1x32xf32> to vector<16x32xf32>
    %37 = arith.mulf %35, %36 : vector<16x32xf32>
    %38 = vector.broadcast %17 : vector<1x32xf32> to vector<16x32xf32>
    %39 = arith.addf %37, %38 : vector<16x32xf32>
    %c0_20 = arith.constant 0 : index
    %c0_21 = arith.constant 0 : index
    %40 = vector.load %arg8[%c0_20, %c0_21] : memref<16x32xf32, #tpu.memory_space<vmem>>, vector<16x32xf32>
    tpu.vector_store %arg8[%c0_20, %c0_21], %39 {strides = array<i32>} : memref<16x32xf32, #tpu.memory_space<vmem>>, vector<16x32xf32>,
    return
  }
  func.func @transform_0(%arg0: i32) -> (i32, i32) {
    %c0_i32 = arith.constant 0 : i32
    %c0_i32_0 = arith.constant 0 : i32
    return %arg0, %c0_i32 : i32, i32
  }
  func.func @transform_1(%arg0: i32) -> (i32, i32) {
    %c0_i32 = arith.constant 0 : i32
    %c0_i32_0 = arith.constant 0 : i32
    %c0_i32_1 = arith.constant 0 : i32
    return %c0_i32, %c0_i32_0 : i32, i32
  }
  func.func @transform_2(%arg0: i32) -> (i32, i32) {
    %c0_i32 = arith.constant 0 : i32
    %c0_i32_0 = arith.constant 0 : i32
    %c0_i32_1 = arith.constant 0 : i32
    return %c0_i32, %c0_i32_0 : i32, i32
  }
  func.func @transform_3(%arg0: i32) -> (i32, i32) {
    %c0_i32 = arith.constant 0 : i32
    %c0_i32_0 = arith.constant 0 : i32
    %c0_i32_1 = arith.constant 0 : i32
    return %c0_i32, %c0_i32_0 : i32, i32
  }
  func.func @transform_4(%arg0: i32) -> (i32, i32) {
    %c0_i32 = arith.constant 0 : i32
    %c0_i32_0 = arith.constant 0 : i32
    %c0_i32_1 = arith.constant 0 : i32
    return %c0_i32, %c0_i32_0 : i32, i32
  }
  func.func @transform_5(%arg0: i32) -> (i32, i32) {
    %c0_i32 = arith.constant 0 : i32
    %c0_i32_0 = arith.constant 0 : i32
    %c0_i32_1 = arith.constant 0 : i32
    return %c0_i32, %c0_i32_0 : i32, i32
  }
  func.func @transform_6(%arg0: i32) -> (i32, i32) {
    %c0_i32 = arith.constant 0 : i32
    %c0_i32_0 = arith.constant 0 : i32
    %c0_i32_1 = arith.constant 0 : i32
    return %c0_i32, %c0_i32_0 : i32, i32
  }
  func.func @transform_7(%arg0: i32) -> (i32, i32) {
    %c0_i32 = arith.constant 0 : i32
    %c0_i32_0 = arith.constant 0 : i32
    return %arg0, %c0_i32 : i32, i32
  }
}

module attributes {stable_mosaic.version = 11 : i64} {
  func.func @kernel(%arg0: i32, %arg1: memref<1x8x96xbf16, #tpu.memory_space<vmem>>, %arg2: memref<1x8x8xi32, #tpu.memory_space<vmem>>, %arg3: memref<1x8x32xf32, #tpu.memory_space<vmem>>, %arg4: memref<32x32xbf16, #tpu.memory_space<vmem>>, %arg5: memref<1x32xf32, #tpu.memory_space<vmem>>, %arg6: memref<1x32xf32, #tpu.memory_space<vmem>>, %arg7: memref<1x32xf32, #tpu.memory_space<vmem>>, %arg8: memref<1x8x32xf32, #tpu.memory_space<vmem>>) attributes {dimension_semantics = [#tpu.dimension_semantics<parallel>], iteration_bounds = array<i64: 2>, scalar_prefetch = 0 : i64, scratch_operands = 0 : i64, tpu.core_type = #tpu.core_type<tc>, window_params = [{transform_indices = @transform_0, window_bounds = array<i64: 1, 8, 96>}, {transform_indices = @transform_1, window_bounds = array<i64: 1, 8, 8>}, {transform_indices = @transform_2, window_bounds = array<i64: 1, 8, 32>}, {pipeline_mode = #tpu.pipeline_mode<synchronous>, transform_indices = @transform_3, window_bounds = array<i64: 32, 32>}, {pipeline_mode = #tpu.pipeline_mode<synchronous>, transform_indices = @transform_4, window_bounds = array<i64: 1, 32>}, {pipeline_mode = #tpu.pipeline_mode<synchronous>, transform_indices = @transform_5, window_bounds = array<i64: 1, 32>}, {pipeline_mode = #tpu.pipeline_mode<synchronous>, transform_indices = @transform_6, window_bounds = array<i64: 1, 32>}, {transform_indices = @transform_7, window_bounds = array<i64: 1, 8, 32>}]} {
    %c0 = arith.constant 0 : index
    %c0_0 = arith.constant 0 : index
    %c0_1 = arith.constant 0 : index
    %0 = vector.load %arg1[%c0, %c0_0, %c0_1] : memref<1x8x96xbf16, #tpu.memory_space<vmem>>, vector<1x8x96xbf16>
    %1 = vector.shape_cast %0 : vector<1x8x96xbf16> to vector<8x96xbf16>
    %2 = vector.extract_strided_slice %1 {offsets = [0, 0], sizes = [8, 32], strides = [1, 1]} : vector<8x96xbf16> to vector<8x32xbf16>
    %3 = vector.extract_strided_slice %1 {offsets = [0, 32], sizes = [8, 32], strides = [1, 1]} : vector<8x96xbf16> to vector<8x32xbf16>
    %4 = vector.extract_strided_slice %1 {offsets = [0, 64], sizes = [8, 32], strides = [1, 1]} : vector<8x96xbf16> to vector<8x32xbf16>
    %c0_2 = arith.constant 0 : index
    %c0_3 = arith.constant 0 : index
    %c0_4 = arith.constant 0 : index
    %5 = vector.load %arg2[%c0_2, %c0_3, %c0_4] : memref<1x8x8xi32, #tpu.memory_space<vmem>>, vector<1x8x8xi32>
    %6 = vector.shape_cast %5 : vector<1x8x8xi32> to vector<8x8xi32>
    %c0_i32 = arith.constant 0 : i32
    %7 = vector.broadcast %c0_i32 : i32 to vector<8x8xi32>
    %8 = arith.cmpi ne, %6, %7 : vector<8x8xi32>
    %9 = vector.extract_strided_slice %2 {offsets = [0, 0], sizes = [8, 8], strides = [1, 1]} : vector<8x32xbf16> to vector<8x8xbf16>
    %10 = vector.extract_strided_slice %3 {offsets = [0, 0], sizes = [8, 8], strides = [1, 1]} : vector<8x32xbf16> to vector<8x8xbf16>
    %11 = vector.extract_strided_slice %4 {offsets = [0, 0], sizes = [8, 8], strides = [1, 1]} : vector<8x32xbf16> to vector<8x8xbf16>
    %cst = arith.constant dense<0.000000e+00> : vector<8x8xf32>
    %12 = tpu.matmul %9, %10, %cst {dimension_numbers = #tpu.dot_dimension_numbers<[1], [1], [0], [0], [0, 0, 1, 0], [], []>} : vector<8x8xbf16>, vector<8x8xbf16>, vector<8x8xf32> -> vector<8x8xf32>
    %cst_5 = arith.constant 0.353553385 : f32
    %13 = vector.broadcast %cst_5 : f32 to vector<8x8xf32>
    %14 = arith.mulf %12, %13 : vector<8x8xf32>
    %cst_6 = arith.constant -1.000000e+10 : f32
    %15 = vector.broadcast %cst_6 : f32 to vector<8x8xf32>
    %16 = arith.select %8, %14, %15 : vector<8x8xi1>, vector<8x8xf32>
    %cst_7 = arith.constant dense<0xFF800000> : vector<8xf32>
    %17 = vector.multi_reduction <maximumf>, %16, %cst_7 [1] : vector<8x8xf32> to vector<8xf32>
    %18 = vector.shape_cast %17 : vector<8xf32> to vector<8x1xf32>
    %19 = vector.broadcast %18 : vector<8x1xf32> to vector<8x8xf32>
    %20 = arith.subf %16, %19 : vector<8x8xf32>
    %21 = math.exp %20 : vector<8x8xf32>
    %cst_8 = arith.constant dense<0.000000e+00> : vector<8xf32>
    %22 = vector.multi_reduction <add>, %21, %cst_8 [1] : vector<8x8xf32> to vector<8xf32>
    %23 = vector.shape_cast %22 : vector<8xf32> to vector<8x1xf32>
    %24 = tpu.reciprocal %23 {approx = true} : vector<8x1xf32> -> vector<8x1xf32>
    %25 = vector.broadcast %24 : vector<8x1xf32> to vector<8x8xf32>
    %26 = arith.mulf %21, %25 : vector<8x8xf32>
    %27 = arith.truncf %26 : vector<8x8xf32> to vector<8x8xbf16>
    %cst_9 = arith.constant dense<0.000000e+00> : vector<8x8xf32>
    %28 = tpu.matmul %27, %11, %cst_9 {dimension_numbers = #tpu.dot_dimension_numbers<[1], [0], [0], [1], [0, 0, 1, 1], [], []>} : vector<8x8xbf16>, vector<8x8xbf16>, vector<8x8xf32> -> vector<8x8xf32>
    %29 = vector.extract_strided_slice %2 {offsets = [0, 8], sizes = [8, 8], strides = [1, 1]} : vector<8x32xbf16> to vector<8x8xbf16>
    %30 = vector.extract_strided_slice %3 {offsets = [0, 8], sizes = [8, 8], strides = [1, 1]} : vector<8x32xbf16> to vector<8x8xbf16>
    %31 = vector.extract_strided_slice %4 {offsets = [0, 8], sizes = [8, 8], strides = [1, 1]} : vector<8x32xbf16> to vector<8x8xbf16>
    %cst_10 = arith.constant dense<0.000000e+00> : vector<8x8xf32>
    %32 = tpu.matmul %29, %30, %cst_10 {dimension_numbers = #tpu.dot_dimension_numbers<[1], [1], [0], [0], [0, 0, 1, 0], [], []>} : vector<8x8xbf16>, vector<8x8xbf16>, vector<8x8xf32> -> vector<8x8xf32>
    %cst_11 = arith.constant 0.353553385 : f32
    %33 = vector.broadcast %cst_11 : f32 to vector<8x8xf32>
    %34 = arith.mulf %32, %33 : vector<8x8xf32>
    %cst_12 = arith.constant -1.000000e+10 : f32
    %35 = vector.broadcast %cst_12 : f32 to vector<8x8xf32>
    %36 = arith.select %8, %34, %35 : vector<8x8xi1>, vector<8x8xf32>
    %cst_13 = arith.constant dense<0xFF800000> : vector<8xf32>
    %37 = vector.multi_reduction <maximumf>, %36, %cst_13 [1] : vector<8x8xf32> to vector<8xf32>
    %38 = vector.shape_cast %37 : vector<8xf32> to vector<8x1xf32>
    %39 = vector.broadcast %38 : vector<8x1xf32> to vector<8x8xf32>
    %40 = arith.subf %36, %39 : vector<8x8xf32>
    %41 = math.exp %40 : vector<8x8xf32>
    %cst_14 = arith.constant dense<0.000000e+00> : vector<8xf32>
    %42 = vector.multi_reduction <add>, %41, %cst_14 [1] : vector<8x8xf32> to vector<8xf32>
    %43 = vector.shape_cast %42 : vector<8xf32> to vector<8x1xf32>
    %44 = tpu.reciprocal %43 {approx = true} : vector<8x1xf32> -> vector<8x1xf32>
    %45 = vector.broadcast %44 : vector<8x1xf32> to vector<8x8xf32>
    %46 = arith.mulf %41, %45 : vector<8x8xf32>
    %47 = arith.truncf %46 : vector<8x8xf32> to vector<8x8xbf16>
    %cst_15 = arith.constant dense<0.000000e+00> : vector<8x8xf32>
    %48 = tpu.matmul %47, %31, %cst_15 {dimension_numbers = #tpu.dot_dimension_numbers<[1], [0], [0], [1], [0, 0, 1, 1], [], []>} : vector<8x8xbf16>, vector<8x8xbf16>, vector<8x8xf32> -> vector<8x8xf32>
    %49 = vector.extract_strided_slice %2 {offsets = [0, 16], sizes = [8, 8], strides = [1, 1]} : vector<8x32xbf16> to vector<8x8xbf16>
    %50 = vector.extract_strided_slice %3 {offsets = [0, 16], sizes = [8, 8], strides = [1, 1]} : vector<8x32xbf16> to vector<8x8xbf16>
    %51 = vector.extract_strided_slice %4 {offsets = [0, 16], sizes = [8, 8], strides = [1, 1]} : vector<8x32xbf16> to vector<8x8xbf16>
    %cst_16 = arith.constant dense<0.000000e+00> : vector<8x8xf32>
    %52 = tpu.matmul %49, %50, %cst_16 {dimension_numbers = #tpu.dot_dimension_numbers<[1], [1], [0], [0], [0, 0, 1, 0], [], []>} : vector<8x8xbf16>, vector<8x8xbf16>, vector<8x8xf32> -> vector<8x8xf32>
    %cst_17 = arith.constant 0.353553385 : f32
    %53 = vector.broadcast %cst_17 : f32 to vector<8x8xf32>
    %54 = arith.mulf %52, %53 : vector<8x8xf32>
    %cst_18 = arith.constant -1.000000e+10 : f32
    %55 = vector.broadcast %cst_18 : f32 to vector<8x8xf32>
    %56 = arith.select %8, %54, %55 : vector<8x8xi1>, vector<8x8xf32>
    %cst_19 = arith.constant dense<0xFF800000> : vector<8xf32>
    %57 = vector.multi_reduction <maximumf>, %56, %cst_19 [1] : vector<8x8xf32> to vector<8xf32>
    %58 = vector.shape_cast %57 : vector<8xf32> to vector<8x1xf32>
    %59 = vector.broadcast %58 : vector<8x1xf32> to vector<8x8xf32>
    %60 = arith.subf %56, %59 : vector<8x8xf32>
    %61 = math.exp %60 : vector<8x8xf32>
    %cst_20 = arith.constant dense<0.000000e+00> : vector<8xf32>
    %62 = vector.multi_reduction <add>, %61, %cst_20 [1] : vector<8x8xf32> to vector<8xf32>
    %63 = vector.shape_cast %62 : vector<8xf32> to vector<8x1xf32>
    %64 = tpu.reciprocal %63 {approx = true} : vector<8x1xf32> -> vector<8x1xf32>
    %65 = vector.broadcast %64 : vector<8x1xf32> to vector<8x8xf32>
    %66 = arith.mulf %61, %65 : vector<8x8xf32>
    %67 = arith.truncf %66 : vector<8x8xf32> to vector<8x8xbf16>
    %cst_21 = arith.constant dense<0.000000e+00> : vector<8x8xf32>
    %68 = tpu.matmul %67, %51, %cst_21 {dimension_numbers = #tpu.dot_dimension_numbers<[1], [0], [0], [1], [0, 0, 1, 1], [], []>} : vector<8x8xbf16>, vector<8x8xbf16>, vector<8x8xf32> -> vector<8x8xf32>
    %69 = vector.extract_strided_slice %2 {offsets = [0, 24], sizes = [8, 8], strides = [1, 1]} : vector<8x32xbf16> to vector<8x8xbf16>
    %70 = vector.extract_strided_slice %3 {offsets = [0, 24], sizes = [8, 8], strides = [1, 1]} : vector<8x32xbf16> to vector<8x8xbf16>
    %71 = vector.extract_strided_slice %4 {offsets = [0, 24], sizes = [8, 8], strides = [1, 1]} : vector<8x32xbf16> to vector<8x8xbf16>
    %cst_22 = arith.constant dense<0.000000e+00> : vector<8x8xf32>
    %72 = tpu.matmul %69, %70, %cst_22 {dimension_numbers = #tpu.dot_dimension_numbers<[1], [1], [0], [0], [0, 0, 1, 0], [], []>} : vector<8x8xbf16>, vector<8x8xbf16>, vector<8x8xf32> -> vector<8x8xf32>
    %cst_23 = arith.constant 0.353553385 : f32
    %73 = vector.broadcast %cst_23 : f32 to vector<8x8xf32>
    %74 = arith.mulf %72, %73 : vector<8x8xf32>
    %cst_24 = arith.constant -1.000000e+10 : f32
    %75 = vector.broadcast %cst_24 : f32 to vector<8x8xf32>
    %76 = arith.select %8, %74, %75 : vector<8x8xi1>, vector<8x8xf32>
    %cst_25 = arith.constant dense<0xFF800000> : vector<8xf32>
    %77 = vector.multi_reduction <maximumf>, %76, %cst_25 [1] : vector<8x8xf32> to vector<8xf32>
    %78 = vector.shape_cast %77 : vector<8xf32> to vector<8x1xf32>
    %79 = vector.broadcast %78 : vector<8x1xf32> to vector<8x8xf32>
    %80 = arith.subf %76, %79 : vector<8x8xf32>
    %81 = math.exp %80 : vector<8x8xf32>
    %cst_26 = arith.constant dense<0.000000e+00> : vector<8xf32>
    %82 = vector.multi_reduction <add>, %81, %cst_26 [1] : vector<8x8xf32> to vector<8xf32>
    %83 = vector.shape_cast %82 : vector<8xf32> to vector<8x1xf32>
    %84 = tpu.reciprocal %83 {approx = true} : vector<8x1xf32> -> vector<8x1xf32>
    %85 = vector.broadcast %84 : vector<8x1xf32> to vector<8x8xf32>
    %86 = arith.mulf %81, %85 : vector<8x8xf32>
    %87 = arith.truncf %86 : vector<8x8xf32> to vector<8x8xbf16>
    %cst_27 = arith.constant dense<0.000000e+00> : vector<8x8xf32>
    %88 = tpu.matmul %87, %71, %cst_27 {dimension_numbers = #tpu.dot_dimension_numbers<[1], [0], [0], [1], [0, 0, 1, 1], [], []>} : vector<8x8xbf16>, vector<8x8xbf16>, vector<8x8xf32> -> vector<8x8xf32>
    %89 = tpu.concatenate %28, %48, %68, %88 in 1 : vector<8x8xf32>, vector<8x8xf32>, vector<8x8xf32>, vector<8x8xf32> -> vector<8x32xf32>
    %c0_28 = arith.constant 0 : index
    %c0_29 = arith.constant 0 : index
    %90 = vector.load %arg4[%c0_28, %c0_29] : memref<32x32xbf16, #tpu.memory_space<vmem>>, vector<32x32xbf16>
    %c0_30 = arith.constant 0 : index
    %c0_31 = arith.constant 0 : index
    %91 = vector.load %arg5[%c0_30, %c0_31] : memref<1x32xf32, #tpu.memory_space<vmem>>, vector<1x32xf32>
    %c0_32 = arith.constant 0 : index
    %c0_33 = arith.constant 0 : index
    %c0_34 = arith.constant 0 : index
    %92 = vector.load %arg3[%c0_32, %c0_33, %c0_34] : memref<1x8x32xf32, #tpu.memory_space<vmem>>, vector<1x8x32xf32>
    %93 = vector.shape_cast %92 : vector<1x8x32xf32> to vector<8x32xf32>
    %c0_35 = arith.constant 0 : index
    %c0_36 = arith.constant 0 : index
    %94 = vector.load %arg6[%c0_35, %c0_36] : memref<1x32xf32, #tpu.memory_space<vmem>>, vector<1x32xf32>
    %c0_37 = arith.constant 0 : index
    %c0_38 = arith.constant 0 : index
    %95 = vector.load %arg7[%c0_37, %c0_38] : memref<1x32xf32, #tpu.memory_space<vmem>>, vector<1x32xf32>
    %96 = arith.truncf %89 : vector<8x32xf32> to vector<8x32xbf16>
    %cst_39 = arith.constant dense<0.000000e+00> : vector<8x32xf32>
    %97 = tpu.matmul %96, %90, %cst_39 {dimension_numbers = #tpu.dot_dimension_numbers<[1], [0], [0], [1], [0, 0, 1, 1], [], []>} : vector<8x32xbf16>, vector<32x32xbf16>, vector<8x32xf32> -> vector<8x32xf32>
    %98 = vector.broadcast %91 : vector<1x32xf32> to vector<8x32xf32>
    %99 = arith.addf %97, %98 : vector<8x32xf32>
    %100 = arith.addf %99, %93 : vector<8x32xf32>
    %cst_40 = arith.constant dense<0.000000e+00> : vector<8xf32>
    %101 = vector.multi_reduction <add>, %100, %cst_40 [1] : vector<8x32xf32> to vector<8xf32>
    %102 = vector.shape_cast %101 : vector<8xf32> to vector<8x1xf32>
    %cst_41 = arith.constant 3.200000e+01 : f32
    %103 = vector.broadcast %cst_41 : f32 to vector<8x1xf32>
    %104 = arith.divf %102, %103 : vector<8x1xf32>
    %105 = vector.broadcast %104 : vector<8x1xf32> to vector<8x32xf32>
    %106 = arith.subf %100, %105 : vector<8x32xf32>
    %107 = arith.mulf %106, %106 : vector<8x32xf32>
    %cst_42 = arith.constant dense<0.000000e+00> : vector<8xf32>
    %108 = vector.multi_reduction <add>, %107, %cst_42 [1] : vector<8x32xf32> to vector<8xf32>
    %109 = vector.shape_cast %108 : vector<8xf32> to vector<8x1xf32>
    %cst_43 = arith.constant 3.200000e+01 : f32
    %110 = vector.broadcast %cst_43 : f32 to vector<8x1xf32>
    %111 = arith.divf %109, %110 : vector<8x1xf32>
    %112 = vector.broadcast %104 : vector<8x1xf32> to vector<8x32xf32>
    %113 = arith.subf %100, %112 : vector<8x32xf32>
    %cst_44 = arith.constant 9.99999974E-6 : f32
    %114 = vector.broadcast %cst_44 : f32 to vector<8x1xf32>
    %115 = arith.addf %111, %114 : vector<8x1xf32>
    %116 = math.rsqrt %115 : vector<8x1xf32>
    %117 = vector.broadcast %116 : vector<8x1xf32> to vector<8x32xf32>
    %118 = arith.mulf %113, %117 : vector<8x32xf32>
    %119 = vector.broadcast %94 : vector<1x32xf32> to vector<8x32xf32>
    %120 = arith.mulf %118, %119 : vector<8x32xf32>
    %121 = vector.broadcast %95 : vector<1x32xf32> to vector<8x32xf32>
    %122 = arith.addf %120, %121 : vector<8x32xf32>
    %c0_45 = arith.constant 0 : index
    %c0_46 = arith.constant 0 : index
    %c0_47 = arith.constant 0 : index
    %123 = vector.load %arg8[%c0_45, %c0_46, %c0_47] : memref<1x8x32xf32, #tpu.memory_space<vmem>>, vector<1x8x32xf32>
    %124 = vector.shape_cast %123 : vector<1x8x32xf32> to vector<8x32xf32>
    %125 = vector.shape_cast %122 : vector<8x32xf32> to vector<1x8x32xf32>
    tpu.vector_store %arg8[%c0_45, %c0_46, %c0_47], %125 {strides = array<i32>} : memref<1x8x32xf32, #tpu.memory_space<vmem>>, vector<1x8x32xf32>,
    return
  }
  func.func @transform_0(%arg0: i32) -> (i32, i32, i32) {
    %c0_i32 = arith.constant 0 : i32
    %c0_i32_0 = arith.constant 0 : i32
    %c0_i32_1 = arith.constant 0 : i32
    return %arg0, %c0_i32, %c0_i32_0 : i32, i32, i32
  }
  func.func @transform_1(%arg0: i32) -> (i32, i32, i32) {
    %c0_i32 = arith.constant 0 : i32
    %c0_i32_0 = arith.constant 0 : i32
    %c0_i32_1 = arith.constant 0 : i32
    return %arg0, %c0_i32, %c0_i32_0 : i32, i32, i32
  }
  func.func @transform_2(%arg0: i32) -> (i32, i32, i32) {
    %c0_i32 = arith.constant 0 : i32
    %c0_i32_0 = arith.constant 0 : i32
    %c0_i32_1 = arith.constant 0 : i32
    return %arg0, %c0_i32, %c0_i32_0 : i32, i32, i32
  }
  func.func @transform_3(%arg0: i32) -> (i32, i32) {
    %c0_i32 = arith.constant 0 : i32
    %c0_i32_0 = arith.constant 0 : i32
    %c0_i32_1 = arith.constant 0 : i32
    return %c0_i32, %c0_i32_0 : i32, i32
  }
  func.func @transform_4(%arg0: i32) -> (i32, i32) {
    %c0_i32 = arith.constant 0 : i32
    %c0_i32_0 = arith.constant 0 : i32
    %c0_i32_1 = arith.constant 0 : i32
    return %c0_i32, %c0_i32_0 : i32, i32
  }
  func.func @transform_5(%arg0: i32) -> (i32, i32) {
    %c0_i32 = arith.constant 0 : i32
    %c0_i32_0 = arith.constant 0 : i32
    %c0_i32_1 = arith.constant 0 : i32
    return %c0_i32, %c0_i32_0 : i32, i32
  }
  func.func @transform_6(%arg0: i32) -> (i32, i32) {
    %c0_i32 = arith.constant 0 : i32
    %c0_i32_0 = arith.constant 0 : i32
    %c0_i32_1 = arith.constant 0 : i32
    return %c0_i32, %c0_i32_0 : i32, i32
  }
  func.func @transform_7(%arg0: i32) -> (i32, i32, i32) {
    %c0_i32 = arith.constant 0 : i32
    %c0_i32_0 = arith.constant 0 : i32
    %c0_i32_1 = arith.constant 0 : i32
    return %arg0, %c0_i32, %c0_i32_0 : i32, i32, i32
  }
}

module attributes {stable_mosaic.version = 11 : i64} {
  func.func @kernel(%arg0: i32, %arg1: memref<1x8x96xbf16, #tpu.memory_space<vmem>>, %arg2: memref<1x8x8xi32, #tpu.memory_space<vmem>>, %arg3: memref<1x8x32xf32, #tpu.memory_space<vmem>>, %arg4: memref<32x32xbf16, #tpu.memory_space<vmem>>, %arg5: memref<1x32xf32, #tpu.memory_space<vmem>>, %arg6: memref<1x32xf32, #tpu.memory_space<vmem>>, %arg7: memref<1x32xf32, #tpu.memory_space<vmem>>, %arg8: memref<1x8x32xf32, #tpu.memory_space<vmem>>, %arg9: memref<1x4x8x8xf32, #tpu.memory_space<vmem>>) attributes {dimension_semantics = [#tpu.dimension_semantics<parallel>], iteration_bounds = array<i64: 2>, scalar_prefetch = 0 : i64, scratch_operands = 0 : i64, tpu.core_type = #tpu.core_type<tc>, window_params = [{transform_indices = @transform_0, window_bounds = array<i64: 1, 8, 96>}, {transform_indices = @transform_1, window_bounds = array<i64: 1, 8, 8>}, {transform_indices = @transform_2, window_bounds = array<i64: 1, 8, 32>}, {pipeline_mode = #tpu.pipeline_mode<synchronous>, transform_indices = @transform_3, window_bounds = array<i64: 32, 32>}, {pipeline_mode = #tpu.pipeline_mode<synchronous>, transform_indices = @transform_4, window_bounds = array<i64: 1, 32>}, {pipeline_mode = #tpu.pipeline_mode<synchronous>, transform_indices = @transform_5, window_bounds = array<i64: 1, 32>}, {pipeline_mode = #tpu.pipeline_mode<synchronous>, transform_indices = @transform_6, window_bounds = array<i64: 1, 32>}, {transform_indices = @transform_7, window_bounds = array<i64: 1, 8, 32>}, {transform_indices = @transform_8, window_bounds = array<i64: 1, 4, 8, 8>}]} {
    %c0 = arith.constant 0 : index
    %c0_0 = arith.constant 0 : index
    %c0_1 = arith.constant 0 : index
    %0 = vector.load %arg1[%c0, %c0_0, %c0_1] : memref<1x8x96xbf16, #tpu.memory_space<vmem>>, vector<1x8x96xbf16>
    %1 = vector.shape_cast %0 : vector<1x8x96xbf16> to vector<8x96xbf16>
    %2 = vector.extract_strided_slice %1 {offsets = [0, 0], sizes = [8, 32], strides = [1, 1]} : vector<8x96xbf16> to vector<8x32xbf16>
    %3 = vector.extract_strided_slice %1 {offsets = [0, 32], sizes = [8, 32], strides = [1, 1]} : vector<8x96xbf16> to vector<8x32xbf16>
    %4 = vector.extract_strided_slice %1 {offsets = [0, 64], sizes = [8, 32], strides = [1, 1]} : vector<8x96xbf16> to vector<8x32xbf16>
    %c0_2 = arith.constant 0 : index
    %c0_3 = arith.constant 0 : index
    %c0_4 = arith.constant 0 : index
    %5 = vector.load %arg2[%c0_2, %c0_3, %c0_4] : memref<1x8x8xi32, #tpu.memory_space<vmem>>, vector<1x8x8xi32>
    %6 = vector.shape_cast %5 : vector<1x8x8xi32> to vector<8x8xi32>
    %c0_i32 = arith.constant 0 : i32
    %7 = vector.broadcast %c0_i32 : i32 to vector<8x8xi32>
    %8 = arith.cmpi ne, %6, %7 : vector<8x8xi32>
    %9 = vector.extract_strided_slice %2 {offsets = [0, 0], sizes = [8, 8], strides = [1, 1]} : vector<8x32xbf16> to vector<8x8xbf16>
    %10 = vector.extract_strided_slice %3 {offsets = [0, 0], sizes = [8, 8], strides = [1, 1]} : vector<8x32xbf16> to vector<8x8xbf16>
    %11 = vector.extract_strided_slice %4 {offsets = [0, 0], sizes = [8, 8], strides = [1, 1]} : vector<8x32xbf16> to vector<8x8xbf16>
    %cst = arith.constant dense<0.000000e+00> : vector<8x8xf32>
    %12 = tpu.matmul %9, %10, %cst {dimension_numbers = #tpu.dot_dimension_numbers<[1], [1], [0], [0], [0, 0, 1, 0], [], []>} : vector<8x8xbf16>, vector<8x8xbf16>, vector<8x8xf32> -> vector<8x8xf32>
    %cst_5 = arith.constant 0.353553385 : f32
    %13 = vector.broadcast %cst_5 : f32 to vector<8x8xf32>
    %14 = arith.mulf %12, %13 : vector<8x8xf32>
    %cst_6 = arith.constant -1.000000e+10 : f32
    %15 = vector.broadcast %cst_6 : f32 to vector<8x8xf32>
    %16 = arith.select %8, %14, %15 : vector<8x8xi1>, vector<8x8xf32>
    %cst_7 = arith.constant dense<0xFF800000> : vector<8xf32>
    %17 = vector.multi_reduction <maximumf>, %16, %cst_7 [1] : vector<8x8xf32> to vector<8xf32>
    %18 = vector.shape_cast %17 : vector<8xf32> to vector<8x1xf32>
    %19 = vector.broadcast %18 : vector<8x1xf32> to vector<8x8xf32>
    %20 = arith.subf %16, %19 : vector<8x8xf32>
    %21 = math.exp %20 : vector<8x8xf32>
    %cst_8 = arith.constant dense<0.000000e+00> : vector<8xf32>
    %22 = vector.multi_reduction <add>, %21, %cst_8 [1] : vector<8x8xf32> to vector<8xf32>
    %23 = vector.shape_cast %22 : vector<8xf32> to vector<8x1xf32>
    %24 = tpu.reciprocal %23 {approx = true} : vector<8x1xf32> -> vector<8x1xf32>
    %25 = vector.broadcast %24 : vector<8x1xf32> to vector<8x8xf32>
    %26 = arith.mulf %21, %25 : vector<8x8xf32>
    %c0_9 = arith.constant 0 : index
    %c0_10 = arith.constant 0 : index
    %c0_11 = arith.constant 0 : index
    %c0_12 = arith.constant 0 : index
    %27 = vector.load %arg9[%c0_9, %c0_10, %c0_11, %c0_12] : memref<1x4x8x8xf32, #tpu.memory_space<vmem>>, vector<1x1x8x8xf32>
    %28 = vector.shape_cast %27 : vector<1x1x8x8xf32> to vector<8x8xf32>
    %29 = vector.shape_cast %26 : vector<8x8xf32> to vector<1x1x8x8xf32>
    tpu.vector_store %arg9[%c0_9, %c0_10, %c0_11, %c0_12], %29 {strides = array<i32>} : memref<1x4x8x8xf32, #tpu.memory_space<vmem>>, vector<1x1x8x8xf32>,
    %30 = arith.truncf %26 : vector<8x8xf32> to vector<8x8xbf16>
    %cst_13 = arith.constant dense<0.000000e+00> : vector<8x8xf32>
    %31 = tpu.matmul %30, %11, %cst_13 {dimension_numbers = #tpu.dot_dimension_numbers<[1], [0], [0], [1], [0, 0, 1, 1], [], []>} : vector<8x8xbf16>, vector<8x8xbf16>, vector<8x8xf32> -> vector<8x8xf32>
    %32 = vector.extract_strided_slice %2 {offsets = [0, 8], sizes = [8, 8], strides = [1, 1]} : vector<8x32xbf16> to vector<8x8xbf16>
    %33 = vector.extract_strided_slice %3 {offsets = [0, 8], sizes = [8, 8], strides = [1, 1]} : vector<8x32xbf16> to vector<8x8xbf16>
    %34 = vector.extract_strided_slice %4 {offsets = [0, 8], sizes = [8, 8], strides = [1, 1]} : vector<8x32xbf16> to vector<8x8xbf16>
    %cst_14 = arith.constant dense<0.000000e+00> : vector<8x8xf32>
    %35 = tpu.matmul %32, %33, %cst_14 {dimension_numbers = #tpu.dot_dimension_numbers<[1], [1], [0], [0], [0, 0, 1, 0], [], []>} : vector<8x8xbf16>, vector<8x8xbf16>, vector<8x8xf32> -> vector<8x8xf32>
    %cst_15 = arith.constant 0.353553385 : f32
    %36 = vector.broadcast %cst_15 : f32 to vector<8x8xf32>
    %37 = arith.mulf %35, %36 : vector<8x8xf32>
    %cst_16 = arith.constant -1.000000e+10 : f32
    %38 = vector.broadcast %cst_16 : f32 to vector<8x8xf32>
    %39 = arith.select %8, %37, %38 : vector<8x8xi1>, vector<8x8xf32>
    %cst_17 = arith.constant dense<0xFF800000> : vector<8xf32>
    %40 = vector.multi_reduction <maximumf>, %39, %cst_17 [1] : vector<8x8xf32> to vector<8xf32>
    %41 = vector.shape_cast %40 : vector<8xf32> to vector<8x1xf32>
    %42 = vector.broadcast %41 : vector<8x1xf32> to vector<8x8xf32>
    %43 = arith.subf %39, %42 : vector<8x8xf32>
    %44 = math.exp %43 : vector<8x8xf32>
    %cst_18 = arith.constant dense<0.000000e+00> : vector<8xf32>
    %45 = vector.multi_reduction <add>, %44, %cst_18 [1] : vector<8x8xf32> to vector<8xf32>
    %46 = vector.shape_cast %45 : vector<8xf32> to vector<8x1xf32>
    %47 = tpu.reciprocal %46 {approx = true} : vector<8x1xf32> -> vector<8x1xf32>
    %48 = vector.broadcast %47 : vector<8x1xf32> to vector<8x8xf32>
    %49 = arith.mulf %44, %48 : vector<8x8xf32>
    %c0_19 = arith.constant 0 : index
    %c1 = arith.constant 1 : index
    %c0_20 = arith.constant 0 : index
    %c0_21 = arith.constant 0 : index
    %50 = vector.load %arg9[%c0_19, %c1, %c0_20, %c0_21] : memref<1x4x8x8xf32, #tpu.memory_space<vmem>>, vector<1x1x8x8xf32>
    %51 = vector.shape_cast %50 : vector<1x1x8x8xf32> to vector<8x8xf32>
    %52 = vector.shape_cast %49 : vector<8x8xf32> to vector<1x1x8x8xf32>
    tpu.vector_store %arg9[%c0_19, %c1, %c0_20, %c0_21], %52 {strides = array<i32>} : memref<1x4x8x8xf32, #tpu.memory_space<vmem>>, vector<1x1x8x8xf32>,
    %53 = arith.truncf %49 : vector<8x8xf32> to vector<8x8xbf16>
    %cst_22 = arith.constant dense<0.000000e+00> : vector<8x8xf32>
    %54 = tpu.matmul %53, %34, %cst_22 {dimension_numbers = #tpu.dot_dimension_numbers<[1], [0], [0], [1], [0, 0, 1, 1], [], []>} : vector<8x8xbf16>, vector<8x8xbf16>, vector<8x8xf32> -> vector<8x8xf32>
    %55 = vector.extract_strided_slice %2 {offsets = [0, 16], sizes = [8, 8], strides = [1, 1]} : vector<8x32xbf16> to vector<8x8xbf16>
    %56 = vector.extract_strided_slice %3 {offsets = [0, 16], sizes = [8, 8], strides = [1, 1]} : vector<8x32xbf16> to vector<8x8xbf16>
    %57 = vector.extract_strided_slice %4 {offsets = [0, 16], sizes = [8, 8], strides = [1, 1]} : vector<8x32xbf16> to vector<8x8xbf16>
    %cst_23 = arith.constant dense<0.000000e+00> : vector<8x8xf32>
    %58 = tpu.matmul %55, %56, %cst_23 {dimension_numbers = #tpu.dot_dimension_numbers<[1], [1], [0], [0], [0, 0, 1, 0], [], []>} : vector<8x8xbf16>, vector<8x8xbf16>, vector<8x8xf32> -> vector<8x8xf32>
    %cst_24 = arith.constant 0.353553385 : f32
    %59 = vector.broadcast %cst_24 : f32 to vector<8x8xf32>
    %60 = arith.mulf %58, %59 : vector<8x8xf32>
    %cst_25 = arith.constant -1.000000e+10 : f32
    %61 = vector.broadcast %cst_25 : f32 to vector<8x8xf32>
    %62 = arith.select %8, %60, %61 : vector<8x8xi1>, vector<8x8xf32>
    %cst_26 = arith.constant dense<0xFF800000> : vector<8xf32>
    %63 = vector.multi_reduction <maximumf>, %62, %cst_26 [1] : vector<8x8xf32> to vector<8xf32>
    %64 = vector.shape_cast %63 : vector<8xf32> to vector<8x1xf32>
    %65 = vector.broadcast %64 : vector<8x1xf32> to vector<8x8xf32>
    %66 = arith.subf %62, %65 : vector<8x8xf32>
    %67 = math.exp %66 : vector<8x8xf32>
    %cst_27 = arith.constant dense<0.000000e+00> : vector<8xf32>
    %68 = vector.multi_reduction <add>, %67, %cst_27 [1] : vector<8x8xf32> to vector<8xf32>
    %69 = vector.shape_cast %68 : vector<8xf32> to vector<8x1xf32>
    %70 = tpu.reciprocal %69 {approx = true} : vector<8x1xf32> -> vector<8x1xf32>
    %71 = vector.broadcast %70 : vector<8x1xf32> to vector<8x8xf32>
    %72 = arith.mulf %67, %71 : vector<8x8xf32>
    %c0_28 = arith.constant 0 : index
    %c2 = arith.constant 2 : index
    %c0_29 = arith.constant 0 : index
    %c0_30 = arith.constant 0 : index
    %73 = vector.load %arg9[%c0_28, %c2, %c0_29, %c0_30] : memref<1x4x8x8xf32, #tpu.memory_space<vmem>>, vector<1x1x8x8xf32>
    %74 = vector.shape_cast %73 : vector<1x1x8x8xf32> to vector<8x8xf32>
    %75 = vector.shape_cast %72 : vector<8x8xf32> to vector<1x1x8x8xf32>
    tpu.vector_store %arg9[%c0_28, %c2, %c0_29, %c0_30], %75 {strides = array<i32>} : memref<1x4x8x8xf32, #tpu.memory_space<vmem>>, vector<1x1x8x8xf32>,
    %76 = arith.truncf %72 : vector<8x8xf32> to vector<8x8xbf16>
    %cst_31 = arith.constant dense<0.000000e+00> : vector<8x8xf32>
    %77 = tpu.matmul %76, %57, %cst_31 {dimension_numbers = #tpu.dot_dimension_numbers<[1], [0], [0], [1], [0, 0, 1, 1], [], []>} : vector<8x8xbf16>, vector<8x8xbf16>, vector<8x8xf32> -> vector<8x8xf32>
    %78 = vector.extract_strided_slice %2 {offsets = [0, 24], sizes = [8, 8], strides = [1, 1]} : vector<8x32xbf16> to vector<8x8xbf16>
    %79 = vector.extract_strided_slice %3 {offsets = [0, 24], sizes = [8, 8], strides = [1, 1]} : vector<8x32xbf16> to vector<8x8xbf16>
    %80 = vector.extract_strided_slice %4 {offsets = [0, 24], sizes = [8, 8], strides = [1, 1]} : vector<8x32xbf16> to vector<8x8xbf16>
    %cst_32 = arith.constant dense<0.000000e+00> : vector<8x8xf32>
    %81 = tpu.matmul %78, %79, %cst_32 {dimension_numbers = #tpu.dot_dimension_numbers<[1], [1], [0], [0], [0, 0, 1, 0], [], []>} : vector<8x8xbf16>, vector<8x8xbf16>, vector<8x8xf32> -> vector<8x8xf32>
    %cst_33 = arith.constant 0.353553385 : f32
    %82 = vector.broadcast %cst_33 : f32 to vector<8x8xf32>
    %83 = arith.mulf %81, %82 : vector<8x8xf32>
    %cst_34 = arith.constant -1.000000e+10 : f32
    %84 = vector.broadcast %cst_34 : f32 to vector<8x8xf32>
    %85 = arith.select %8, %83, %84 : vector<8x8xi1>, vector<8x8xf32>
    %cst_35 = arith.constant dense<0xFF800000> : vector<8xf32>
    %86 = vector.multi_reduction <maximumf>, %85, %cst_35 [1] : vector<8x8xf32> to vector<8xf32>
    %87 = vector.shape_cast %86 : vector<8xf32> to vector<8x1xf32>
    %88 = vector.broadcast %87 : vector<8x1xf32> to vector<8x8xf32>
    %89 = arith.subf %85, %88 : vector<8x8xf32>
    %90 = math.exp %89 : vector<8x8xf32>
    %cst_36 = arith.constant dense<0.000000e+00> : vector<8xf32>
    %91 = vector.multi_reduction <add>, %90, %cst_36 [1] : vector<8x8xf32> to vector<8xf32>
    %92 = vector.shape_cast %91 : vector<8xf32> to vector<8x1xf32>
    %93 = tpu.reciprocal %92 {approx = true} : vector<8x1xf32> -> vector<8x1xf32>
    %94 = vector.broadcast %93 : vector<8x1xf32> to vector<8x8xf32>
    %95 = arith.mulf %90, %94 : vector<8x8xf32>
    %c0_37 = arith.constant 0 : index
    %c3 = arith.constant 3 : index
    %c0_38 = arith.constant 0 : index
    %c0_39 = arith.constant 0 : index
    %96 = vector.load %arg9[%c0_37, %c3, %c0_38, %c0_39] : memref<1x4x8x8xf32, #tpu.memory_space<vmem>>, vector<1x1x8x8xf32>
    %97 = vector.shape_cast %96 : vector<1x1x8x8xf32> to vector<8x8xf32>
    %98 = vector.shape_cast %95 : vector<8x8xf32> to vector<1x1x8x8xf32>
    tpu.vector_store %arg9[%c0_37, %c3, %c0_38, %c0_39], %98 {strides = array<i32>} : memref<1x4x8x8xf32, #tpu.memory_space<vmem>>, vector<1x1x8x8xf32>,
    %99 = arith.truncf %95 : vector<8x8xf32> to vector<8x8xbf16>
    %cst_40 = arith.constant dense<0.000000e+00> : vector<8x8xf32>
    %100 = tpu.matmul %99, %80, %cst_40 {dimension_numbers = #tpu.dot_dimension_numbers<[1], [0], [0], [1], [0, 0, 1, 1], [], []>} : vector<8x8xbf16>, vector<8x8xbf16>, vector<8x8xf32> -> vector<8x8xf32>
    %101 = tpu.concatenate %31, %54, %77, %100 in 1 : vector<8x8xf32>, vector<8x8xf32>, vector<8x8xf32>, vector<8x8xf32> -> vector<8x32xf32>
    %c0_41 = arith.constant 0 : index
    %c0_42 = arith.constant 0 : index
    %102 = vector.load %arg4[%c0_41, %c0_42] : memref<32x32xbf16, #tpu.memory_space<vmem>>, vector<32x32xbf16>
    %c0_43 = arith.constant 0 : index
    %c0_44 = arith.constant 0 : index
    %103 = vector.load %arg5[%c0_43, %c0_44] : memref<1x32xf32, #tpu.memory_space<vmem>>, vector<1x32xf32>
    %c0_45 = arith.constant 0 : index
    %c0_46 = arith.constant 0 : index
    %c0_47 = arith.constant 0 : index
    %104 = vector.load %arg3[%c0_45, %c0_46, %c0_47] : memref<1x8x32xf32, #tpu.memory_space<vmem>>, vector<1x8x32xf32>
    %105 = vector.shape_cast %104 : vector<1x8x32xf32> to vector<8x32xf32>
    %c0_48 = arith.constant 0 : index
    %c0_49 = arith.constant 0 : index
    %106 = vector.load %arg6[%c0_48, %c0_49] : memref<1x32xf32, #tpu.memory_space<vmem>>, vector<1x32xf32>
    %c0_50 = arith.constant 0 : index
    %c0_51 = arith.constant 0 : index
    %107 = vector.load %arg7[%c0_50, %c0_51] : memref<1x32xf32, #tpu.memory_space<vmem>>, vector<1x32xf32>
    %108 = arith.truncf %101 : vector<8x32xf32> to vector<8x32xbf16>
    %cst_52 = arith.constant dense<0.000000e+00> : vector<8x32xf32>
    %109 = tpu.matmul %108, %102, %cst_52 {dimension_numbers = #tpu.dot_dimension_numbers<[1], [0], [0], [1], [0, 0, 1, 1], [], []>} : vector<8x32xbf16>, vector<32x32xbf16>, vector<8x32xf32> -> vector<8x32xf32>
    %110 = vector.broadcast %103 : vector<1x32xf32> to vector<8x32xf32>
    %111 = arith.addf %109, %110 : vector<8x32xf32>
    %112 = arith.addf %111, %105 : vector<8x32xf32>
    %cst_53 = arith.constant dense<0.000000e+00> : vector<8xf32>
    %113 = vector.multi_reduction <add>, %112, %cst_53 [1] : vector<8x32xf32> to vector<8xf32>
    %114 = vector.shape_cast %113 : vector<8xf32> to vector<8x1xf32>
    %cst_54 = arith.constant 3.200000e+01 : f32
    %115 = vector.broadcast %cst_54 : f32 to vector<8x1xf32>
    %116 = arith.divf %114, %115 : vector<8x1xf32>
    %117 = vector.broadcast %116 : vector<8x1xf32> to vector<8x32xf32>
    %118 = arith.subf %112, %117 : vector<8x32xf32>
    %119 = arith.mulf %118, %118 : vector<8x32xf32>
    %cst_55 = arith.constant dense<0.000000e+00> : vector<8xf32>
    %120 = vector.multi_reduction <add>, %119, %cst_55 [1] : vector<8x32xf32> to vector<8xf32>
    %121 = vector.shape_cast %120 : vector<8xf32> to vector<8x1xf32>
    %cst_56 = arith.constant 3.200000e+01 : f32
    %122 = vector.broadcast %cst_56 : f32 to vector<8x1xf32>
    %123 = arith.divf %121, %122 : vector<8x1xf32>
    %124 = vector.broadcast %116 : vector<8x1xf32> to vector<8x32xf32>
    %125 = arith.subf %112, %124 : vector<8x32xf32>
    %cst_57 = arith.constant 9.99999974E-6 : f32
    %126 = vector.broadcast %cst_57 : f32 to vector<8x1xf32>
    %127 = arith.addf %123, %126 : vector<8x1xf32>
    %128 = math.rsqrt %127 : vector<8x1xf32>
    %129 = vector.broadcast %128 : vector<8x1xf32> to vector<8x32xf32>
    %130 = arith.mulf %125, %129 : vector<8x32xf32>
    %131 = vector.broadcast %106 : vector<1x32xf32> to vector<8x32xf32>
    %132 = arith.mulf %130, %131 : vector<8x32xf32>
    %133 = vector.broadcast %107 : vector<1x32xf32> to vector<8x32xf32>
    %134 = arith.addf %132, %133 : vector<8x32xf32>
    %c0_58 = arith.constant 0 : index
    %c0_59 = arith.constant 0 : index
    %c0_60 = arith.constant 0 : index
    %135 = vector.load %arg8[%c0_58, %c0_59, %c0_60] : memref<1x8x32xf32, #tpu.memory_space<vmem>>, vector<1x8x32xf32>
    %136 = vector.shape_cast %135 : vector<1x8x32xf32> to vector<8x32xf32>
    %137 = vector.shape_cast %134 : vector<8x32xf32> to vector<1x8x32xf32>
    tpu.vector_store %arg8[%c0_58, %c0_59, %c0_60], %137 {strides = array<i32>} : memref<1x8x32xf32, #tpu.memory_space<vmem>>, vector<1x8x32xf32>,
    return
  }
  func.func @transform_0(%arg0: i32) -> (i32, i32, i32) {
    %c0_i32 = arith.constant 0 : i32
    %c0_i32_0 = arith.constant 0 : i32
    %c0_i32_1 = arith.constant 0 : i32
    return %arg0, %c0_i32, %c0_i32_0 : i32, i32, i32
  }
  func.func @transform_1(%arg0: i32) -> (i32, i32, i32) {
    %c0_i32 = arith.constant 0 : i32
    %c0_i32_0 = arith.constant 0 : i32
    %c0_i32_1 = arith.constant 0 : i32
    return %arg0, %c0_i32, %c0_i32_0 : i32, i32, i32
  }
  func.func @transform_2(%arg0: i32) -> (i32, i32, i32) {
    %c0_i32 = arith.constant 0 : i32
    %c0_i32_0 = arith.constant 0 : i32
    %c0_i32_1 = arith.constant 0 : i32
    return %arg0, %c0_i32, %c0_i32_0 : i32, i32, i32
  }
  func.func @transform_3(%arg0: i32) -> (i32, i32) {
    %c0_i32 = arith.constant 0 : i32
    %c0_i32_0 = arith.constant 0 : i32
    %c0_i32_1 = arith.constant 0 : i32
    return %c0_i32, %c0_i32_0 : i32, i32
  }
  func.func @transform_4(%arg0: i32) -> (i32, i32) {
    %c0_i32 = arith.constant 0 : i32
    %c0_i32_0 = arith.constant 0 : i32
    %c0_i32_1 = arith.constant 0 : i32
    return %c0_i32, %c0_i32_0 : i32, i32
  }
  func.func @transform_5(%arg0: i32) -> (i32, i32) {
    %c0_i32 = arith.constant 0 : i32
    %c0_i32_0 = arith.constant 0 : i32
    %c0_i32_1 = arith.constant 0 : i32
    return %c0_i32, %c0_i32_0 : i32, i32
  }
  func.func @transform_6(%arg0: i32) -> (i32, i32) {
    %c0_i32 = arith.constant 0 : i32
    %c0_i32_0 = arith.constant 0 : i32
    %c0_i32_1 = arith.constant 0 : i32
    return %c0_i32, %c0_i32_0 : i32, i32
  }
  func.func @transform_7(%arg0: i32) -> (i32, i32, i32) {
    %c0_i32 = arith.constant 0 : i32
    %c0_i32_0 = arith.constant 0 : i32
    %c0_i32_1 = arith.constant 0 : i32
    return %arg0, %c0_i32, %c0_i32_0 : i32, i32, i32
  }
  func.func @transform_8(%arg0: i32) -> (i32, i32, i32, i32) {
    %c0_i32 = arith.constant 0 : i32
    %c0_i32_0 = arith.constant 0 : i32
    %c0_i32_1 = arith.constant 0 : i32
    %c0_i32_2 = arith.constant 0 : i32
    return %arg0, %c0_i32, %c0_i32_0, %c0_i32_1 : i32, i32, i32, i32
  }
}

module attributes {stable_mosaic.version = 11 : i64} {
  func.func @kernel(%arg0: i32, %arg1: memref<1x8x32xbf16, #tpu.memory_space<vmem>>, %arg2: memref<1x8x64xbf16, #tpu.memory_space<vmem>>, %arg3: memref<1x8x8xi32, #tpu.memory_space<vmem>>, %arg4: memref<1x8x32xf32, #tpu.memory_space<vmem>>, %arg5: memref<32x32xbf16, #tpu.memory_space<vmem>>, %arg6: memref<1x32xf32, #tpu.memory_space<vmem>>, %arg7: memref<1x32xf32, #tpu.memory_space<vmem>>, %arg8: memref<1x32xf32, #tpu.memory_space<vmem>>, %arg9: memref<1x8x32xf32, #tpu.memory_space<vmem>>) attributes {dimension_semantics = [#tpu.dimension_semantics<parallel>], iteration_bounds = array<i64: 2>, scalar_prefetch = 0 : i64, scratch_operands = 0 : i64, tpu.core_type = #tpu.core_type<tc>, window_params = [{transform_indices = @transform_0, window_bounds = array<i64: 1, 8, 32>}, {transform_indices = @transform_1, window_bounds = array<i64: 1, 8, 64>}, {transform_indices = @transform_2, window_bounds = array<i64: 1, 8, 8>}, {transform_indices = @transform_3, window_bounds = array<i64: 1, 8, 32>}, {pipeline_mode = #tpu.pipeline_mode<synchronous>, transform_indices = @transform_4, window_bounds = array<i64: 32, 32>}, {pipeline_mode = #tpu.pipeline_mode<synchronous>, transform_indices = @transform_5, window_bounds = array<i64: 1, 32>}, {pipeline_mode = #tpu.pipeline_mode<synchronous>, transform_indices = @transform_6, window_bounds = array<i64: 1, 32>}, {pipeline_mode = #tpu.pipeline_mode<synchronous>, transform_indices = @transform_7, window_bounds = array<i64: 1, 32>}, {transform_indices = @transform_8, window_bounds = array<i64: 1, 8, 32>}]} {
    %c0 = arith.constant 0 : index
    %c0_0 = arith.constant 0 : index
    %c0_1 = arith.constant 0 : index
    %0 = vector.load %arg2[%c0, %c0_0, %c0_1] : memref<1x8x64xbf16, #tpu.memory_space<vmem>>, vector<1x8x64xbf16>
    %1 = vector.shape_cast %0 : vector<1x8x64xbf16> to vector<8x64xbf16>
    %c0_2 = arith.constant 0 : index
    %c0_3 = arith.constant 0 : index
    %c0_4 = arith.constant 0 : index
    %2 = vector.load %arg1[%c0_2, %c0_3, %c0_4] : memref<1x8x32xbf16, #tpu.memory_space<vmem>>, vector<1x8x32xbf16>
    %3 = vector.shape_cast %2 : vector<1x8x32xbf16> to vector<8x32xbf16>
    %4 = vector.extract_strided_slice %1 {offsets = [0, 0], sizes = [8, 32], strides = [1, 1]} : vector<8x64xbf16> to vector<8x32xbf16>
    %5 = vector.extract_strided_slice %1 {offsets = [0, 32], sizes = [8, 32], strides = [1, 1]} : vector<8x64xbf16> to vector<8x32xbf16>
    %c0_5 = arith.constant 0 : index
    %c0_6 = arith.constant 0 : index
    %c0_7 = arith.constant 0 : index
    %6 = vector.load %arg3[%c0_5, %c0_6, %c0_7] : memref<1x8x8xi32, #tpu.memory_space<vmem>>, vector<1x8x8xi32>
    %7 = vector.shape_cast %6 : vector<1x8x8xi32> to vector<8x8xi32>
    %c0_i32 = arith.constant 0 : i32
    %8 = vector.broadcast %c0_i32 : i32 to vector<8x8xi32>
    %9 = arith.cmpi ne, %7, %8 : vector<8x8xi32>
    %10 = vector.extract_strided_slice %3 {offsets = [0, 0], sizes = [8, 8], strides = [1, 1]} : vector<8x32xbf16> to vector<8x8xbf16>
    %11 = vector.extract_strided_slice %4 {offsets = [0, 0], sizes = [8, 8], strides = [1, 1]} : vector<8x32xbf16> to vector<8x8xbf16>
    %12 = vector.extract_strided_slice %5 {offsets = [0, 0], sizes = [8, 8], strides = [1, 1]} : vector<8x32xbf16> to vector<8x8xbf16>
    %cst = arith.constant dense<0.000000e+00> : vector<8x8xf32>
    %13 = tpu.matmul %10, %11, %cst {dimension_numbers = #tpu.dot_dimension_numbers<[1], [1], [0], [0], [0, 0, 1, 0], [], []>} : vector<8x8xbf16>, vector<8x8xbf16>, vector<8x8xf32> -> vector<8x8xf32>
    %cst_8 = arith.constant 0.353553385 : f32
    %14 = vector.broadcast %cst_8 : f32 to vector<8x8xf32>
    %15 = arith.mulf %13, %14 : vector<8x8xf32>
    %cst_9 = arith.constant -1.000000e+10 : f32
    %16 = vector.broadcast %cst_9 : f32 to vector<8x8xf32>
    %17 = arith.select %9, %15, %16 : vector<8x8xi1>, vector<8x8xf32>
    %cst_10 = arith.constant dense<0xFF800000> : vector<8xf32>
    %18 = vector.multi_reduction <maximumf>, %17, %cst_10 [1] : vector<8x8xf32> to vector<8xf32>
    %19 = vector.shape_cast %18 : vector<8xf32> to vector<8x1xf32>
    %20 = vector.broadcast %19 : vector<8x1xf32> to vector<8x8xf32>
    %21 = arith.subf %17, %20 : vector<8x8xf32>
    %22 = math.exp %21 : vector<8x8xf32>
    %cst_11 = arith.constant dense<0.000000e+00> : vector<8xf32>
    %23 = vector.multi_reduction <add>, %22, %cst_11 [1] : vector<8x8xf32> to vector<8xf32>
    %24 = vector.shape_cast %23 : vector<8xf32> to vector<8x1xf32>
    %25 = tpu.reciprocal %24 {approx = true} : vector<8x1xf32> -> vector<8x1xf32>
    %26 = vector.broadcast %25 : vector<8x1xf32> to vector<8x8xf32>
    %27 = arith.mulf %22, %26 : vector<8x8xf32>
    %28 = arith.truncf %27 : vector<8x8xf32> to vector<8x8xbf16>
    %cst_12 = arith.constant dense<0.000000e+00> : vector<8x8xf32>
    %29 = tpu.matmul %28, %12, %cst_12 {dimension_numbers = #tpu.dot_dimension_numbers<[1], [0], [0], [1], [0, 0, 1, 1], [], []>} : vector<8x8xbf16>, vector<8x8xbf16>, vector<8x8xf32> -> vector<8x8xf32>
    %30 = vector.extract_strided_slice %3 {offsets = [0, 8], sizes = [8, 8], strides = [1, 1]} : vector<8x32xbf16> to vector<8x8xbf16>
    %31 = vector.extract_strided_slice %4 {offsets = [0, 8], sizes = [8, 8], strides = [1, 1]} : vector<8x32xbf16> to vector<8x8xbf16>
    %32 = vector.extract_strided_slice %5 {offsets = [0, 8], sizes = [8, 8], strides = [1, 1]} : vector<8x32xbf16> to vector<8x8xbf16>
    %cst_13 = arith.constant dense<0.000000e+00> : vector<8x8xf32>
    %33 = tpu.matmul %30, %31, %cst_13 {dimension_numbers = #tpu.dot_dimension_numbers<[1], [1], [0], [0], [0, 0, 1, 0], [], []>} : vector<8x8xbf16>, vector<8x8xbf16>, vector<8x8xf32> -> vector<8x8xf32>
    %cst_14 = arith.constant 0.353553385 : f32
    %34 = vector.broadcast %cst_14 : f32 to vector<8x8xf32>
    %35 = arith.mulf %33, %34 : vector<8x8xf32>
    %cst_15 = arith.constant -1.000000e+10 : f32
    %36 = vector.broadcast %cst_15 : f32 to vector<8x8xf32>
    %37 = arith.select %9, %35, %36 : vector<8x8xi1>, vector<8x8xf32>
    %cst_16 = arith.constant dense<0xFF800000> : vector<8xf32>
    %38 = vector.multi_reduction <maximumf>, %37, %cst_16 [1] : vector<8x8xf32> to vector<8xf32>
    %39 = vector.shape_cast %38 : vector<8xf32> to vector<8x1xf32>
    %40 = vector.broadcast %39 : vector<8x1xf32> to vector<8x8xf32>
    %41 = arith.subf %37, %40 : vector<8x8xf32>
    %42 = math.exp %41 : vector<8x8xf32>
    %cst_17 = arith.constant dense<0.000000e+00> : vector<8xf32>
    %43 = vector.multi_reduction <add>, %42, %cst_17 [1] : vector<8x8xf32> to vector<8xf32>
    %44 = vector.shape_cast %43 : vector<8xf32> to vector<8x1xf32>
    %45 = tpu.reciprocal %44 {approx = true} : vector<8x1xf32> -> vector<8x1xf32>
    %46 = vector.broadcast %45 : vector<8x1xf32> to vector<8x8xf32>
    %47 = arith.mulf %42, %46 : vector<8x8xf32>
    %48 = arith.truncf %47 : vector<8x8xf32> to vector<8x8xbf16>
    %cst_18 = arith.constant dense<0.000000e+00> : vector<8x8xf32>
    %49 = tpu.matmul %48, %32, %cst_18 {dimension_numbers = #tpu.dot_dimension_numbers<[1], [0], [0], [1], [0, 0, 1, 1], [], []>} : vector<8x8xbf16>, vector<8x8xbf16>, vector<8x8xf32> -> vector<8x8xf32>
    %50 = vector.extract_strided_slice %3 {offsets = [0, 16], sizes = [8, 8], strides = [1, 1]} : vector<8x32xbf16> to vector<8x8xbf16>
    %51 = vector.extract_strided_slice %4 {offsets = [0, 16], sizes = [8, 8], strides = [1, 1]} : vector<8x32xbf16> to vector<8x8xbf16>
    %52 = vector.extract_strided_slice %5 {offsets = [0, 16], sizes = [8, 8], strides = [1, 1]} : vector<8x32xbf16> to vector<8x8xbf16>
    %cst_19 = arith.constant dense<0.000000e+00> : vector<8x8xf32>
    %53 = tpu.matmul %50, %51, %cst_19 {dimension_numbers = #tpu.dot_dimension_numbers<[1], [1], [0], [0], [0, 0, 1, 0], [], []>} : vector<8x8xbf16>, vector<8x8xbf16>, vector<8x8xf32> -> vector<8x8xf32>
    %cst_20 = arith.constant 0.353553385 : f32
    %54 = vector.broadcast %cst_20 : f32 to vector<8x8xf32>
    %55 = arith.mulf %53, %54 : vector<8x8xf32>
    %cst_21 = arith.constant -1.000000e+10 : f32
    %56 = vector.broadcast %cst_21 : f32 to vector<8x8xf32>
    %57 = arith.select %9, %55, %56 : vector<8x8xi1>, vector<8x8xf32>
    %cst_22 = arith.constant dense<0xFF800000> : vector<8xf32>
    %58 = vector.multi_reduction <maximumf>, %57, %cst_22 [1] : vector<8x8xf32> to vector<8xf32>
    %59 = vector.shape_cast %58 : vector<8xf32> to vector<8x1xf32>
    %60 = vector.broadcast %59 : vector<8x1xf32> to vector<8x8xf32>
    %61 = arith.subf %57, %60 : vector<8x8xf32>
    %62 = math.exp %61 : vector<8x8xf32>
    %cst_23 = arith.constant dense<0.000000e+00> : vector<8xf32>
    %63 = vector.multi_reduction <add>, %62, %cst_23 [1] : vector<8x8xf32> to vector<8xf32>
    %64 = vector.shape_cast %63 : vector<8xf32> to vector<8x1xf32>
    %65 = tpu.reciprocal %64 {approx = true} : vector<8x1xf32> -> vector<8x1xf32>
    %66 = vector.broadcast %65 : vector<8x1xf32> to vector<8x8xf32>
    %67 = arith.mulf %62, %66 : vector<8x8xf32>
    %68 = arith.truncf %67 : vector<8x8xf32> to vector<8x8xbf16>
    %cst_24 = arith.constant dense<0.000000e+00> : vector<8x8xf32>
    %69 = tpu.matmul %68, %52, %cst_24 {dimension_numbers = #tpu.dot_dimension_numbers<[1], [0], [0], [1], [0, 0, 1, 1], [], []>} : vector<8x8xbf16>, vector<8x8xbf16>, vector<8x8xf32> -> vector<8x8xf32>
    %70 = vector.extract_strided_slice %3 {offsets = [0, 24], sizes = [8, 8], strides = [1, 1]} : vector<8x32xbf16> to vector<8x8xbf16>
    %71 = vector.extract_strided_slice %4 {offsets = [0, 24], sizes = [8, 8], strides = [1, 1]} : vector<8x32xbf16> to vector<8x8xbf16>
    %72 = vector.extract_strided_slice %5 {offsets = [0, 24], sizes = [8, 8], strides = [1, 1]} : vector<8x32xbf16> to vector<8x8xbf16>
    %cst_25 = arith.constant dense<0.000000e+00> : vector<8x8xf32>
    %73 = tpu.matmul %70, %71, %cst_25 {dimension_numbers = #tpu.dot_dimension_numbers<[1], [1], [0], [0], [0, 0, 1, 0], [], []>} : vector<8x8xbf16>, vector<8x8xbf16>, vector<8x8xf32> -> vector<8x8xf32>
    %cst_26 = arith.constant 0.353553385 : f32
    %74 = vector.broadcast %cst_26 : f32 to vector<8x8xf32>
    %75 = arith.mulf %73, %74 : vector<8x8xf32>
    %cst_27 = arith.constant -1.000000e+10 : f32
    %76 = vector.broadcast %cst_27 : f32 to vector<8x8xf32>
    %77 = arith.select %9, %75, %76 : vector<8x8xi1>, vector<8x8xf32>
    %cst_28 = arith.constant dense<0xFF800000> : vector<8xf32>
    %78 = vector.multi_reduction <maximumf>, %77, %cst_28 [1] : vector<8x8xf32> to vector<8xf32>
    %79 = vector.shape_cast %78 : vector<8xf32> to vector<8x1xf32>
    %80 = vector.broadcast %79 : vector<8x1xf32> to vector<8x8xf32>
    %81 = arith.subf %77, %80 : vector<8x8xf32>
    %82 = math.exp %81 : vector<8x8xf32>
    %cst_29 = arith.constant dense<0.000000e+00> : vector<8xf32>
    %83 = vector.multi_reduction <add>, %82, %cst_29 [1] : vector<8x8xf32> to vector<8xf32>
    %84 = vector.shape_cast %83 : vector<8xf32> to vector<8x1xf32>
    %85 = tpu.reciprocal %84 {approx = true} : vector<8x1xf32> -> vector<8x1xf32>
    %86 = vector.broadcast %85 : vector<8x1xf32> to vector<8x8xf32>
    %87 = arith.mulf %82, %86 : vector<8x8xf32>
    %88 = arith.truncf %87 : vector<8x8xf32> to vector<8x8xbf16>
    %cst_30 = arith.constant dense<0.000000e+00> : vector<8x8xf32>
    %89 = tpu.matmul %88, %72, %cst_30 {dimension_numbers = #tpu.dot_dimension_numbers<[1], [0], [0], [1], [0, 0, 1, 1], [], []>} : vector<8x8xbf16>, vector<8x8xbf16>, vector<8x8xf32> -> vector<8x8xf32>
    %90 = tpu.concatenate %29, %49, %69, %89 in 1 : vector<8x8xf32>, vector<8x8xf32>, vector<8x8xf32>, vector<8x8xf32> -> vector<8x32xf32>
    %c0_31 = arith.constant 0 : index
    %c0_32 = arith.constant 0 : index
    %91 = vector.load %arg5[%c0_31, %c0_32] : memref<32x32xbf16, #tpu.memory_space<vmem>>, vector<32x32xbf16>
    %c0_33 = arith.constant 0 : index
    %c0_34 = arith.constant 0 : index
    %92 = vector.load %arg6[%c0_33, %c0_34] : memref<1x32xf32, #tpu.memory_space<vmem>>, vector<1x32xf32>
    %c0_35 = arith.constant 0 : index
    %c0_36 = arith.constant 0 : index
    %c0_37 = arith.constant 0 : index
    %93 = vector.load %arg4[%c0_35, %c0_36, %c0_37] : memref<1x8x32xf32, #tpu.memory_space<vmem>>, vector<1x8x32xf32>
    %94 = vector.shape_cast %93 : vector<1x8x32xf32> to vector<8x32xf32>
    %c0_38 = arith.constant 0 : index
    %c0_39 = arith.constant 0 : index
    %95 = vector.load %arg7[%c0_38, %c0_39] : memref<1x32xf32, #tpu.memory_space<vmem>>, vector<1x32xf32>
    %c0_40 = arith.constant 0 : index
    %c0_41 = arith.constant 0 : index
    %96 = vector.load %arg8[%c0_40, %c0_41] : memref<1x32xf32, #tpu.memory_space<vmem>>, vector<1x32xf32>
    %97 = arith.truncf %90 : vector<8x32xf32> to vector<8x32xbf16>
    %cst_42 = arith.constant dense<0.000000e+00> : vector<8x32xf32>
    %98 = tpu.matmul %97, %91, %cst_42 {dimension_numbers = #tpu.dot_dimension_numbers<[1], [0], [0], [1], [0, 0, 1, 1], [], []>} : vector<8x32xbf16>, vector<32x32xbf16>, vector<8x32xf32> -> vector<8x32xf32>
    %99 = vector.broadcast %92 : vector<1x32xf32> to vector<8x32xf32>
    %100 = arith.addf %98, %99 : vector<8x32xf32>
    %101 = arith.addf %100, %94 : vector<8x32xf32>
    %cst_43 = arith.constant dense<0.000000e+00> : vector<8xf32>
    %102 = vector.multi_reduction <add>, %101, %cst_43 [1] : vector<8x32xf32> to vector<8xf32>
    %103 = vector.shape_cast %102 : vector<8xf32> to vector<8x1xf32>
    %cst_44 = arith.constant 3.200000e+01 : f32
    %104 = vector.broadcast %cst_44 : f32 to vector<8x1xf32>
    %105 = arith.divf %103, %104 : vector<8x1xf32>
    %106 = vector.broadcast %105 : vector<8x1xf32> to vector<8x32xf32>
    %107 = arith.subf %101, %106 : vector<8x32xf32>
    %108 = arith.mulf %107, %107 : vector<8x32xf32>
    %cst_45 = arith.constant dense<0.000000e+00> : vector<8xf32>
    %109 = vector.multi_reduction <add>, %108, %cst_45 [1] : vector<8x32xf32> to vector<8xf32>
    %110 = vector.shape_cast %109 : vector<8xf32> to vector<8x1xf32>
    %cst_46 = arith.constant 3.200000e+01 : f32
    %111 = vector.broadcast %cst_46 : f32 to vector<8x1xf32>
    %112 = arith.divf %110, %111 : vector<8x1xf32>
    %113 = vector.broadcast %105 : vector<8x1xf32> to vector<8x32xf32>
    %114 = arith.subf %101, %113 : vector<8x32xf32>
    %cst_47 = arith.constant 9.99999974E-6 : f32
    %115 = vector.broadcast %cst_47 : f32 to vector<8x1xf32>
    %116 = arith.addf %112, %115 : vector<8x1xf32>
    %117 = math.rsqrt %116 : vector<8x1xf32>
    %118 = vector.broadcast %117 : vector<8x1xf32> to vector<8x32xf32>
    %119 = arith.mulf %114, %118 : vector<8x32xf32>
    %120 = vector.broadcast %95 : vector<1x32xf32> to vector<8x32xf32>
    %121 = arith.mulf %119, %120 : vector<8x32xf32>
    %122 = vector.broadcast %96 : vector<1x32xf32> to vector<8x32xf32>
    %123 = arith.addf %121, %122 : vector<8x32xf32>
    %c0_48 = arith.constant 0 : index
    %c0_49 = arith.constant 0 : index
    %c0_50 = arith.constant 0 : index
    %124 = vector.load %arg9[%c0_48, %c0_49, %c0_50] : memref<1x8x32xf32, #tpu.memory_space<vmem>>, vector<1x8x32xf32>
    %125 = vector.shape_cast %124 : vector<1x8x32xf32> to vector<8x32xf32>
    %126 = vector.shape_cast %123 : vector<8x32xf32> to vector<1x8x32xf32>
    tpu.vector_store %arg9[%c0_48, %c0_49, %c0_50], %126 {strides = array<i32>} : memref<1x8x32xf32, #tpu.memory_space<vmem>>, vector<1x8x32xf32>,
    return
  }
  func.func @transform_0(%arg0: i32) -> (i32, i32, i32) {
    %c0_i32 = arith.constant 0 : i32
    %c0_i32_0 = arith.constant 0 : i32
    %c0_i32_1 = arith.constant 0 : i32
    return %arg0, %c0_i32, %c0_i32_0 : i32, i32, i32
  }
  func.func @transform_1(%arg0: i32) -> (i32, i32, i32) {
    %c0_i32 = arith.constant 0 : i32
    %c0_i32_0 = arith.constant 0 : i32
    %c0_i32_1 = arith.constant 0 : i32
    return %arg0, %c0_i32, %c0_i32_0 : i32, i32, i32
  }
  func.func @transform_2(%arg0: i32) -> (i32, i32, i32) {
    %c0_i32 = arith.constant 0 : i32
    %c0_i32_0 = arith.constant 0 : i32
    %c0_i32_1 = arith.constant 0 : i32
    return %arg0, %c0_i32, %c0_i32_0 : i32, i32, i32
  }
  func.func @transform_3(%arg0: i32) -> (i32, i32, i32) {
    %c0_i32 = arith.constant 0 : i32
    %c0_i32_0 = arith.constant 0 : i32
    %c0_i32_1 = arith.constant 0 : i32
    return %arg0, %c0_i32, %c0_i32_0 : i32, i32, i32
  }
  func.func @transform_4(%arg0: i32) -> (i32, i32) {
    %c0_i32 = arith.constant 0 : i32
    %c0_i32_0 = arith.constant 0 : i32
    %c0_i32_1 = arith.constant 0 : i32
    return %c0_i32, %c0_i32_0 : i32, i32
  }
  func.func @transform_5(%arg0: i32) -> (i32, i32) {
    %c0_i32 = arith.constant 0 : i32
    %c0_i32_0 = arith.constant 0 : i32
    %c0_i32_1 = arith.constant 0 : i32
    return %c0_i32, %c0_i32_0 : i32, i32
  }
  func.func @transform_6(%arg0: i32) -> (i32, i32) {
    %c0_i32 = arith.constant 0 : i32
    %c0_i32_0 = arith.constant 0 : i32
    %c0_i32_1 = arith.constant 0 : i32
    return %c0_i32, %c0_i32_0 : i32, i32
  }
  func.func @transform_7(%arg0: i32) -> (i32, i32) {
    %c0_i32 = arith.constant 0 : i32
    %c0_i32_0 = arith.constant 0 : i32
    %c0_i32_1 = arith.constant 0 : i32
    return %c0_i32, %c0_i32_0 : i32, i32
  }
  func.func @transform_8(%arg0: i32) -> (i32, i32, i32) {
    %c0_i32 = arith.constant 0 : i32
    %c0_i32_0 = arith.constant 0 : i32
    %c0_i32_1 = arith.constant 0 : i32
    return %arg0, %c0_i32, %c0_i32_0 : i32, i32, i32
  }
}

module attributes {stable_mosaic.version = 11 : i64} {
  func.func @kernel(%arg0: i32, %arg1: memref<1x8x32xbf16, #tpu.memory_space<vmem>>, %arg2: memref<1x8x64xbf16, #tpu.memory_space<vmem>>, %arg3: memref<1x8x8xi32, #tpu.memory_space<vmem>>, %arg4: memref<1x8x32xf32, #tpu.memory_space<vmem>>, %arg5: memref<32x32xbf16, #tpu.memory_space<vmem>>, %arg6: memref<1x32xf32, #tpu.memory_space<vmem>>, %arg7: memref<1x32xf32, #tpu.memory_space<vmem>>, %arg8: memref<1x32xf32, #tpu.memory_space<vmem>>, %arg9: memref<1x8x32xf32, #tpu.memory_space<vmem>>, %arg10: memref<1x4x8x8xf32, #tpu.memory_space<vmem>>) attributes {dimension_semantics = [#tpu.dimension_semantics<parallel>], iteration_bounds = array<i64: 2>, scalar_prefetch = 0 : i64, scratch_operands = 0 : i64, tpu.core_type = #tpu.core_type<tc>, window_params = [{transform_indices = @transform_0, window_bounds = array<i64: 1, 8, 32>}, {transform_indices = @transform_1, window_bounds = array<i64: 1, 8, 64>}, {transform_indices = @transform_2, window_bounds = array<i64: 1, 8, 8>}, {transform_indices = @transform_3, window_bounds = array<i64: 1, 8, 32>}, {pipeline_mode = #tpu.pipeline_mode<synchronous>, transform_indices = @transform_4, window_bounds = array<i64: 32, 32>}, {pipeline_mode = #tpu.pipeline_mode<synchronous>, transform_indices = @transform_5, window_bounds = array<i64: 1, 32>}, {pipeline_mode = #tpu.pipeline_mode<synchronous>, transform_indices = @transform_6, window_bounds = array<i64: 1, 32>}, {pipeline_mode = #tpu.pipeline_mode<synchronous>, transform_indices = @transform_7, window_bounds = array<i64: 1, 32>}, {transform_indices = @transform_8, window_bounds = array<i64: 1, 8, 32>}, {transform_indices = @transform_9, window_bounds = array<i64: 1, 4, 8, 8>}]} {
    %c0 = arith.constant 0 : index
    %c0_0 = arith.constant 0 : index
    %c0_1 = arith.constant 0 : index
    %0 = vector.load %arg2[%c0, %c0_0, %c0_1] : memref<1x8x64xbf16, #tpu.memory_space<vmem>>, vector<1x8x64xbf16>
    %1 = vector.shape_cast %0 : vector<1x8x64xbf16> to vector<8x64xbf16>
    %c0_2 = arith.constant 0 : index
    %c0_3 = arith.constant 0 : index
    %c0_4 = arith.constant 0 : index
    %2 = vector.load %arg1[%c0_2, %c0_3, %c0_4] : memref<1x8x32xbf16, #tpu.memory_space<vmem>>, vector<1x8x32xbf16>
    %3 = vector.shape_cast %2 : vector<1x8x32xbf16> to vector<8x32xbf16>
    %4 = vector.extract_strided_slice %1 {offsets = [0, 0], sizes = [8, 32], strides = [1, 1]} : vector<8x64xbf16> to vector<8x32xbf16>
    %5 = vector.extract_strided_slice %1 {offsets = [0, 32], sizes = [8, 32], strides = [1, 1]} : vector<8x64xbf16> to vector<8x32xbf16>
    %c0_5 = arith.constant 0 : index
    %c0_6 = arith.constant 0 : index
    %c0_7 = arith.constant 0 : index
    %6 = vector.load %arg3[%c0_5, %c0_6, %c0_7] : memref<1x8x8xi32, #tpu.memory_space<vmem>>, vector<1x8x8xi32>
    %7 = vector.shape_cast %6 : vector<1x8x8xi32> to vector<8x8xi32>
    %c0_i32 = arith.constant 0 : i32
    %8 = vector.broadcast %c0_i32 : i32 to vector<8x8xi32>
    %9 = arith.cmpi ne, %7, %8 : vector<8x8xi32>
    %10 = vector.extract_strided_slice %3 {offsets = [0, 0], sizes = [8, 8], strides = [1, 1]} : vector<8x32xbf16> to vector<8x8xbf16>
    %11 = vector.extract_strided_slice %4 {offsets = [0, 0], sizes = [8, 8], strides = [1, 1]} : vector<8x32xbf16> to vector<8x8xbf16>
    %12 = vector.extract_strided_slice %5 {offsets = [0, 0], sizes = [8, 8], strides = [1, 1]} : vector<8x32xbf16> to vector<8x8xbf16>
    %cst = arith.constant dense<0.000000e+00> : vector<8x8xf32>
    %13 = tpu.matmul %10, %11, %cst {dimension_numbers = #tpu.dot_dimension_numbers<[1], [1], [0], [0], [0, 0, 1, 0], [], []>} : vector<8x8xbf16>, vector<8x8xbf16>, vector<8x8xf32> -> vector<8x8xf32>
    %cst_8 = arith.constant 0.353553385 : f32
    %14 = vector.broadcast %cst_8 : f32 to vector<8x8xf32>
    %15 = arith.mulf %13, %14 : vector<8x8xf32>
    %cst_9 = arith.constant -1.000000e+10 : f32
    %16 = vector.broadcast %cst_9 : f32 to vector<8x8xf32>
    %17 = arith.select %9, %15, %16 : vector<8x8xi1>, vector<8x8xf32>
    %cst_10 = arith.constant dense<0xFF800000> : vector<8xf32>
    %18 = vector.multi_reduction <maximumf>, %17, %cst_10 [1] : vector<8x8xf32> to vector<8xf32>
    %19 = vector.shape_cast %18 : vector<8xf32> to vector<8x1xf32>
    %20 = vector.broadcast %19 : vector<8x1xf32> to vector<8x8xf32>
    %21 = arith.subf %17, %20 : vector<8x8xf32>
    %22 = math.exp %21 : vector<8x8xf32>
    %cst_11 = arith.constant dense<0.000000e+00> : vector<8xf32>
    %23 = vector.multi_reduction <add>, %22, %cst_11 [1] : vector<8x8xf32> to vector<8xf32>
    %24 = vector.shape_cast %23 : vector<8xf32> to vector<8x1xf32>
    %25 = tpu.reciprocal %24 {approx = true} : vector<8x1xf32> -> vector<8x1xf32>
    %26 = vector.broadcast %25 : vector<8x1xf32> to vector<8x8xf32>
    %27 = arith.mulf %22, %26 : vector<8x8xf32>
    %c0_12 = arith.constant 0 : index
    %c0_13 = arith.constant 0 : index
    %c0_14 = arith.constant 0 : index
    %c0_15 = arith.constant 0 : index
    %28 = vector.load %arg10[%c0_12, %c0_13, %c0_14, %c0_15] : memref<1x4x8x8xf32, #tpu.memory_space<vmem>>, vector<1x1x8x8xf32>
    %29 = vector.shape_cast %28 : vector<1x1x8x8xf32> to vector<8x8xf32>
    %30 = vector.shape_cast %27 : vector<8x8xf32> to vector<1x1x8x8xf32>
    tpu.vector_store %arg10[%c0_12, %c0_13, %c0_14, %c0_15], %30 {strides = array<i32>} : memref<1x4x8x8xf32, #tpu.memory_space<vmem>>, vector<1x1x8x8xf32>,
    %31 = arith.truncf %27 : vector<8x8xf32> to vector<8x8xbf16>
    %cst_16 = arith.constant dense<0.000000e+00> : vector<8x8xf32>
    %32 = tpu.matmul %31, %12, %cst_16 {dimension_numbers = #tpu.dot_dimension_numbers<[1], [0], [0], [1], [0, 0, 1, 1], [], []>} : vector<8x8xbf16>, vector<8x8xbf16>, vector<8x8xf32> -> vector<8x8xf32>
    %33 = vector.extract_strided_slice %3 {offsets = [0, 8], sizes = [8, 8], strides = [1, 1]} : vector<8x32xbf16> to vector<8x8xbf16>
    %34 = vector.extract_strided_slice %4 {offsets = [0, 8], sizes = [8, 8], strides = [1, 1]} : vector<8x32xbf16> to vector<8x8xbf16>
    %35 = vector.extract_strided_slice %5 {offsets = [0, 8], sizes = [8, 8], strides = [1, 1]} : vector<8x32xbf16> to vector<8x8xbf16>
    %cst_17 = arith.constant dense<0.000000e+00> : vector<8x8xf32>
    %36 = tpu.matmul %33, %34, %cst_17 {dimension_numbers = #tpu.dot_dimension_numbers<[1], [1], [0], [0], [0, 0, 1, 0], [], []>} : vector<8x8xbf16>, vector<8x8xbf16>, vector<8x8xf32> -> vector<8x8xf32>
    %cst_18 = arith.constant 0.353553385 : f32
    %37 = vector.broadcast %cst_18 : f32 to vector<8x8xf32>
    %38 = arith.mulf %36, %37 : vector<8x8xf32>
    %cst_19 = arith.constant -1.000000e+10 : f32
    %39 = vector.broadcast %cst_19 : f32 to vector<8x8xf32>
    %40 = arith.select %9, %38, %39 : vector<8x8xi1>, vector<8x8xf32>
    %cst_20 = arith.constant dense<0xFF800000> : vector<8xf32>
    %41 = vector.multi_reduction <maximumf>, %40, %cst_20 [1] : vector<8x8xf32> to vector<8xf32>
    %42 = vector.shape_cast %41 : vector<8xf32> to vector<8x1xf32>
    %43 = vector.broadcast %42 : vector<8x1xf32> to vector<8x8xf32>
    %44 = arith.subf %40, %43 : vector<8x8xf32>
    %45 = math.exp %44 : vector<8x8xf32>
    %cst_21 = arith.constant dense<0.000000e+00> : vector<8xf32>
    %46 = vector.multi_reduction <add>, %45, %cst_21 [1] : vector<8x8xf32> to vector<8xf32>
    %47 = vector.shape_cast %46 : vector<8xf32> to vector<8x1xf32>
    %48 = tpu.reciprocal %47 {approx = true} : vector<8x1xf32> -> vector<8x1xf32>
    %49 = vector.broadcast %48 : vector<8x1xf32> to vector<8x8xf32>
    %50 = arith.mulf %45, %49 : vector<8x8xf32>
    %c0_22 = arith.constant 0 : index
    %c1 = arith.constant 1 : index
    %c0_23 = arith.constant 0 : index
    %c0_24 = arith.constant 0 : index
    %51 = vector.load %arg10[%c0_22, %c1, %c0_23, %c0_24] : memref<1x4x8x8xf32, #tpu.memory_space<vmem>>, vector<1x1x8x8xf32>
    %52 = vector.shape_cast %51 : vector<1x1x8x8xf32> to vector<8x8xf32>
    %53 = vector.shape_cast %50 : vector<8x8xf32> to vector<1x1x8x8xf32>
    tpu.vector_store %arg10[%c0_22, %c1, %c0_23, %c0_24], %53 {strides = array<i32>} : memref<1x4x8x8xf32, #tpu.memory_space<vmem>>, vector<1x1x8x8xf32>,
    %54 = arith.truncf %50 : vector<8x8xf32> to vector<8x8xbf16>
    %cst_25 = arith.constant dense<0.000000e+00> : vector<8x8xf32>
    %55 = tpu.matmul %54, %35, %cst_25 {dimension_numbers = #tpu.dot_dimension_numbers<[1], [0], [0], [1], [0, 0, 1, 1], [], []>} : vector<8x8xbf16>, vector<8x8xbf16>, vector<8x8xf32> -> vector<8x8xf32>
    %56 = vector.extract_strided_slice %3 {offsets = [0, 16], sizes = [8, 8], strides = [1, 1]} : vector<8x32xbf16> to vector<8x8xbf16>
    %57 = vector.extract_strided_slice %4 {offsets = [0, 16], sizes = [8, 8], strides = [1, 1]} : vector<8x32xbf16> to vector<8x8xbf16>
    %58 = vector.extract_strided_slice %5 {offsets = [0, 16], sizes = [8, 8], strides = [1, 1]} : vector<8x32xbf16> to vector<8x8xbf16>
    %cst_26 = arith.constant dense<0.000000e+00> : vector<8x8xf32>
    %59 = tpu.matmul %56, %57, %cst_26 {dimension_numbers = #tpu.dot_dimension_numbers<[1], [1], [0], [0], [0, 0, 1, 0], [], []>} : vector<8x8xbf16>, vector<8x8xbf16>, vector<8x8xf32> -> vector<8x8xf32>
    %cst_27 = arith.constant 0.353553385 : f32
    %60 = vector.broadcast %cst_27 : f32 to vector<8x8xf32>
    %61 = arith.mulf %59, %60 : vector<8x8xf32>
    %cst_28 = arith.constant -1.000000e+10 : f32
    %62 = vector.broadcast %cst_28 : f32 to vector<8x8xf32>
    %63 = arith.select %9, %61, %62 : vector<8x8xi1>, vector<8x8xf32>
    %cst_29 = arith.constant dense<0xFF800000> : vector<8xf32>
    %64 = vector.multi_reduction <maximumf>, %63, %cst_29 [1] : vector<8x8xf32> to vector<8xf32>
    %65 = vector.shape_cast %64 : vector<8xf32> to vector<8x1xf32>
    %66 = vector.broadcast %65 : vector<8x1xf32> to vector<8x8xf32>
    %67 = arith.subf %63, %66 : vector<8x8xf32>
    %68 = math.exp %67 : vector<8x8xf32>
    %cst_30 = arith.constant dense<0.000000e+00> : vector<8xf32>
    %69 = vector.multi_reduction <add>, %68, %cst_30 [1] : vector<8x8xf32> to vector<8xf32>
    %70 = vector.shape_cast %69 : vector<8xf32> to vector<8x1xf32>
    %71 = tpu.reciprocal %70 {approx = true} : vector<8x1xf32> -> vector<8x1xf32>
    %72 = vector.broadcast %71 : vector<8x1xf32> to vector<8x8xf32>
    %73 = arith.mulf %68, %72 : vector<8x8xf32>
    %c0_31 = arith.constant 0 : index
    %c2 = arith.constant 2 : index
    %c0_32 = arith.constant 0 : index
    %c0_33 = arith.constant 0 : index
    %74 = vector.load %arg10[%c0_31, %c2, %c0_32, %c0_33] : memref<1x4x8x8xf32, #tpu.memory_space<vmem>>, vector<1x1x8x8xf32>
    %75 = vector.shape_cast %74 : vector<1x1x8x8xf32> to vector<8x8xf32>
    %76 = vector.shape_cast %73 : vector<8x8xf32> to vector<1x1x8x8xf32>
    tpu.vector_store %arg10[%c0_31, %c2, %c0_32, %c0_33], %76 {strides = array<i32>} : memref<1x4x8x8xf32, #tpu.memory_space<vmem>>, vector<1x1x8x8xf32>,
    %77 = arith.truncf %73 : vector<8x8xf32> to vector<8x8xbf16>
    %cst_34 = arith.constant dense<0.000000e+00> : vector<8x8xf32>
    %78 = tpu.matmul %77, %58, %cst_34 {dimension_numbers = #tpu.dot_dimension_numbers<[1], [0], [0], [1], [0, 0, 1, 1], [], []>} : vector<8x8xbf16>, vector<8x8xbf16>, vector<8x8xf32> -> vector<8x8xf32>
    %79 = vector.extract_strided_slice %3 {offsets = [0, 24], sizes = [8, 8], strides = [1, 1]} : vector<8x32xbf16> to vector<8x8xbf16>
    %80 = vector.extract_strided_slice %4 {offsets = [0, 24], sizes = [8, 8], strides = [1, 1]} : vector<8x32xbf16> to vector<8x8xbf16>
    %81 = vector.extract_strided_slice %5 {offsets = [0, 24], sizes = [8, 8], strides = [1, 1]} : vector<8x32xbf16> to vector<8x8xbf16>
    %cst_35 = arith.constant dense<0.000000e+00> : vector<8x8xf32>
    %82 = tpu.matmul %79, %80, %cst_35 {dimension_numbers = #tpu.dot_dimension_numbers<[1], [1], [0], [0], [0, 0, 1, 0], [], []>} : vector<8x8xbf16>, vector<8x8xbf16>, vector<8x8xf32> -> vector<8x8xf32>
    %cst_36 = arith.constant 0.353553385 : f32
    %83 = vector.broadcast %cst_36 : f32 to vector<8x8xf32>
    %84 = arith.mulf %82, %83 : vector<8x8xf32>
    %cst_37 = arith.constant -1.000000e+10 : f32
    %85 = vector.broadcast %cst_37 : f32 to vector<8x8xf32>
    %86 = arith.select %9, %84, %85 : vector<8x8xi1>, vector<8x8xf32>
    %cst_38 = arith.constant dense<0xFF800000> : vector<8xf32>
    %87 = vector.multi_reduction <maximumf>, %86, %cst_38 [1] : vector<8x8xf32> to vector<8xf32>
    %88 = vector.shape_cast %87 : vector<8xf32> to vector<8x1xf32>
    %89 = vector.broadcast %88 : vector<8x1xf32> to vector<8x8xf32>
    %90 = arith.subf %86, %89 : vector<8x8xf32>
    %91 = math.exp %90 : vector<8x8xf32>
    %cst_39 = arith.constant dense<0.000000e+00> : vector<8xf32>
    %92 = vector.multi_reduction <add>, %91, %cst_39 [1] : vector<8x8xf32> to vector<8xf32>
    %93 = vector.shape_cast %92 : vector<8xf32> to vector<8x1xf32>
    %94 = tpu.reciprocal %93 {approx = true} : vector<8x1xf32> -> vector<8x1xf32>
    %95 = vector.broadcast %94 : vector<8x1xf32> to vector<8x8xf32>
    %96 = arith.mulf %91, %95 : vector<8x8xf32>
    %c0_40 = arith.constant 0 : index
    %c3 = arith.constant 3 : index
    %c0_41 = arith.constant 0 : index
    %c0_42 = arith.constant 0 : index
    %97 = vector.load %arg10[%c0_40, %c3, %c0_41, %c0_42] : memref<1x4x8x8xf32, #tpu.memory_space<vmem>>, vector<1x1x8x8xf32>
    %98 = vector.shape_cast %97 : vector<1x1x8x8xf32> to vector<8x8xf32>
    %99 = vector.shape_cast %96 : vector<8x8xf32> to vector<1x1x8x8xf32>
    tpu.vector_store %arg10[%c0_40, %c3, %c0_41, %c0_42], %99 {strides = array<i32>} : memref<1x4x8x8xf32, #tpu.memory_space<vmem>>, vector<1x1x8x8xf32>,
    %100 = arith.truncf %96 : vector<8x8xf32> to vector<8x8xbf16>
    %cst_43 = arith.constant dense<0.000000e+00> : vector<8x8xf32>
    %101 = tpu.matmul %100, %81, %cst_43 {dimension_numbers = #tpu.dot_dimension_numbers<[1], [0], [0], [1], [0, 0, 1, 1], [], []>} : vector<8x8xbf16>, vector<8x8xbf16>, vector<8x8xf32> -> vector<8x8xf32>
    %102 = tpu.concatenate %32, %55, %78, %101 in 1 : vector<8x8xf32>, vector<8x8xf32>, vector<8x8xf32>, vector<8x8xf32> -> vector<8x32xf32>
    %c0_44 = arith.constant 0 : index
    %c0_45 = arith.constant 0 : index
    %103 = vector.load %arg5[%c0_44, %c0_45] : memref<32x32xbf16, #tpu.memory_space<vmem>>, vector<32x32xbf16>
    %c0_46 = arith.constant 0 : index
    %c0_47 = arith.constant 0 : index
    %104 = vector.load %arg6[%c0_46, %c0_47] : memref<1x32xf32, #tpu.memory_space<vmem>>, vector<1x32xf32>
    %c0_48 = arith.constant 0 : index
    %c0_49 = arith.constant 0 : index
    %c0_50 = arith.constant 0 : index
    %105 = vector.load %arg4[%c0_48, %c0_49, %c0_50] : memref<1x8x32xf32, #tpu.memory_space<vmem>>, vector<1x8x32xf32>
    %106 = vector.shape_cast %105 : vector<1x8x32xf32> to vector<8x32xf32>
    %c0_51 = arith.constant 0 : index
    %c0_52 = arith.constant 0 : index
    %107 = vector.load %arg7[%c0_51, %c0_52] : memref<1x32xf32, #tpu.memory_space<vmem>>, vector<1x32xf32>
    %c0_53 = arith.constant 0 : index
    %c0_54 = arith.constant 0 : index
    %108 = vector.load %arg8[%c0_53, %c0_54] : memref<1x32xf32, #tpu.memory_space<vmem>>, vector<1x32xf32>
    %109 = arith.truncf %102 : vector<8x32xf32> to vector<8x32xbf16>
    %cst_55 = arith.constant dense<0.000000e+00> : vector<8x32xf32>
    %110 = tpu.matmul %109, %103, %cst_55 {dimension_numbers = #tpu.dot_dimension_numbers<[1], [0], [0], [1], [0, 0, 1, 1], [], []>} : vector<8x32xbf16>, vector<32x32xbf16>, vector<8x32xf32> -> vector<8x32xf32>
    %111 = vector.broadcast %104 : vector<1x32xf32> to vector<8x32xf32>
    %112 = arith.addf %110, %111 : vector<8x32xf32>
    %113 = arith.addf %112, %106 : vector<8x32xf32>
    %cst_56 = arith.constant dense<0.000000e+00> : vector<8xf32>
    %114 = vector.multi_reduction <add>, %113, %cst_56 [1] : vector<8x32xf32> to vector<8xf32>
    %115 = vector.shape_cast %114 : vector<8xf32> to vector<8x1xf32>
    %cst_57 = arith.constant 3.200000e+01 : f32
    %116 = vector.broadcast %cst_57 : f32 to vector<8x1xf32>
    %117 = arith.divf %115, %116 : vector<8x1xf32>
    %118 = vector.broadcast %117 : vector<8x1xf32> to vector<8x32xf32>
    %119 = arith.subf %113, %118 : vector<8x32xf32>
    %120 = arith.mulf %119, %119 : vector<8x32xf32>
    %cst_58 = arith.constant dense<0.000000e+00> : vector<8xf32>
    %121 = vector.multi_reduction <add>, %120, %cst_58 [1] : vector<8x32xf32> to vector<8xf32>
    %122 = vector.shape_cast %121 : vector<8xf32> to vector<8x1xf32>
    %cst_59 = arith.constant 3.200000e+01 : f32
    %123 = vector.broadcast %cst_59 : f32 to vector<8x1xf32>
    %124 = arith.divf %122, %123 : vector<8x1xf32>
    %125 = vector.broadcast %117 : vector<8x1xf32> to vector<8x32xf32>
    %126 = arith.subf %113, %125 : vector<8x32xf32>
    %cst_60 = arith.constant 9.99999974E-6 : f32
    %127 = vector.broadcast %cst_60 : f32 to vector<8x1xf32>
    %128 = arith.addf %124, %127 : vector<8x1xf32>
    %129 = math.rsqrt %128 : vector<8x1xf32>
    %130 = vector.broadcast %129 : vector<8x1xf32> to vector<8x32xf32>
    %131 = arith.mulf %126, %130 : vector<8x32xf32>
    %132 = vector.broadcast %107 : vector<1x32xf32> to vector<8x32xf32>
    %133 = arith.mulf %131, %132 : vector<8x32xf32>
    %134 = vector.broadcast %108 : vector<1x32xf32> to vector<8x32xf32>
    %135 = arith.addf %133, %134 : vector<8x32xf32>
    %c0_61 = arith.constant 0 : index
    %c0_62 = arith.constant 0 : index
    %c0_63 = arith.constant 0 : index
    %136 = vector.load %arg9[%c0_61, %c0_62, %c0_63] : memref<1x8x32xf32, #tpu.memory_space<vmem>>, vector<1x8x32xf32>
    %137 = vector.shape_cast %136 : vector<1x8x32xf32> to vector<8x32xf32>
    %138 = vector.shape_cast %135 : vector<8x32xf32> to vector<1x8x32xf32>
    tpu.vector_store %arg9[%c0_61, %c0_62, %c0_63], %138 {strides = array<i32>} : memref<1x8x32xf32, #tpu.memory_space<vmem>>, vector<1x8x32xf32>,
    return
  }
  func.func @transform_0(%arg0: i32) -> (i32, i32, i32) {
    %c0_i32 = arith.constant 0 : i32
    %c0_i32_0 = arith.constant 0 : i32
    %c0_i32_1 = arith.constant 0 : i32
    return %arg0, %c0_i32, %c0_i32_0 : i32, i32, i32
  }
  func.func @transform_1(%arg0: i32) -> (i32, i32, i32) {
    %c0_i32 = arith.constant 0 : i32
    %c0_i32_0 = arith.constant 0 : i32
    %c0_i32_1 = arith.constant 0 : i32
    return %arg0, %c0_i32, %c0_i32_0 : i32, i32, i32
  }
  func.func @transform_2(%arg0: i32) -> (i32, i32, i32) {
    %c0_i32 = arith.constant 0 : i32
    %c0_i32_0 = arith.constant 0 : i32
    %c0_i32_1 = arith.constant 0 : i32
    return %arg0, %c0_i32, %c0_i32_0 : i32, i32, i32
  }
  func.func @transform_3(%arg0: i32) -> (i32, i32, i32) {
    %c0_i32 = arith.constant 0 : i32
    %c0_i32_0 = arith.constant 0 : i32
    %c0_i32_1 = arith.constant 0 : i32
    return %arg0, %c0_i32, %c0_i32_0 : i32, i32, i32
  }
  func.func @transform_4(%arg0: i32) -> (i32, i32) {
    %c0_i32 = arith.constant 0 : i32
    %c0_i32_0 = arith.constant 0 : i32
    %c0_i32_1 = arith.constant 0 : i32
    return %c0_i32, %c0_i32_0 : i32, i32
  }
  func.func @transform_5(%arg0: i32) -> (i32, i32) {
    %c0_i32 = arith.constant 0 : i32
    %c0_i32_0 = arith.constant 0 : i32
    %c0_i32_1 = arith.constant 0 : i32
    return %c0_i32, %c0_i32_0 : i32, i32
  }
  func.func @transform_6(%arg0: i32) -> (i32, i32) {
    %c0_i32 = arith.constant 0 : i32
    %c0_i32_0 = arith.constant 0 : i32
    %c0_i32_1 = arith.constant 0 : i32
    return %c0_i32, %c0_i32_0 : i32, i32
  }
  func.func @transform_7(%arg0: i32) -> (i32, i32) {
    %c0_i32 = arith.constant 0 : i32
    %c0_i32_0 = arith.constant 0 : i32
    %c0_i32_1 = arith.constant 0 : i32
    return %c0_i32, %c0_i32_0 : i32, i32
  }
  func.func @transform_8(%arg0: i32) -> (i32, i32, i32) {
    %c0_i32 = arith.constant 0 : i32
    %c0_i32_0 = arith.constant 0 : i32
    %c0_i32_1 = arith.constant 0 : i32
    return %arg0, %c0_i32, %c0_i32_0 : i32, i32, i32
  }
  func.func @transform_9(%arg0: i32) -> (i32, i32, i32, i32) {
    %c0_i32 = arith.constant 0 : i32
    %c0_i32_0 = arith.constant 0 : i32
    %c0_i32_1 = arith.constant 0 : i32
    %c0_i32_2 = arith.constant 0 : i32
    return %arg0, %c0_i32, %c0_i32_0, %c0_i32_1 : i32, i32, i32, i32
  }
}

</mosaic_0001>

<bundles_post_ra>
// kernel: transformer_forward.21
= control target key start
LH: loop header
LB: loop body
LE: loop exit
PB: predicated region body
PF: predicated region fallthrough
CT: control target
= control target key end

     0   :  { %s235_s1 = inlined_call_operand.vmem [shape: bf16[128,128], index: 1, kind: input, shape index: {}]   ;;  %s236_s2 = inlined_call_operand.vmem [shape: f32[1,128], index: 2, kind: input, shape index: {}]   ;;  %s237_s0 = inlined_call_operand.vmem [shape: bf16[16,128], index: 0, kind: input, shape index: {}]   ;;  %s238_s3 = inlined_call_operand.vmem [shape: bf16[16,128], index: 3, kind: output, shape index: {}]  }
   0x1   :  { %v175_v0 = vld [vmem:[%s235_s1 + $0x38] sm:$0xff]  ;;  %v174_v1 = vld [vmem:[%s235_s1 + $0x30] sm:$0xff]  ;;  %v173_v2 = vld [vmem:[%s235_s1 + $0x28] sm:$0xff] }
   0x2   :  { %94 = vmatpush.bf16.msra.mxu0 %v175_v0  ;;  %v172_v3 = vld [vmem:[%s235_s1 + $0x20] sm:$0xff]  ;;  %v171_v4 = vld [vmem:[%s235_s1 + $0x18] sm:$0xff]  ;;  %v170_v5 = vld [vmem:[%s235_s1 + $0x10] sm:$0xff] }
   0x3   :  { %v169_v6 = vld [vmem:[%s235_s1 + $0x8] sm:$0xff]  ;;  %v168_v7 = vld [vmem:[%s235_s1] sm:$0xff] }
   0x4   :  { %v167_v8 = vld [vmem:[%s237_s0] sm:$0xff] }
   0x5   :  { %v181_v10 = vld [vmem:[%s236_s2] ss:$0 sm:$0xff] }
   0x6   :  { %95 = vmatpush.bf16.msra.mxu0 %v174_v1 }
   0xa   :  { %96 = vmatpush.bf16.msra.mxu0 %v173_v2 }
   0xe   :  { %97 = vmatpush.bf16.msra.mxu0 %v172_v3 }
  0x12   :  { %98 = vmatpush.bf16.msra.mxu0 %v171_v4 }
  0x16   :  { %99 = vmatpush.bf16.msra.mxu0 %v170_v5 }
  0x1a   :  { %100 = vmatpush.bf16.msra.mxu0 %v169_v6 }
  0x1e   :  { %101 = vmatpush.bf16.msra.mxu0 %v168_v7 }
  0x21   :  { %102 = vmatmul.bf16.vlgmr.msra.gmra.mxu0 %v167_v8 }
  0x9e   :  { %v103_v9 = vpop.f32.mrf.mxu0 }
  0x9f   :  { %v121_v12 = vadd.f32 %v181_v10, %v103_v9 }
  0xa6   :  { %v105_v11 = vpop.f32.mrf.mxu0 }
  0xa7   :  { %v122_v13 = vadd.f32 %v181_v10, %v105_v11 }
  0xa9   :  { %v179_v14 = vpack.c.bf16 %v122_v13, %v121_v12 }
  0xab   :  { %180 = vst [vmem:[%s238_s3] sm:$0xff] %v179_v14  }

// kernel: transformer_forward.20
= control target key start
LH: loop header
LB: loop body
LE: loop exit
PB: predicated region body
PF: predicated region fallthrough
CT: control target
= control target key end

     0   :  { %s231_s1 = inlined_call_operand.vmem [shape: bf16[128,128], index: 1, kind: input, shape index: {}]   ;;  %s232_s2 = inlined_call_operand.vmem [shape: f32[1,128], index: 2, kind: input, shape index: {}]   ;;  %s233_s0 = inlined_call_operand.vmem [shape: bf16[16,128], index: 0, kind: input, shape index: {}]   ;;  %s234_s3 = inlined_call_operand.vmem [shape: f32[16,128], index: 3, kind: output, shape index: {}]  }
   0x1   :  { %v173_v0 = vld [vmem:[%s231_s1 + $0x38] sm:$0xff]  ;;  %v172_v1 = vld [vmem:[%s231_s1 + $0x30] sm:$0xff]  ;;  %v171_v2 = vld [vmem:[%s231_s1 + $0x28] sm:$0xff] }
   0x2   :  { %94 = vmatpush.bf16.msra.mxu0 %v173_v0  ;;  %v170_v3 = vld [vmem:[%s231_s1 + $0x20] sm:$0xff]  ;;  %v169_v4 = vld [vmem:[%s231_s1 + $0x18] sm:$0xff]  ;;  %v168_v5 = vld [vmem:[%s231_s1 + $0x10] sm:$0xff] }
   0x3   :  { %v167_v6 = vld [vmem:[%s231_s1 + $0x8] sm:$0xff]  ;;  %v166_v7 = vld [vmem:[%s231_s1] sm:$0xff] }
   0x4   :  { %v165_v8 = vld [vmem:[%s233_s0] sm:$0xff] }
   0x5   :  { %v174_v9 = vld [vmem:[%s232_s2] ss:$0 sm:$0xff] }
   0x6   :  { %95 = vmatpush.bf16.msra.mxu0 %v172_v1 }
   0xa   :  { %96 = vmatpush.bf16.msra.mxu0 %v171_v2 }
   0xe   :  { %97 = vmatpush.bf16.msra.mxu0 %v170_v3 }
  0x12   :  { %98 = vmatpush.bf16.msra.mxu0 %v169_v4 }
  0x16   :  { %99 = vmatpush.bf16.msra.mxu0 %v168_v5 }
  0x1a   :  { %100 = vmatpush.bf16.msra.mxu0 %v167_v6 }
  0x1e   :  { %101 = vmatpush.bf16.msra.mxu0 %v166_v7 }
  0x21   :  { %102 = vmatmul.bf16.vlgmr.msra.gmra.mxu0 %v165_v8 }
  0x9e   :  { %v103_v10 = vpop.f32.mrf.mxu0 }
  0x9f   :  { %v121_v11 = vadd.f32 %v174_v9, %v103_v10 }
  0xa1   :  { %123 = vst [vmem:[%s234_s3] sm:$0xff] %v121_v11 }
  0xa6   :  { %v105_v12 = vpop.f32.mrf.mxu0 }
  0xa7   :  { %v122_v13 = vadd.f32 %v174_v9, %v105_v12 }
  0xa9   :  { %124 = vst [vmem:[%s234_s3 + $0x8] sm:$0xff] %v122_v13 }

// kernel: transformer_forward.23
= control target key start
LH: loop header
LB: loop body
LE: loop exit
PB: predicated region body
PF: predicated region fallthrough
CT: control target
= control target key end

     0   :  { %vm50_vm0 = vcmask 261120   ;;  %vm107_vm1 = vcmask 523264   ;;  %v239_v26 = vmov 32.0   ;;  %s329_s1 = inlined_call_operand.vmem [shape: bf16[32,64], index: 1, kind: input, shape index: {}]   ;;  %s330_s0 = inlined_call_operand.vmem [shape: f32[16,32], index: 0, kind: input, shape index: {}]   ;;  %s331_s2 = inlined_call_operand.vmem [shape: f32[1,64], index: 2, kind: input, shape index: {}]   ;;  %s332_s4 = inlined_call_operand.vmem [shape: f32[1,32], index: 4, kind: input, shape index: {}]   ;;  %s333_s3 = inlined_call_operand.vmem [shape: bf16[64,32], index: 3, kind: input, shape index: {}]   ;;  %s334_s5 = inlined_call_operand.vmem [shape: f32[1,32], index: 5, kind: input, shape index: {}]   ;;  %s335_s6 = inlined_call_operand.vmem [shape: f32[1,32], index: 6, kind: input, shape index: {}]   ;;  %s336_s7 = inlined_call_operand.vmem [shape: f32[16,32], index: 7, kind: output, shape index: {}]  }
   0x1   :  { %v223_v0 = vld [vmem:[%s329_s1 + $0x8] sm:$0xff]  ;;  %v222_v1 = vld [vmem:[%s329_s1] sm:$0xff]  ;;  %v227_v5 = vld [vmem:[%s333_s3 + $0x18] sm:$0xff]  ;;  %233 = vrcp.f32 %v239_v26 }
   0x2   :  { %60 = vmatpush.bf16.msra.mxu0 %v223_v0  ;;  %v27_v2 = vld [vmem:[%s330_s0] sm:$0xff]  ;;  %v28_v3 = vld [vmem:[%s330_s0 + $0x8] sm:$0xff]  ;;  %115 = vmatpush.bf16.msra.mxu1 %v227_v5  ;;  %v226_v6 = vld [vmem:[%s333_s3 + $0x10] sm:$0xff] }
   0x3   :  { %v29_v4 = vpack.c.bf16 %v28_v3, %v27_v2  ;;  %v225_v7 = vld [vmem:[%s333_s3 + $0x8] sm:$0xff]  ;;  %v224_v8 = vld [vmem:[%s333_s3] sm:$0xff] }
   0x4   :  { %v229_v10 = vld [vmem:[%s331_s2] ss:$0 sm:$0xff] }
   0x5   :  { %v230_v17 = vld [vmem:[%s332_s4] ss:$0 sm:$0xff] }
   0x6   :  { %61 = vmatpush.bf16.msra.mxu0 %v222_v1  ;;  %116 = vmatpush.bf16.msra.mxu1 %v226_v6  ;;  %v231_v57 = vld [vmem:[%s334_s5] ss:$0 sm:$0xff] }
   0x7   :  { %v234_v27 = vpop.eup %233  ;;  %v232_v60 = vld [vmem:[%s335_s6] ss:$0 sm:$0xff] }
   0x8   :  { %v136_v28 = vmul.f32 32.0, %v234_v27  ;;  %vm140_vm2 = vweird.f32 %v234_v27 }
   0x9   :  { %204 = vmatmul.msk.bf16.vlgmr.msra.gmra.mxu0 %vm50_vm0, %v29_v4 }
   0xa   :  { %117 = vmatpush.bf16.msra.mxu1 %v225_v7  ;;  %v137_v29 = vsub.f32 1.0, %v136_v28 }
   0xc   :  { %v138_v30 = vmul.f32 %v234_v27, %v137_v29 }
   0xe   :  { %118 = vmatpush.bf16.msra.mxu1 %v224_v8  ;;  %v139_v31 = vadd.f32 %v234_v27, %v138_v30 }
  0x10   :  { %v141_v32 = vsel %vm140_vm2, %v234_v27, %v139_v31 }
  0x86   :  { %v63_v9 = vpop.f32.mrf.mxu0 }
  0x87   :  { %v64_v11 = vadd.f32 %v229_v10, %v63_v9 }
  0x89   :  { %v68_v14 = vmax.f32 %v64_v11, 0.0 }
  0x8e   :  { %v65_v12 = vpop.f32.mrf.mxu0 }
  0x8f   :  { %v66_v13 = vadd.f32 %v229_v10, %v65_v12 }
  0x91   :  { %v69_v15 = vmax.f32 %v66_v13, 0.0 }
  0x93   :  { %v70_v16 = vpack.c.bf16 %v69_v15, %v68_v14 }
  0x95   :  { %221 = vmatmul.msk.bf16.vlgmr.msra.gmra.mxu1 %vm107_vm1, %v70_v16 }
 0x112   :  { %v120_v18 = vpop.f32.mrf.mxu1 }
 0x113   :  { %v121_v19 = vadd.f32 %v230_v17, %v120_v18 }
 0x115   :  { %v125_v20 = vadd.f32 %v121_v19, %v27_v2 }
 0x117   :  { %v129_v21 = vsel %vm50_vm0, %v125_v20, 0.0 }
 0x118   :  { %130 = vadd.xlane.f32.xlu0 %v129_v21 }
 0x11a   :  { %v122_v22 = vpop.f32.mrf.mxu1 }
 0x11b   :  { %v123_v23 = vadd.f32 %v230_v17, %v122_v22 }
 0x11d   :  { %v126_v24 = vadd.f32 %v123_v23, %v28_v3 }
 0x11f   :  { %v132_v25 = vsel %vm50_vm0, %v126_v24, 0.0 }
 0x120   :  { %133 = vadd.xlane.f32.xlu0 %v132_v25 }
 0x18b   :  { %v131_v33 = vpop.xlane.xlu0 %130 }
 0x18c   :  { %v142_v34 = vmul.f32 %v141_v32, %v131_v33 }
 0x18e   :  { %v144_v35 = vsub.f32 %v125_v20, %v142_v34 }
 0x190   :  { %v146_v36 = vmul.f32 %v144_v35, %v144_v35 }
 0x192   :  { %v148_v37 = vsel %vm50_vm0, %v146_v36, 0.0 }
 0x193   :  { %149 = vadd.xlane.f32.xlu1 %v148_v37  ;;  %v134_v38 = vpop.xlane.xlu0 %133 }
 0x194   :  { %v143_v39 = vmul.f32 %v141_v32, %v134_v38 }
 0x196   :  { %v145_v40 = vsub.f32 %v126_v24, %v143_v39 }
 0x198   :  { %v147_v41 = vmul.f32 %v145_v40, %v145_v40 }
 0x19a   :  { %v151_v42 = vsel %vm50_vm0, %v147_v41, 0.0 }
 0x19b   :  { %152 = vadd.xlane.f32.xlu1 %v151_v42 }
 0x206   :  { %v150_v43 = vpop.xlane.xlu1 %149 }
 0x207   :  { %v154_v44 = vmul.f32 %v150_v43, %v141_v32 }
 0x209   :  { %v156_v45 = vadd.f32 1e-05, %v154_v44 }
 0x20b   :  { %235 = vrsqrt.f32 %v156_v45  ;;  %vm164_vm4 = vweird.f32 %v156_v45 }
 0x20e   :  { %v153_v46 = vpop.xlane.xlu1 %152 }
 0x20f   :  { %v155_v47 = vmul.f32 %v153_v46, %v141_v32 }
 0x211   :  { %v236_v48 = vpop.eup %235  ;;  %v157_v49 = vadd.f32 1e-05, %v155_v47 }
 0x212   :  { %v159_v50 = vmul.f32 %v236_v48, %v156_v45  ;;  %vm165_vm3 = vweird.f32 %v236_v48 }
 0x213   :  { %237 = vrsqrt.f32 %v157_v49  ;;  %vm166_vm5 = vmor %vm164_vm4, %vm165_vm3  ;;  %vm174_vm7 = vweird.f32 %v157_v49 }
 0x214   :  { %v160_v51 = vmul.f32 %v236_v48, %v159_v50 }
 0x216   :  { %v161_v52 = vmul.f32 0.5, %v160_v51 }
 0x218   :  { %v162_v53 = vsub.f32 1.5, %v161_v52 }
 0x219   :  { %v238_v54 = vpop.eup %237 }
 0x21a   :  { %v163_v55 = vmul.f32 %v236_v48, %v162_v53  ;;  %v169_v56 = vmul.f32 %v238_v54, %v157_v49  ;;  %vm175_vm6 = vweird.f32 %v238_v54 }
 0x21b   :  { %vm176_vm8 = vmor %vm174_vm7, %vm175_vm6 }
 0x21c   :  { %v167_v58 = vsel %vm166_vm5, %v236_v48, %v163_v55  ;;  %v170_v59 = vmul.f32 %v238_v54, %v169_v56 }
 0x21d   :  { %v178_v61 = vmul.f32 %v167_v58, %v144_v35 }
 0x21e   :  { %v171_v62 = vmul.f32 0.5, %v170_v59 }
 0x21f   :  { %v183_v63 = vmul.f32 %v231_v57, %v178_v61 }
 0x220   :  { %v172_v0 = vsub.f32 1.5, %v171_v62 }
 0x221   :  { %v188_v1 = vadd.f32 %v232_v60, %v183_v63 }
 0x222   :  { %v173_v2 = vmul.f32 %v238_v54, %v172_v0 }
 0x223   :  { %190 = vst.msk [vmem:[%s336_s7] sm:$0xff] %vm50_vm0, %v188_v1 }
 0x224   :  { %v177_v3 = vsel %vm176_vm8, %v238_v54, %v173_v2 }
 0x225   :  { %v179_v4 = vmul.f32 %v177_v3, %v145_v40 }
 0x227   :  { %v184_v5 = vmul.f32 %v231_v57, %v179_v4 }
 0x229   :  { %v189_v6 = vadd.f32 %v232_v60, %v184_v5 }
 0x22b   :  { %191 = vst.msk [vmem:[%s336_s7 + $0x8] sm:$0xff] %vm50_vm0, %v189_v6 }

// kernel: transformer_forward.22
= control target key start
LH: loop header
LB: loop body
LE: loop exit
PB: predicated region body
PF: predicated region fallthrough
CT: control target
= control target key end

     0   :  { %s860_s24 = smov 0   ;;  %s956_s0 = inlined_call_operand.vmem [shape: bf16[2,8,96], index: 0, kind: input, shape index: {}]   ;;  %s957_s1 = inlined_call_operand.vmem [shape: s32[2,8,8], index: 1, kind: input, shape index: {}]   ;;  %s958_s2 = inlined_call_operand.vmem [shape: f32[2,8,32], index: 2, kind: input, shape index: {}]   ;;  %s959_s3 = inlined_call_operand.vmem [shape: bf16[32,32], index: 3, kind: input, shape index: {}]   ;;  %s960_s4 = inlined_call_operand.vmem [shape: f32[1,32], index: 4, kind: input, shape index: {}]   ;;  %s961_s5 = inlined_call_operand.vmem [shape: f32[1,32], index: 5, kind: input, shape index: {}]   ;;  %s962_s6 = inlined_call_operand.vmem [shape: f32[1,32], index: 6, kind: input, shape index: {}]   ;;  %s963_s7 = inlined_call_operand.vmem [shape: f32[2,8,32], index: 7, kind: output, shape index: {}]  }
   0x1 LB: > { %s721_s25 = sadd.s32 4294967295, %s803_s24   ;;  %p725_p0 = scmp.ge.s32.totalorder %s803_s24, 1  ;;  %s803_s24 = sphi %s860_s24, %s17_s24  }
   0x2   : > { %p254_p1 = scmp.lt.s32.totalorder %s803_s24, 3 }
   0x4   : > { %p255_p2 = pnand %p725_p0, %p254_p1 }
   0x5   : > { %p292_p3 = scmp.lt.s32.totalorder (!%p255_p2), %s721_s25, 1  ;;  %s805_s30 = smov (!%p255_p2), 96  }
   0x6   : > { %258 = sbr.rel (%p255_p2) target bundleno = 1597 (0x63d), region = 48  ;;  %s806_s8 = smov (!%p255_p2), 88  }
   0x7   : > { %s807_s9 = smov (!%p255_p2), 120   ;;  %s808_s10 = smov (!%p255_p2), 64  }
   0x8   : > { %s809_s11 = smov (!%p255_p2), 80   ;;  %s810_s12 = smov (!%p255_p2), 72  }
   0x9   : > { %s811_s13 = smov (!%p255_p2), 112   ;;  %s812_s14 = smov (!%p255_p2), 104  }
   0xa   : > { %s813_s19 = smov (!%p255_p2), 56   ;;  %s814_s20 = smov (!%p255_p2), 40  }
   0xb   : > { %s965_s25 = smov (!%p292_p3, %s721_s25), 1  ;;  %vm317_vm0 = vcmask 64512   ;;  %vm356_vm2 = vcmask 1043456   ;;  %s815_s21 = smov 48   ;;  %vm560_vm3 = vcmask 130048   ;;  %vm562_vm4 = vcmask 195584  }
   0xc   : > { %s726_s26 = sshll.u32 %s965_s25, 2  ;;  %s889_s15 = sshll.u32 %s965_s25, 3  ;;  %vm588_vm5 = vcmask 261120  }
   0xd   : > { %s295_s29 = scalar_lea.vmem %s956_s0, %s726_s26  ;;  %s299_s18 = scalar_lea.vmem %s957_s1, %s889_s15 }
   0xe   : > { %v309_v0 = vld [vmem:[%s295_s29] sm:$0xf]  ;;  %s816_s22 = smov 8   ;;  %s817_s23 = smov 16  }
   0xf   : > { %v313_v1 = vunpack.c.l.b16 %v309_v0  ;;  %v310_v8 = vld [vmem:[%s299_s18] sm:$0xff]  ;;  %s818_s25 = smov 24  }
  0x10   : > { %vm311_vm1 = vcmp.ne.s32.totalorder %v310_v8, 0 }
  0x11   : > { %v874_v2 = vpack.c.b16 %v313_v1, %v313_v1 }
  0x13   : > { %315 = vrot.lane.b32.xlu0 %v874_v2, %s805_s30  ;;  %375 = vrot.lane.b32.xlu1 %v874_v2, %s806_s8 }
  0x14   : > { %373 = vrot.lane.b32.xlu2 %v874_v2, %s807_s9 }
  0x1c   : > { %351 = vrot.lane.b32.xlu2 %v874_v2, %s808_s10 }
  0x24   : > { %433 = vrot.lane.b32.xlu2 %v874_v2, %s809_s11  ;;  %s303_s11 = scalar_lea.vmem %s958_s2, %s889_s15 }
  0x2c   : > { %491 = vrot.lane.b32.xlu2 %v874_v2, %s810_s12 }
  0x34   : > { %431 = vrot.lane.b32.xlu2 %v874_v2, %s811_s13 }
  0x3c   : > { %489 = vrot.lane.b32.xlu2 %v874_v2, %s812_s14 }
  0x6e   : > { %v374_v7 = vpop.permute.xlu2 %373 }
  0x76   : > { %v352_v14 = vpop.permute.xlu2 %351 }
  0x77   : > { %v358_v19 = vsel %vm356_vm2, %v352_v14, 0 }
  0x78   : > { %367 = vmatpush.bf16.msra.mxu1 %v358_v19 }
  0x7e   : > { %v434_v15 = vpop.permute.xlu2 %433 }
  0x7f   : > { %v439_v17 = vsel %vm317_vm0, %v434_v15, 0 }
  0x80   : > { %448 = vmatpush.bf16.xpose.msrb.mxu1 %v439_v17 }
  0x85   : > { %v316_v3 = vpop.permute.xlu0 %315  ;;  %v376_v5 = vpop.permute.xlu1 %375 }
  0x86   : > { %v322_v4 = vsel %vm317_vm0, %v316_v3, 0  ;;  %v381_v6 = vsel %vm317_vm0, %v376_v5, 0  ;;  %v492_v16 = vpop.permute.xlu2 %491 }
  0x87   : > { %331 = vmatpush.bf16.xpose.msra.mxu0 %v322_v4  ;;  %390 = vmatpush.bf16.xpose.msra.mxu2 %v381_v6  ;;  %v497_v18 = vsel %vm317_vm0, %v492_v16, 0 }
  0x8e   : > { %730 = vmatmul.msk.bf16.vlgmr.msra.gmra.mxu0 %vm317_vm0, %v309_v0  ;;  %732 = vmatmul.msk.bf16.vlgmr.msra.gmra.mxu2 %vm317_vm0, %v374_v7  ;;  %v432_v20 = vpop.permute.xlu2 %431 }
  0x8f   : > { %506 = vmatpush.bf16.xpose.msrb.mxu0 %v497_v18 }
  0x96   : > { %v490_v22 = vpop.permute.xlu2 %489 }
  0x9e   : > { %736 = vmatmul.msk.bf16.vlgmr.msrb.gmra.mxu0 %vm317_vm0, %v490_v22 }
 0x10b   : > { %v333_v9 = vpop.f32.mrf.mxu0 }
 0x10c   : > { %v337_v10 = vmul.f32 0.35355338, %v333_v9 }
 0x10e   : > { %v338_v11 = vsel %vm311_vm1, %v337_v10, -1e+10 }
 0x10f   : > { %v339_v12 = vsel %vm317_vm0, %v338_v11, -inf }
 0x110   : > { %340 = vmax.xlane.f32.xlu0 %v339_v12 }
 0x111   : > { %v392_v21 = vpop.f32.mrf.mxu2 }
 0x112   : > { %v396_v23 = vmul.f32 0.35355338, %v392_v21 }
 0x113   : > { %v335_v13 = vpop.f32.mrf.mxu0 }
 0x114   : > { %v397_v24 = vsel %vm311_vm1, %v396_v23, -1e+10  ;;  %v750_v23 = vld [vmem:[%s959_s3 + $0x8] sm:$0xff] }
 0x115   : > { %v398_v26 = vsel %vm317_vm0, %v397_v24, -inf }
 0x116   : > { %399 = vmax.xlane.f32.xlu2 %v398_v26 }
 0x119   : > { %v394_v29 = vpop.f32.mrf.mxu2 }
 0x11b   : > { %v508_v32 = vpop.f32.mrf.mxu0 }
 0x11c   : > { %v512_v33 = vmul.f32 0.35355338, %v508_v32  ;;  %v774_v32 = vld [vmem:[%s960_s4] ss:$0 sm:$0xff] }
 0x11e   : > { %v513_v34 = vsel %vm311_vm1, %v512_v33, -1e+10 }
 0x11f   : > { %v514_v36 = vsel %vm317_vm0, %v513_v34, -inf }
 0x123   : > { %v510_v37 = vpop.f32.mrf.mxu0 }
 0x183   : > { %v341_v25 = vpop.xlane.xlu0 %340 }
 0x184   : > { %v342_v27 = vsub.f32 %v338_v11, %v341_v25 }
 0x186   : > { %v343_v28 = vmul.f32 1.442695, %v342_v27 }
 0x188   : > { %777 = vpow2.f32 %v343_v28 }
 0x189   : > { %v400_v42 = vpop.xlane.xlu2 %399 }
 0x18a   : > { %v401_v44 = vsub.f32 %v397_v24, %v400_v42  ;;  %v749_v24 = vld [vmem:[%s959_s3] sm:$0xff] }
 0x18c   : > { %v402_v45 = vmul.f32 1.442695, %v401_v44 }
 0x18e   : > { %v778_v30 = vpop.eup %777 }
 0x18f   : > { %v345_v31 = vsel %vm317_vm0, %v778_v30, 0.0 }
 0x190   : > { %346 = vadd.xlane.f32.xlu1 %v345_v31 }
 0x198   : > { %515 = vmax.xlane.f32.xlu1 %v514_v36 }
 0x1b1   : > { %410 = vrot.lane.b32.xlu1 %v874_v2, %s813_s19  ;;  %s307_s19 = scalar_lea.vmem %s963_s7, %s889_s15 }
 0x1b9   : > { %526 = vrot.lane.b32.xlu1 %v874_v2, %s814_s20 }
 0x203   : > { %v347_v35 = vpop.xlane.xlu1 %346 }
 0x204   : > { %779 = vrcp.f32 %v347_v35 }
 0x205   : > { %781 = vpow2.f32 %v402_v45 }
 0x20a   : > { %v780_v38 = vpop.eup %779 }
 0x20b   : > { %v349_v39 = vmul.f32 %v780_v38, %v778_v30  ;;  %v516_v46 = vpop.xlane.xlu1 %515  ;;  %v782_v54 = vpop.eup %781 }
 0x20c   : > { %v517_v49 = vsub.f32 %v513_v34, %v516_v46  ;;  %v404_v55 = vsel %vm317_vm0, %v782_v54, 0.0  ;;  %v569_v34 = vld [vmem:[%s303_s11] sm:$0xff] }
 0x20d   : > { %v350_v40 = vpack.c.bf16 %v349_v39, %v349_v39  ;;  %v819_v39 = vmov 32.0  }
 0x20e   : > { %v518_v52 = vmul.f32 1.442695, %v517_v49 }
 0x20f   : > { %731 = vmatmul.msk.bf16.vlgmr.msra.gmra.mxu1 %vm317_vm0, %v350_v40 }
 0x210   : > { %783 = vpow2.f32 %v518_v52  ;;  %598 = vmatpush.bf16.msra.mxu1 %v750_v23 }
 0x214   : > { %599 = vmatpush.bf16.msra.mxu1 %v749_v24 }
 0x216   : > { %v784_v56 = vpop.eup %783 }
 0x217   : > { %v520_v57 = vsel %vm317_vm0, %v784_v56, 0.0 }
 0x21f   : > { %734 = vmatmul.msk.bf16.vlgmr.msrb.gmra.mxu1 %vm317_vm0, %v432_v20 }
 0x223   : > { %v411_v58 = vpop.permute.xlu1 %410 }
 0x224   : > { %v416_v59 = vsel %vm356_vm2, %v411_v58, 0 }
 0x225   : > { %425 = vmatpush.bf16.msra.mxu3 %v416_v59 }
 0x22b   : > { %v527_v60 = vpop.permute.xlu1 %526 }
 0x22c   : > { %v532_v61 = vsel %vm356_vm2, %v527_v60, 0  ;;  %v775_v60 = vld [vmem:[%s961_s5] ss:$0 sm:$0xff] }
 0x22d   : > { %541 = vmatpush.bf16.msrb.mxu2 %v532_v61 }
 0x28c   : > { %v910_v41 = vpop.f32.mrf.mxu1 }
 0x294   : > { %v371_v43 = vpop.f32.mrf.mxu1 }
 0x29c   : > { %v450_v47 = vpop.f32.mrf.mxu1 }
 0x29d   : > { %v454_v48 = vmul.f32 0.35355338, %v450_v47 }
 0x29f   : > { %v455_v50 = vsel %vm311_vm1, %v454_v48, -1e+10 }
 0x2a0   : > { %v456_v51 = vsel %vm317_vm0, %v455_v50, -inf }
 0x2a1   : > { %457 = vmax.xlane.f32.xlu0 %v456_v51 }
 0x2a4   : > { %v452_v53 = vpop.f32.mrf.mxu1 }
 0x2a9   : > { %405 = vadd.xlane.f32.xlu0 %v404_v55 }
 0x2b1   : > { %521 = vadd.xlane.f32.xlu0 %v520_v57 }
 0x314   : > { %v458_v62 = vpop.xlane.xlu0 %457 }
 0x315   : > { %v459_v63 = vsub.f32 %v455_v50, %v458_v62  ;;  %v776_v62 = vld [vmem:[%s962_s6] ss:$0 sm:$0xff] }
 0x317   : > { %v460_v0 = vmul.f32 1.442695, %v459_v63 }
 0x319   : > { %785 = vpow2.f32 %v460_v0 }
 0x31c   : > { %v406_v1 = vpop.xlane.xlu0 %405 }
 0x31d   : > { %787 = vrcp.f32 %v406_v1 }
 0x31f   : > { %v786_v3 = vpop.eup %785 }
 0x320   : > { %v462_v4 = vsel %vm317_vm0, %v786_v3, 0.0 }
 0x321   : > { %463 = vadd.xlane.f32.xlu0 %v462_v4 }
 0x323   : > { %v788_v5 = vpop.eup %787 }
 0x324   : > { %v522_v6 = vpop.xlane.xlu0 %521  ;;  %v408_v7 = vmul.f32 %v788_v5, %v782_v54 }
 0x325   : > { %789 = vrcp.f32 %v522_v6 }
 0x326   : > { %v409_v8 = vpack.c.bf16 %v408_v7, %v408_v7 }
 0x328   : > { %733 = vmatmul.msk.bf16.vlgmr.msra.gmra.mxu3 %vm317_vm0, %v409_v8 }
 0x32b   : > { %v790_v9 = vpop.eup %789 }
 0x32c   : > { %v524_v10 = vmul.f32 %v790_v9, %v784_v56 }
 0x32e   : > { %v525_v11 = vpack.c.bf16 %v524_v10, %v524_v10 }
 0x330   : > { %737 = vmatmul.msk.bf16.vlgmr.msrb.gmra.mxu2 %vm317_vm0, %v525_v11 }
 0x335   : > { %468 = vrot.lane.b32.xlu0 %v874_v2, %s815_s21 }
 0x394   : > { %v464_v12 = vpop.xlane.xlu0 %463 }
 0x395   : > { %791 = vrcp.f32 %v464_v12 }
 0x396   : > { %793 = vrcp.f32 %v819_v39 }
 0x39b   : > { %v792_v13 = vpop.eup %791 }
 0x39c   : > { %v466_v14 = vmul.f32 %v792_v13, %v786_v3  ;;  %v794_v40 = vpop.eup %793 }
 0x39d   : > { %vm614_vm6 = vweird.f32 %v794_v40 }
 0x39e   : > { %v467_v17 = vpack.c.bf16 %v466_v14, %v466_v14 }
 0x3a7   : > { %v469_v15 = vpop.permute.xlu0 %468 }
 0x3a8   : > { %v474_v16 = vsel %vm356_vm2, %v469_v15, 0 }
 0x3a9   : > { %483 = vmatpush.bf16.msrb.mxu3 %v474_v16 }
 0x3ab   : > { %v427_v18 = vpop.f32.mrf.mxu3 }
 0x3ac   : > { %735 = vmatmul.msk.bf16.vlgmr.msrb.gmra.mxu3 %vm317_vm0, %v467_v17  ;;  %548 = vrot.lane.b32.xlu2 %v427_v18, %s816_s22 }
 0x3b3   : > { %v429_v19 = vpop.f32.mrf.mxu3  ;;  %v543_v20 = vpop.f32.mrf.mxu2 }
 0x3bb   : > { %v545_v21 = vpop.f32.mrf.mxu2 }
 0x406   : > { %v549_v26 = vpop.permute.xlu2 %548 }
 0x407   : > { %v559_v27 = vsel %vm317_vm0, %v910_v41, %v549_v26  ;;  %v610_v41 = vmul.f32 32.0, %v794_v40 }
 0x409   : > { %v611_v42 = vsub.f32 1.0, %v610_v41 }
 0x40b   : > { %v612_v43 = vmul.f32 %v794_v40, %v611_v42 }
 0x40d   : > { %v613_v44 = vadd.f32 %v794_v40, %v612_v43 }
 0x40f   : > { %v615_v45 = vsel %vm614_vm6, %v794_v40, %v613_v44 }
 0x42f   : > { %v485_v22 = vpop.f32.mrf.mxu3 }
 0x430   : > { %552 = vrot.lane.b32.xlu1 %v485_v22, %s817_s23 }
 0x437   : > { %v487_v2 = vpop.f32.mrf.mxu3 }
 0x438   : > { %556 = vrot.lane.b32.xlu1 %v543_v20, %s818_s25 }
 0x4a2   : > { %v553_v25 = vpop.permute.xlu1 %552 }
 0x4a3   : > { %v561_v28 = vsel %vm560_vm3, %v559_v27, %v553_v25 }
 0x4aa   : > { %v557_v29 = vpop.permute.xlu1 %556 }
 0x4ab   : > { %v563_v30 = vsel %vm562_vm4, %v561_v28, %v557_v29 }
 0x4ac   : > { %v572_v31 = vpack.c.bf16 %v563_v30, %v563_v30 }
 0x4ae   : > { %746 = vmatmul.msk.bf16.vlgmr.msra.gmra.mxu1 %vm588_vm5, %v572_v31 }
 0x52b   : > { %v601_v33 = vpop.f32.mrf.mxu1 }
 0x52c   : > { %v602_v35 = vadd.f32 %v774_v32, %v601_v33 }
 0x52e   : > { %v605_v36 = vadd.f32 %v602_v35, %v569_v34 }
 0x530   : > { %v606_v37 = vsel %vm588_vm5, %v605_v36, 0.0 }
 0x531   : > { %607 = vadd.xlane.f32.xlu0 %v606_v37 }
 0x533   : > { %v603_v38 = vpop.f32.mrf.mxu1 }
 0x5a4   : > { %v608_v46 = vpop.xlane.xlu0 %607 }
 0x5a5   : > { %v616_v47 = vmul.f32 %v615_v45, %v608_v46 }
 0x5a7   : > { %v617_v48 = vsub.f32 %v605_v36, %v616_v47 }
 0x5a9   : > { %v618_v49 = vmul.f32 %v617_v48, %v617_v48 }
 0x5ab   : > { %v619_v50 = vsel %vm588_vm5, %v618_v49, 0.0 }
 0x5ac   : > { %620 = vadd.xlane.f32.xlu1 %v619_v50 }
 0x61f   : > { %v621_v51 = vpop.xlane.xlu1 %620 }
 0x620   : > { %v622_v52 = vmul.f32 %v621_v51, %v615_v45 }
 0x622   : > { %v623_v53 = vadd.f32 1e-05, %v622_v52 }
 0x624   : > { %795 = vrsqrt.f32 %v623_v53  ;;  %vm630_vm8 = vweird.f32 %v623_v53 }
 0x62a   : > { %v796_v54 = vpop.eup %795 }
 0x62b   : > { %v625_v55 = vmul.f32 %v796_v54, %v623_v53  ;;  %vm631_vm7 = vweird.f32 %v796_v54 }
 0x62c   : > { %vm632_vm9 = vmor %vm630_vm8, %vm631_vm7 }
 0x62d   : > { %v626_v56 = vmul.f32 %v796_v54, %v625_v55 }
 0x62f   : > { %v627_v57 = vmul.f32 0.5, %v626_v56 }
 0x631   : > { %v628_v58 = vsub.f32 1.5, %v627_v57 }
 0x633   : > { %v629_v59 = vmul.f32 %v796_v54, %v628_v58 }
 0x635   : > { %v633_v61 = vsel %vm632_vm9, %v796_v54, %v629_v59 }
 0x636   : > { %v634_v63 = vmul.f32 %v633_v61, %v617_v48 }
 0x638   : > { %v638_v0 = vmul.f32 %v775_v60, %v634_v63 }
 0x63a   : > { %v642_v1 = vadd.f32 %v776_v62, %v638_v0 }
 0x63c   : > { %643 = vst.msk [vmem:[%s307_s19] sm:$0xff] %vm588_vm5, %v642_v1 }
 0x63d PF: > { %s17_s24 = sadd.s32 1, %s803_s24  }
 0x63e   : > { %p14_p4 = scmp.ge.s32.totalorder %s17_s24, 4  }
 0x640   :  { %16 = sbr.rel (!%p14_p4) target bundleno = 1 (0x1), region = 84 }

// kernel: transformer_forward.25
= control target key start
LH: loop header
LB: loop body
LE: loop exit
PB: predicated region body
PF: predicated region fallthrough
CT: control target
= control target key end

     0   :  { %s1253_s0 = inlined_call_operand.vmem [shape: bf16[2,8,96], index: 0, kind: input, shape index: {}]   ;;  %s1254_s1 = inlined_call_operand.vmem [shape: s32[2,8,8], index: 1, kind: input, shape index: {}]   ;;  %s1255_s2 = inlined_call_operand.vmem [shape: f32[2,8,32], index: 2, kind: input, shape index: {}]   ;;  %s1256_s3 = inlined_call_operand.vmem [shape: bf16[32,32], index: 3, kind: input, shape index: {}]   ;;  %s1257_s4 = inlined_call_operand.vmem [shape: f32[1,32], index: 4, kind: input, shape index: {}]   ;;  %s1258_s5 = inlined_call_operand.vmem [shape: f32[1,32], index: 5, kind: input, shape index: {}]   ;;  %s1259_s6 = inlined_call_operand.vmem [shape: f32[1,32], index: 6, kind: input, shape index: {}]   ;;  %s1260_s7 = inlined_call_operand.vmem [shape: f32[2,8,32], index: 7, kind: output, shape index: {0}]   ;;  %s1261_s8 = inlined_call_operand.hbm [shape: f32[2,4,8,8], index: 8, kind: output, shape index: {1}]  }
   0x1   :  { %1263 = sst [smem:[#allocation5_spill]] %s1253_s0 }
   0x2   :  { %1264 = sst [smem:[#allocation6_spill]] %s1254_s1 }
   0x3   :  { %14 = vsyncpa [#allocation3], 0 }
   0x4   :  { %16 = vsyncpa [#allocation3 + $0x1], 0  ;;  %s1062_s27 = smov 0   ;;  %s1064_s28 = smov 0  }
   0x5   :  { %s1066_s29 = smov 0   ;;  %s1068_s30 = smov 0  }
   0x6 LB: > { %s1083_s9 = sadd.s32 4294967295, %s999_s30   ;;  %s822_s10 = sadd.s32 4294967294, %s999_s30   ;;  %s999_s30 = sphi %s1068_s30, %s1273_s30   ;;  %s995_s29 = sphi %s1066_s29, %s1272_s29   ;;  %s991_s28 = sphi %s1064_s28, %s1271_s28   ;;  %s987_s27 = sphi %s1062_s27, %s1270_s27  }
   0x7   : > { %s1087_s11 = sadd.s32 1, %s999_s30   ;;  %s217_s12 = sadd.s32 1, %s995_s29 }
   0x8   : > { %s214_s13 = ssub.s32 %s999_s30, %s1087_s11  ;;  %p227_p0 = scmp.ne.s32.totalorder %s995_s29, %s991_s28 }
   0x9   : > { %p215_p1 = scmp.eq.s32.totalorder %s214_s13, 0  ;;  %p228_p2 = scmp.eq.s32.totalorder %s1083_s9, 1 }
   0xa   : > { %p233_p3 = scmp.ne.s32.totalorder %s991_s28, %s987_s27  ;;  %p234_p4 = scmp.eq.s32.totalorder %s822_s10, 1 }
   0xb   : > { %s1098_s14 = scalar_select %p215_p1, %s995_s29, %s217_s12  }
   0xc   : > { %p1100_p5 = por %p228_p2, %p227_p0  ;;  %p1104_p6 = por %p234_p4, %p233_p3 }
   0xd   : > { %p825_p7 = scmp.ge.s32.totalorder %s999_s30, 1  ;;  %p285_p8 = scmp.lt.s32.totalorder %s999_s30, 3 }
   0xf   : > { %p286_p9 = pnand %p825_p7, %p285_p8 }
  0x10   : > { %p330_p10 = scmp.lt.s32.totalorder (!%p286_p9), %s1083_s9, 1  ;;  %s1267_s0 = sld [smem:[#allocation5_spill]] (!%p286_p9) }
  0x11   : > { %289 = sbr.rel (%p286_p9) target bundleno = 1609 (0x649), region = 48  ;;  %s1001_s22 = smov (!%p286_p9), 96  }
  0x12   : > { %s1002_s23 = smov (!%p286_p9), 88   ;;  %s1003_s24 = smov (!%p286_p9), 120  }
  0x13   : > { %s1004_s25 = smov (!%p286_p9), 64   ;;  %s1005_s26 = smov (!%p286_p9), 80  }
  0x14   : > { %s1006_s10 = smov (!%p286_p9), 72   ;;  %s1007_s12 = smov (!%p286_p9), 112  }
  0x15   : > { %s1008_s13 = smov (!%p286_p9), 104   ;;  %s1268_s1 = sld [smem:[#allocation6_spill]] (!%p286_p9) }
  0x16   : > { %s1112_s17 = scalar_select %p330_p10, %s1083_s9, 1  ;;  %vm355_vm0 = vcmask 64512   ;;  %vm395_vm2 = vcmask 1043456   ;;  %vm605_vm3 = vcmask 130048   ;;  %vm607_vm4 = vcmask 195584  }
  0x17   : > { %vm633_vm5 = vcmask 261120   ;;  %s858_s19 = sshll.u32 %s1083_s9, 5  ;;  %s957_s9 = scalar_lea.hbm %s1261_s8, 64 }
  0x18   : > { %s827_s18 = sshll.u32 %s1112_s17, 2 }
  0x19   : > { %s333_s21 = scalar_lea.vmem %s1267_s0, %s827_s18  ;;  %s1133_s18 = sshll.u32 %s1112_s17, 3 }
  0x1a   : > { %v347_v0 = vld [vmem:[%s333_s21] sm:$0xf]  ;;  %s327_s17 = sand.u32 1, %s991_s28  }
  0x1b   : > { %v351_v1 = vunpack.c.l.b16 %v347_v0  ;;  %s337_s21 = scalar_lea.vmem %s1268_s1, %s1133_s18 }
  0x1c   : > { %v1139_v8 = vld [vmem:[%s337_s21] sm:$0xff] }
  0x1d   : > { %v1118_v2 = vpack.c.b16 %v351_v1, %v351_v1  ;;  %vm349_vm1 = vcmp.ne.s32.totalorder %v1139_v8, 0 }
  0x1f   : > { %353 = vrot.lane.b32.xlu0 %v1118_v2, %s1001_s22  ;;  %414 = vrot.lane.b32.xlu1 %v1118_v2, %s1002_s23  ;;  %s826_s22 = sshll.u32 %s327_s17, 5 }
  0x20   : > { %412 = vrot.lane.b32.xlu2 %v1118_v2, %s1003_s24  ;;  %s1159_s23 = scalar_lea.vmem [#allocation2], %s826_s22  ;;  %s1009_s24 = smov 56  }
  0x21   : > { %s708_s22 = scalar_lea.hbm %s1261_s8, %s858_s19 }
  0x28   : > { %390 = vrot.lane.b32.xlu2 %v1118_v2, %s1004_s25  ;;  %s1010_s25 = smov 40  }
  0x30   : > { %474 = vrot.lane.b32.xlu2 %v1118_v2, %s1005_s26  ;;  %s1011_s26 = smov 48  }
  0x38   : > { %534 = vrot.lane.b32.xlu2 %v1118_v2, %s1006_s10  ;;  %s1262_s10 = smov 8  }
  0x40   : > { %472 = vrot.lane.b32.xlu2 %v1118_v2, %s1007_s12  ;;  %s1013_s12 = smov 16  }
  0x48   : > { %532 = vrot.lane.b32.xlu2 %v1118_v2, %s1008_s13  ;;  %s1014_s13 = smov 24  }
  0x7a   : > { %v413_v7 = vpop.permute.xlu2 %412 }
  0x82   : > { %v391_v14 = vpop.permute.xlu2 %390 }
  0x83   : > { %v397_v19 = vsel %vm395_vm2, %v391_v14, 0 }
  0x84   : > { %406 = vmatpush.bf16.msra.mxu1 %v397_v19 }
  0x8a   : > { %v475_v15 = vpop.permute.xlu2 %474 }
  0x8b   : > { %v480_v17 = vsel %vm355_vm0, %v475_v15, 0 }
  0x8c   : > { %489 = vmatpush.bf16.xpose.msrb.mxu1 %v480_v17 }
  0x91   : > { %v354_v3 = vpop.permute.xlu0 %353  ;;  %v415_v5 = vpop.permute.xlu1 %414 }
  0x92   : > { %v360_v4 = vsel %vm355_vm0, %v354_v3, 0  ;;  %v420_v6 = vsel %vm355_vm0, %v415_v5, 0  ;;  %v535_v16 = vpop.permute.xlu2 %534 }
  0x93   : > { %369 = vmatpush.bf16.xpose.msra.mxu0 %v360_v4  ;;  %429 = vmatpush.bf16.xpose.msra.mxu2 %v420_v6  ;;  %v540_v18 = vsel %vm355_vm0, %v535_v16, 0 }
  0x9a   : > { %831 = vmatmul.msk.bf16.vlgmr.msra.gmra.mxu0 %vm355_vm0, %v347_v0  ;;  %833 = vmatmul.msk.bf16.vlgmr.msra.gmra.mxu2 %vm355_vm0, %v413_v7  ;;  %v473_v20 = vpop.permute.xlu2 %472 }
  0x9b   : > { %549 = vmatpush.bf16.xpose.msrb.mxu0 %v540_v18 }
  0xa2   : > { %v533_v22 = vpop.permute.xlu2 %532 }
  0xaa   : > { %839 = vmatmul.msk.bf16.vlgmr.msrb.gmra.mxu0 %vm355_vm0, %v533_v22 }
 0x117   : > { %v371_v9 = vpop.f32.mrf.mxu0 }
 0x118   : > { %v375_v10 = vmul.f32 0.35355338, %v371_v9 }
 0x11a   : > { %v376_v11 = vsel %vm349_vm1, %v375_v10, -1e+10 }
 0x11b   : > { %v377_v12 = vsel %vm355_vm0, %v376_v11, -inf }
 0x11c   : > { %378 = vmax.xlane.f32.xlu0 %v377_v12 }
 0x11d   : > { %v431_v21 = vpop.f32.mrf.mxu2 }
 0x11e   : > { %v435_v23 = vmul.f32 0.35355338, %v431_v21 }
 0x11f   : > { %v373_v13 = vpop.f32.mrf.mxu0 }
 0x120   : > { %v436_v24 = vsel %vm349_vm1, %v435_v23, -1e+10  ;;  %v857_v23 = vld [vmem:[%s1256_s3 + $0x8] sm:$0xff] }
 0x121   : > { %v437_v26 = vsel %vm355_vm0, %v436_v24, -inf }
 0x122   : > { %438 = vmax.xlane.f32.xlu2 %v437_v26 }
 0x125   : > { %v433_v29 = vpop.f32.mrf.mxu2 }
 0x127   : > { %v551_v32 = vpop.f32.mrf.mxu0 }
 0x128   : > { %v555_v33 = vmul.f32 0.35355338, %v551_v32  ;;  %v914_v32 = vld [vmem:[%s1257_s4] ss:$0 sm:$0xff] }
 0x12a   : > { %v556_v34 = vsel %vm349_vm1, %v555_v33, -1e+10 }
 0x12b   : > { %v557_v36 = vsel %vm355_vm0, %v556_v34, -inf }
 0x12f   : > { %v553_v37 = vpop.f32.mrf.mxu0 }
 0x18f   : > { %v379_v25 = vpop.xlane.xlu0 %378 }
 0x190   : > { %v380_v27 = vsub.f32 %v376_v11, %v379_v25 }
 0x192   : > { %v381_v28 = vmul.f32 1.442695, %v380_v27 }
 0x194   : > { %917 = vpow2.f32 %v381_v28 }
 0x195   : > { %v439_v42 = vpop.xlane.xlu2 %438 }
 0x196   : > { %v440_v44 = vsub.f32 %v436_v24, %v439_v42  ;;  %v856_v24 = vld [vmem:[%s1256_s3] sm:$0xff] }
 0x198   : > { %v441_v45 = vmul.f32 1.442695, %v440_v44 }
 0x19a   : > { %v918_v30 = vpop.eup %917 }
 0x19b   : > { %v383_v31 = vsel %vm355_vm0, %v918_v30, 0.0 }
 0x19c   : > { %384 = vadd.xlane.f32.xlu1 %v383_v31 }
 0x1a4   : > { %558 = vmax.xlane.f32.xlu1 %v557_v36 }
 0x1bd   : > { %451 = vrot.lane.b32.xlu1 %v1118_v2, %s1009_s24  ;;  %s709_s24 = sshll.u32 %s1159_s23, 4  ;;  %s710_s24 = int_to_ptr.vmem [resolvable:$true] %s709_s24 }
 0x1c5   : > { %571 = vrot.lane.b32.xlu1 %v1118_v2, %s1010_s25  ;;  %s711_s25 = sshll.u32 %s708_s22, 4  ;;  %s712_s25 = int_to_ptr.hbm [resolvable:$true] %s711_s25 }
 0x20f   : > { %v385_v35 = vpop.xlane.xlu1 %384 }
 0x210   : > { %919 = vrcp.f32 %v385_v35 }
 0x211   : > { %921 = vpow2.f32 %v441_v45 }
 0x216   : > { %v920_v38 = vpop.eup %919 }
 0x217   : > { %v387_v39 = vmul.f32 %v920_v38, %v918_v30  ;;  %v559_v46 = vpop.xlane.xlu1 %558  ;;  %v922_v54 = vpop.eup %921 }
 0x218   : > { %v560_v49 = vsub.f32 %v556_v34, %v559_v46  ;;  %v443_v55 = vsel %vm355_vm0, %v922_v54, 0.0 }
 0x219   : > { %388 = vst.msk [vmem:[%s1159_s23] sm:$0xff] %vm355_vm0, %v387_v39  ;;  %v389_v40 = vpack.c.bf16 %v387_v39, %v387_v39  ;;  %v1015_v39 = vmov 32.0  }
 0x21a   : > { %v561_v52 = vmul.f32 1.442695, %v560_v49 }
 0x21b   : > { %832 = vmatmul.msk.bf16.vlgmr.msra.gmra.mxu1 %vm355_vm0, %v389_v40 }
 0x21c   : > { %923 = vpow2.f32 %v561_v52  ;;  %643 = vmatpush.bf16.msra.mxu1 %v857_v23 }
 0x220   : > { %644 = vmatpush.bf16.msra.mxu1 %v856_v24 }
 0x222   : > { %v924_v56 = vpop.eup %923 }
 0x223   : > { %v563_v57 = vsel %vm355_vm0, %v924_v56, 0.0 }
 0x22b   : > { %836 = vmatmul.msk.bf16.vlgmr.msrb.gmra.mxu1 %vm355_vm0, %v473_v20 }
 0x22f   : > { %v452_v58 = vpop.permute.xlu1 %451 }
 0x230   : > { %v457_v59 = vsel %vm395_vm2, %v452_v58, 0 }
 0x231   : > { %466 = vmatpush.bf16.msra.mxu3 %v457_v59 }
 0x237   : > { %v572_v60 = vpop.permute.xlu1 %571 }
 0x238   : > { %v577_v61 = vsel %vm395_vm2, %v572_v60, 0 }
 0x239   : > { %586 = vmatpush.bf16.msrb.mxu2 %v577_v61 }
 0x298   : > { %v1167_v41 = vpop.f32.mrf.mxu1 }
 0x2a0   : > { %v410_v43 = vpop.f32.mrf.mxu1 }
 0x2a8   : > { %v491_v47 = vpop.f32.mrf.mxu1 }
 0x2a9   : > { %v495_v48 = vmul.f32 0.35355338, %v491_v47 }
 0x2ab   : > { %v496_v50 = vsel %vm349_vm1, %v495_v48, -1e+10 }
 0x2ac   : > { %v497_v51 = vsel %vm355_vm0, %v496_v50, -inf }
 0x2ad   : > { %498 = vmax.xlane.f32.xlu0 %v497_v51 }
 0x2b0   : > { %v493_v53 = vpop.f32.mrf.mxu1 }
 0x2b5   : > { %444 = vadd.xlane.f32.xlu0 %v443_v55 }
 0x2bd   : > { %564 = vadd.xlane.f32.xlu0 %v563_v57 }
 0x320   : > { %v499_v62 = vpop.xlane.xlu0 %498 }
 0x321   : > { %v500_v63 = vsub.f32 %v496_v50, %v499_v62 }
 0x323   : > { %v501_v0 = vmul.f32 1.442695, %v500_v63 }
 0x325   : > { %925 = vpow2.f32 %v501_v0 }
 0x328   : > { %v445_v1 = vpop.xlane.xlu0 %444 }
 0x329   : > { %927 = vrcp.f32 %v445_v1 }
 0x32b   : > { %v926_v3 = vpop.eup %925 }
 0x32c   : > { %v503_v4 = vsel %vm355_vm0, %v926_v3, 0.0 }
 0x32d   : > { %504 = vadd.xlane.f32.xlu0 %v503_v4 }
 0x32f   : > { %v928_v5 = vpop.eup %927 }
 0x330   : > { %v565_v6 = vpop.xlane.xlu0 %564  ;;  %v447_v7 = vmul.f32 %v928_v5, %v922_v54 }
 0x331   : > { %929 = vrcp.f32 %v565_v6 }
 0x332   : > { %834 = vst.msk [vmem:[%s1159_s23 + $0x8] sm:$0xff] %vm355_vm0, %v447_v7  ;;  %v450_v8 = vpack.c.bf16 %v447_v7, %v447_v7 }
 0x334   : > { %835 = vmatmul.msk.bf16.vlgmr.msra.gmra.mxu3 %vm355_vm0, %v450_v8 }
 0x337   : > { %v930_v9 = vpop.eup %929 }
 0x338   : > { %v567_v10 = vmul.f32 %v930_v9, %v924_v56 }
 0x33a   : > { %840 = vst.msk [vmem:[%s1159_s23 + $0x18] sm:$0xff] %vm355_vm0, %v567_v10  ;;  %v570_v11 = vpack.c.bf16 %v567_v10, %v567_v10 }
 0x33c   : > { %841 = vmatmul.msk.bf16.vlgmr.msrb.gmra.mxu2 %vm355_vm0, %v570_v11 }
 0x341   : > { %511 = vrot.lane.b32.xlu0 %v1118_v2, %s1011_s26  ;;  %s694_s26 = scalar_lea.sflag [#allocation3], %s327_s17 }
 0x3a0   : > { %v505_v12 = vpop.xlane.xlu0 %504 }
 0x3a1   : > { %931 = vrcp.f32 %v505_v12 }
 0x3a2   : > { %933 = vrcp.f32 %v1015_v39 }
 0x3a7   : > { %v932_v13 = vpop.eup %931 }
 0x3a8   : > { %v507_v14 = vmul.f32 %v932_v13, %v926_v3  ;;  %v934_v40 = vpop.eup %933 }
 0x3a9   : > { %vm659_vm6 = vweird.f32 %v934_v40 }
 0x3aa   : > { %837 = vst.msk [vmem:[%s1159_s23 + $0x10] sm:$0xff] %vm355_vm0, %v507_v14  ;;  %v510_v17 = vpack.c.bf16 %v507_v14, %v507_v14 }
 0x3b3   : > { %v512_v15 = vpop.permute.xlu0 %511 }
 0x3b4   : > { %v517_v16 = vsel %vm395_vm2, %v512_v15, 0 }
 0x3b5   : > { %526 = vmatpush.bf16.msrb.mxu3 %v517_v16 }
 0x3b7   : > { %v468_v18 = vpop.f32.mrf.mxu3 }
 0x3b8   : > { %838 = vmatmul.msk.bf16.vlgmr.msrb.gmra.mxu3 %vm355_vm0, %v510_v17  ;;  %593 = vrot.lane.b32.xlu2 %v468_v18, %s1262_s10 }
 0x3bf   : > { %v470_v19 = vpop.f32.mrf.mxu3  ;;  %v588_v20 = vpop.f32.mrf.mxu2 }
 0x3c7   : > { %v590_v2 = vpop.f32.mrf.mxu2 }
 0x412   : > { %v594_v26 = vpop.permute.xlu2 %593 }
 0x413   : > { %v604_v27 = vsel %vm355_vm0, %v1167_v41, %v594_v26  ;;  %v655_v41 = vmul.f32 32.0, %v934_v40 }
 0x415   : > { %v656_v42 = vsub.f32 1.0, %v655_v41 }
 0x417   : > { %v657_v43 = vmul.f32 %v934_v40, %v656_v42 }
 0x419   : > { %v658_v44 = vadd.f32 %v934_v40, %v657_v43 }
 0x41b   : > { %v660_v45 = vsel %vm659_vm6, %v934_v40, %v658_v44 }
 0x43b   : > { %v528_v21 = vpop.f32.mrf.mxu3 }
 0x43c   : > { %597 = vrot.lane.b32.xlu1 %v528_v21, %s1013_s12  ;;  %s951_s12 = sshra.s32 %s712_s25, 4  ;;  %s952_s12 = int_to_ptr.hbm [resolvable:$true] %s951_s12 }
 0x43d   : > { %p958_p0 = scmp.lt.s32.totalorder %s952_s12, %s1261_s8 }
 0x443   : > { %v530_v22 = vpop.f32.mrf.mxu3 }
 0x444   : > { %601 = vrot.lane.b32.xlu1 %v588_v20, %s1014_s13  ;;  %s341_s13 = scalar_lea.vmem %s1255_s2, %s1133_s18 }
 0x445   : > { %v614_v34 = vld [vmem:[%s341_s13] sm:$0xff]  ;;  %s953_s13 = scalar_lea.hbm %s952_s12, 32 }
 0x446   : > { %p954_p11 = scmp.ne.s32.totalorder %s952_s12, %s953_s13  ;;  %p959_p1 = scmp.lt.s32.totalorder %s957_s9, %s953_s13 }
 0x448   : > { %p955_p12 = pnand %p954_p11, %p1100_p5  ;;  %p960_p2 = por %p959_p1, %p958_p0 }
 0x44a   : > { %p956_p13 = pneg %p955_p12 }
 0x44c   : > { %p961_p3 = pnand %p960_p2, %p956_p13 }
 0x4ae   : > { %v598_v25 = vpop.permute.xlu1 %597 }
 0x4af   : > { %v606_v28 = vsel %vm605_vm3, %v604_v27, %v598_v25 }
 0x4b6   : > { %v602_v29 = vpop.permute.xlu1 %601 }
 0x4b7   : > { %v608_v30 = vsel %vm607_vm4, %v606_v28, %v602_v29 }
 0x4b8   : > { %v617_v31 = vpack.c.bf16 %v608_v30, %v608_v30 }
 0x4ba   : > { %850 = vmatmul.msk.bf16.vlgmr.msra.gmra.mxu1 %vm633_vm5, %v617_v31 }
 0x537   : > { %v646_v33 = vpop.f32.mrf.mxu1 }
 0x538   : > { %v647_v35 = vadd.f32 %v914_v32, %v646_v33 }
 0x53a   : > { %v650_v36 = vadd.f32 %v647_v35, %v614_v34 }
 0x53c   : > { %v651_v37 = vsel %vm633_vm5, %v650_v36, 0.0 }
 0x53d   : > { %652 = vadd.xlane.f32.xlu0 %v651_v37 }
 0x53f   : > { %v648_v38 = vpop.f32.mrf.mxu1 }
 0x5b0   : > { %v653_v46 = vpop.xlane.xlu0 %652 }
 0x5b1   : > { %v661_v47 = vmul.f32 %v660_v45, %v653_v46 }
 0x5b3   : > { %v662_v48 = vsub.f32 %v650_v36, %v661_v47 }
 0x5b5   : > { %v663_v49 = vmul.f32 %v662_v48, %v662_v48 }
 0x5b7   : > { %v664_v50 = vsel %vm633_vm5, %v663_v49, 0.0 }
 0x5b8   : > { %665 = vadd.xlane.f32.xlu1 %v664_v50 }
 0x5b9   : > { %964 = shalt.err (!%p961_p3)
}
 0x5ba   : > { %s1016_s17 = smov 128   ;;  %s1269_s23 = smov 8   ;;  %v915_v60 = vld [vmem:[%s1258_s5] ss:$0 sm:$0xff] }
 0x5bb   : > { %859 = dma.vmem_to_hbm [thread:$0]  (%p1100_p5), %s710_s24, 512, %s712_s25, %s694_s26, %s1016_s17, %s1016_s17, %s1269_s23  }
 0x5bc   : > { %v916_v62 = vld [vmem:[%s1259_s6] ss:$0 sm:$0xff]  ;;  %s345_s22 = scalar_lea.vmem %s1260_s7, %s1133_s18 }
 0x62b   : > { %v666_v51 = vpop.xlane.xlu1 %665 }
 0x62c   : > { %v667_v52 = vmul.f32 %v666_v51, %v660_v45 }
 0x62e   : > { %v668_v53 = vadd.f32 1e-05, %v667_v52 }
 0x630   : > { %935 = vrsqrt.f32 %v668_v53  ;;  %vm675_vm8 = vweird.f32 %v668_v53 }
 0x636   : > { %v936_v54 = vpop.eup %935 }
 0x637   : > { %v670_v55 = vmul.f32 %v936_v54, %v668_v53  ;;  %vm676_vm7 = vweird.f32 %v936_v54 }
 0x638   : > { %vm677_vm9 = vmor %vm675_vm8, %vm676_vm7 }
 0x639   : > { %v671_v56 = vmul.f32 %v936_v54, %v670_v55 }
 0x63b   : > { %v672_v57 = vmul.f32 0.5, %v671_v56 }
 0x63d   : > { %v673_v58 = vsub.f32 1.5, %v672_v57 }
 0x63f   : > { %v674_v59 = vmul.f32 %v936_v54, %v673_v58 }
 0x641   : > { %v678_v61 = vsel %vm677_vm9, %v936_v54, %v674_v59 }
 0x642   : > { %v679_v63 = vmul.f32 %v678_v61, %v662_v48 }
 0x644   : > { %v683_v0 = vmul.f32 %v915_v60, %v679_v63 }
 0x646   : > { %v687_v1 = vadd.f32 %v916_v62, %v683_v0 }
 0x648   : > { %688 = vst.msk [vmem:[%s345_s22] sm:$0xff] %vm633_vm5, %v687_v1 }
 0x649 PF: > { %p865_p4 = scmp.ge.s32.totalorder %s999_s30, 2  ;;  %s733_s24 = sand.u32 1, %s987_s27  }
 0x64a   : > { %s734_s25 = scalar_lea.sflag [#allocation3], %s733_s24 }
 0x64b   : > { %p862_p5 = pnand %p865_p4, %p1104_p6 }
 0x64d   : > { %p863_p7 = pneg %p862_p5 }
 0x64f   : > { %982 = dma.done.wait (%p863_p7), %s734_s25, 512  }
 0x650   : > { %984 = vsyncadd (%p863_p7), %s734_s25, 4294966784  ;;  %p19_p8 = scmp.ge.s32.totalorder %s1087_s11, 4   ;;  %s1270_s27 = smov %s991_s28 }
 0x651   : > { %s1271_s28 = smov %s995_s29  ;;  %s1272_s29 = smov %s1098_s14 }
 0x652   : > { %s1273_s30 = smov %s1087_s11  ;;  %21 = sbr.rel (!%p19_p8) target bundleno = 6 (0x6), region = 104 }
 0x657   :  { %740 = vsyncpa [#allocation3], 1 }
 0x658   :  { %742 = vsyncpa [#allocation3 + $0x1], 1 }

// kernel: transformer_forward.31
= control target key start
LH: loop header
LB: loop body
LE: loop exit
PB: predicated region body
PF: predicated region fallthrough
CT: control target
= control target key end

     0   :  { %s916_s27 = smov 0   ;;  %s1007_s0 = inlined_call_operand.vmem [shape: bf16[2,8,32], index: 0, kind: input, shape index: {}]   ;;  %s1008_s1 = inlined_call_operand.vmem [shape: bf16[2,8,64], index: 1, kind: input, shape index: {}]   ;;  %s1009_s2 = inlined_call_operand.vmem [shape: s32[2,8,8], index: 2, kind: input, shape index: {}]   ;;  %s1010_s3 = inlined_call_operand.vmem [shape: f32[2,8,32], index: 3, kind: input, shape index: {}]   ;;  %s1011_s4 = inlined_call_operand.vmem [shape: bf16[32,32], index: 4, kind: input, shape index: {}]   ;;  %s1012_s5 = inlined_call_operand.vmem [shape: f32[1,32], index: 5, kind: input, shape index: {}]   ;;  %s1013_s6 = inlined_call_operand.vmem [shape: f32[1,32], index: 6, kind: input, shape index: {}]   ;;  %s1014_s7 = inlined_call_operand.vmem [shape: f32[1,32], index: 7, kind: input, shape index: {}]   ;;  %s1015_s8 = inlined_call_operand.vmem [shape: f32[2,8,32], index: 8, kind: output, shape index: {}]  }
   0x1 LB: > { %s779_s28 = sadd.s32 4294967295, %s858_s27   ;;  %p783_p0 = scmp.ge.s32.totalorder %s858_s27, 1  ;;  %s858_s27 = sphi %s916_s27, %s18_s27  }
   0x2   : > { %p288_p1 = scmp.lt.s32.totalorder %s858_s27, 3 }
   0x4   : > { %p289_p2 = pnand %p783_p0, %p288_p1 }
   0x5   : > { %p332_p3 = scmp.lt.s32.totalorder (!%p289_p2), %s779_s28, 1  ;;  %s860_s14 = smov (!%p289_p2), 96  }
   0x6   : > { %292 = sbr.rel (%p289_p2) target bundleno = 1478 (0x5c6), region = 52  ;;  %s861_s15 = smov (!%p289_p2), 112  }
   0x7   : > { %s862_s16 = smov (!%p289_p2), 104   ;;  %s863_s21 = smov (!%p289_p2), 120  }
   0x8   : > { %s864_s22 = smov (!%p289_p2), 88   ;;  %s865_s23 = smov (!%p289_p2), 80  }
   0x9   : > { %s866_s24 = smov (!%p289_p2), 72   ;;  %s867_s25 = smov (!%p289_p2), 8  }
   0xa   : > { %s868_s26 = smov (!%p289_p2), 24  }
   0xb   : > { %s1017_s28 = smov (!%p332_p3, %s779_s28), 1  ;;  %vm357_vm0 = vcmask 64512   ;;  %vm399_vm2 = vcmask 1043456   ;;  %vm606_vm3 = vcmask 130048   ;;  %vm608_vm4 = vcmask 195584  }
   0xc   : > { %s784_s29 = sshll.u32 %s1017_s28, 2  ;;  %s937_s17 = sshll.u32 %s1017_s28, 3  ;;  %vm634_vm5 = vcmask 261120  }
   0xd   : > { %s339_s10 = scalar_lea.vmem %s1008_s1, %s784_s29  ;;  %s335_s13 = scalar_lea.vmem %s1007_s0, %s784_s29 }
   0xe   : > { %v353_v0 = vld [vmem:[%s339_s10] sm:$0xf]  ;;  %s343_s20 = scalar_lea.vmem %s1009_s2, %s937_s17  ;;  %s869_s28 = smov 16  }
   0xf   : > { %v362_v1 = vsel %vm357_vm0, %v353_v0, 0  ;;  %v354_v2 = vld [vmem:[%s335_s13] sm:$0xf]  ;;  %v392_v3 = vunpack.c.l.b16 %v353_v0 }
  0x10   : > { %371 = vmatpush.bf16.xpose.msra.mxu0 %v362_v1  ;;  %v417_v5 = vunpack.c.l.b16 %v354_v2  ;;  %v355_v7 = vld [vmem:[%s343_s20] sm:$0xff] }
  0x11   : > { %v932_v4 = vpack.c.b16 %v392_v3, %v392_v3  ;;  %vm356_vm1 = vcmp.ne.s32.totalorder %v355_v7, 0 }
  0x12   : > { %v418_v6 = vpack.c.b16 %v417_v5, %v417_v5 }
  0x13   : > { %394 = vrot.lane.b32.xlu2 %v932_v4, %s860_s14 }
  0x17   : > { %789 = vmatmul.msk.bf16.vlgmr.msra.gmra.mxu0 %vm357_vm0, %v354_v2 }
  0x1b   : > { %479 = vrot.lane.b32.xlu2 %v932_v4, %s861_s15 }
  0x23   : > { %537 = vrot.lane.b32.xlu2 %v932_v4, %s862_s16 }
  0x2b   : > { %477 = vrot.lane.b32.xlu2 %v418_v6, %s861_s15  ;;  %s347_s15 = scalar_lea.vmem %s1010_s3, %s937_s17 }
  0x6d   : > { %v395_v13 = vpop.permute.xlu2 %394 }
  0x6e   : > { %v401_v24 = vsel %vm399_vm2, %v395_v13, 0 }
  0x6f   : > { %410 = vmatpush.bf16.msra.mxu1 %v401_v24 }
  0x75   : > { %v480_v14 = vpop.permute.xlu2 %479 }
  0x76   : > { %v485_v25 = vsel %vm357_vm0, %v480_v14, 0 }
  0x77   : > { %494 = vmatpush.bf16.xpose.msrb.mxu1 %v485_v25  ;;  %v809_v25 = vld [vmem:[%s1011_s4 + $0x8] sm:$0xff] }
  0x7d   : > { %v538_v18 = vpop.permute.xlu2 %537 }
  0x7e   : > { %v543_v19 = vsel %vm357_vm0, %v538_v18, 0 }
  0x7f   : > { %552 = vmatpush.bf16.xpose.msrb.mxu0 %v543_v19 }
  0x85   : > { %v478_v32 = vpop.permute.xlu2 %477 }
  0x94   : > { %v373_v8 = vpop.f32.mrf.mxu0 }
  0x95   : > { %v377_v9 = vmul.f32 0.35355338, %v373_v8 }
  0x97   : > { %v378_v10 = vsel %vm356_vm1, %v377_v9, -1e+10 }
  0x98   : > { %v379_v11 = vsel %vm357_vm0, %v378_v10, -inf }
  0x99   : > { %380 = vmax.xlane.f32.xlu0 %v379_v11 }
  0x9c   : > { %v375_v12 = vpop.f32.mrf.mxu0 }
  0xad   : > { %421 = vrot.lane.b32.xlu0 %v932_v4, %s863_s21 }
  0xb5   : > { %535 = vrot.lane.b32.xlu0 %v418_v6, %s862_s16 }
 0x10c   : > { %v381_v15 = vpop.xlane.xlu0 %380 }
 0x10d   : > { %v382_v16 = vsub.f32 %v378_v10, %v381_v15 }
 0x10f   : > { %v383_v17 = vmul.f32 1.442695, %v382_v16 }
 0x111   : > { %832 = vpow2.f32 %v383_v17 }
 0x117   : > { %v833_v20 = vpop.eup %832 }
 0x118   : > { %v385_v21 = vsel %vm357_vm0, %v833_v20, 0.0 }
 0x119   : > { %386 = vadd.xlane.f32.xlu1 %v385_v21 }
 0x11f   : > { %v422_v22 = vpop.permute.xlu0 %421 }
 0x120   : > { %v427_v26 = vsel %vm357_vm0, %v422_v22, 0 }
 0x121   : > { %436 = vmatpush.bf16.xpose.msra.mxu2 %v427_v26  ;;  %v808_v26 = vld [vmem:[%s1011_s4] sm:$0xff] }
 0x127   : > { %v536_v23 = vpop.permute.xlu0 %535 }
 0x128   : > { %795 = vmatmul.msk.bf16.vlgmr.msrb.gmra.mxu0 %vm357_vm0, %v536_v23 }
 0x132   : > { %419 = vrot.lane.b32.xlu1 %v418_v6, %s863_s21 }
 0x18c   : > { %v387_v27 = vpop.xlane.xlu1 %386 }
 0x18d   : > { %834 = vrcp.f32 %v387_v27 }
 0x193   : > { %v835_v28 = vpop.eup %834 }
 0x194   : > { %v389_v29 = vmul.f32 %v835_v28, %v833_v20 }
 0x196   : > { %v390_v30 = vpack.c.bf16 %v389_v29, %v389_v29 }
 0x198   : > { %790 = vmatmul.msk.bf16.vlgmr.msra.gmra.mxu1 %vm357_vm0, %v390_v30 }
 0x199   : > { %644 = vmatpush.bf16.msra.mxu1 %v809_v25 }
 0x19d   : > { %645 = vmatpush.bf16.msra.mxu1 %v808_v26 }
 0x1a4   : > { %v420_v31 = vpop.permute.xlu1 %419 }
 0x1a5   : > { %791 = vmatmul.msk.bf16.vlgmr.msra.gmra.mxu2 %vm357_vm0, %v420_v31  ;;  %v554_v33 = vpop.f32.mrf.mxu0 }
 0x1a6   : > { %v558_v34 = vmul.f32 0.35355338, %v554_v33 }
 0x1a8   : > { %793 = vmatmul.msk.bf16.vlgmr.msrb.gmra.mxu1 %vm357_vm0, %v478_v32  ;;  %v559_v35 = vsel %vm356_vm1, %v558_v34, -1e+10  ;;  %v829_v34 = vld [vmem:[%s1012_s5] ss:$0 sm:$0xff] }
 0x1a9   : > { %v560_v36 = vsel %vm357_vm0, %v559_v35, -inf }
 0x1aa   : > { %561 = vmax.xlane.f32.xlu0 %v560_v36  ;;  %v615_v36 = vld [vmem:[%s347_s15] sm:$0xff] }
 0x1ad   : > { %v556_v37 = vpop.f32.mrf.mxu0 }
 0x215   : > { %v957_v38 = vpop.f32.mrf.mxu1 }
 0x21d   : > { %v414_v39 = vpop.f32.mrf.mxu1  ;;  %v562_v52 = vpop.xlane.xlu0 %561 }
 0x21e   : > { %v563_v56 = vsub.f32 %v559_v35, %v562_v52 }
 0x220   : > { %v564_v58 = vmul.f32 1.442695, %v563_v56 }
 0x225   : > { %v496_v40 = vpop.f32.mrf.mxu1 }
 0x226   : > { %v500_v41 = vmul.f32 0.35355338, %v496_v40 }
 0x228   : > { %v438_v42 = vpop.f32.mrf.mxu2  ;;  %v501_v43 = vsel %vm356_vm1, %v500_v41, -1e+10  ;;  %v870_v41 = vmov 32.0  }
 0x229   : > { %v442_v44 = vmul.f32 0.35355338, %v438_v42  ;;  %v502_v45 = vsel %vm357_vm0, %v501_v43, -inf }
 0x22a   : > { %503 = vmax.xlane.f32.xlu1 %v502_v45 }
 0x22b   : > { %v443_v46 = vsel %vm356_vm1, %v442_v44, -1e+10 }
 0x22c   : > { %v444_v47 = vsel %vm357_vm0, %v443_v46, -inf }
 0x22d   : > { %v498_v48 = vpop.f32.mrf.mxu1  ;;  %445 = vmax.xlane.f32.xlu2 %v444_v47 }
 0x230   : > { %v440_v49 = vpop.f32.mrf.mxu2 }
 0x243   : > { %456 = vrot.lane.b32.xlu1 %v932_v4, %s864_s22 }
 0x29d   : > { %v504_v50 = vpop.xlane.xlu1 %503 }
 0x29e   : > { %v505_v51 = vsub.f32 %v501_v43, %v504_v50 }
 0x2a0   : > { %v506_v53 = vmul.f32 1.442695, %v505_v51  ;;  %v446_v54 = vpop.xlane.xlu2 %445 }
 0x2a1   : > { %v447_v55 = vsub.f32 %v443_v46, %v446_v54 }
 0x2a2   : > { %836 = vpow2.f32 %v506_v53 }
 0x2a3   : > { %v448_v57 = vmul.f32 1.442695, %v447_v55 }
 0x2a5   : > { %838 = vpow2.f32 %v448_v57 }
 0x2a6   : > { %840 = vpow2.f32 %v564_v58 }
 0x2a8   : > { %v837_v59 = vpop.eup %836 }
 0x2a9   : > { %v508_v60 = vsel %vm357_vm0, %v837_v59, 0.0 }
 0x2aa   : > { %509 = vadd.xlane.f32.xlu0 %v508_v60 }
 0x2ab   : > { %v839_v61 = vpop.eup %838 }
 0x2ac   : > { %v450_v62 = vsel %vm357_vm0, %v839_v61, 0.0  ;;  %v841_v63 = vpop.eup %840 }
 0x2ad   : > { %451 = vadd.xlane.f32.xlu2 %v450_v62  ;;  %v566_v0 = vsel %vm357_vm0, %v841_v63, 0.0  ;;  %v830_v62 = vld [vmem:[%s1013_s6] ss:$0 sm:$0xff] }
 0x2b5   : > { %567 = vadd.xlane.f32.xlu2 %v566_v0  ;;  %v457_v1 = vpop.permute.xlu1 %456  ;;  %v831_v0 = vld [vmem:[%s1014_s7] ss:$0 sm:$0xff] }
 0x2b6   : > { %v462_v2 = vsel %vm399_vm2, %v457_v1, 0 }
 0x2b7   : > { %471 = vmatpush.bf16.msra.mxu3 %v462_v2 }
 0x2be   : > { %514 = vrot.lane.b32.xlu0 %v932_v4, %s865_s23  ;;  %s351_s23 = scalar_lea.vmem %s1015_s8, %s937_s17 }
 0x2cd   : > { %572 = vrot.lane.b32.xlu2 %v932_v4, %s866_s24 }
 0x31d   : > { %v510_v6 = vpop.xlane.xlu0 %509 }
 0x320   : > { %v452_v3 = vpop.xlane.xlu2 %451 }
 0x321   : > { %842 = vrcp.f32 %v452_v3 }
 0x327   : > { %v843_v5 = vpop.eup %842 }
 0x328   : > { %v568_v7 = vpop.xlane.xlu2 %567  ;;  %v454_v8 = vmul.f32 %v843_v5, %v839_v61 }
 0x329   : > { %844 = vrcp.f32 %v568_v7 }
 0x32a   : > { %v455_v9 = vpack.c.bf16 %v454_v8, %v454_v8  ;;  %846 = vrcp.f32 %v510_v6 }
 0x32b   : > { %848 = vrcp.f32 %v870_v41 }
 0x32c   : > { %792 = vmatmul.msk.bf16.vlgmr.msra.gmra.mxu3 %vm357_vm0, %v455_v9 }
 0x32f   : > { %v845_v10 = vpop.eup %844 }
 0x330   : > { %v570_v11 = vmul.f32 %v845_v10, %v841_v63  ;;  %v573_v12 = vpop.permute.xlu2 %572  ;;  %v515_v13 = vpop.permute.xlu0 %514 }
 0x331   : > { %v520_v4 = vsel %vm399_vm2, %v515_v13, 0  ;;  %v578_v14 = vsel %vm399_vm2, %v573_v12, 0  ;;  %v847_v16 = vpop.eup %846 }
 0x332   : > { %529 = vmatpush.bf16.msrb.mxu3 %v520_v4  ;;  %587 = vmatpush.bf16.msrb.mxu2 %v578_v14  ;;  %v571_v15 = vpack.c.bf16 %v570_v11, %v570_v11  ;;  %v512_v17 = vmul.f32 %v847_v16, %v837_v59  ;;  %v849_v42 = vpop.eup %848 }
 0x333   : > { %v656_v43 = vmul.f32 32.0, %v849_v42  ;;  %vm660_vm6 = vweird.f32 %v849_v42 }
 0x334   : > { %v513_v18 = vpack.c.bf16 %v512_v17, %v512_v17 }
 0x335   : > { %796 = vmatmul.msk.bf16.vlgmr.msrb.gmra.mxu2 %vm357_vm0, %v571_v15  ;;  %v657_v44 = vsub.f32 1.0, %v656_v43 }
 0x337   : > { %v658_v45 = vmul.f32 %v849_v42, %v657_v44 }
 0x339   : > { %v659_v46 = vadd.f32 %v849_v42, %v658_v45 }
 0x33b   : > { %v661_v47 = vsel %vm660_vm6, %v849_v42, %v659_v46 }
 0x33c   : > { %794 = vmatmul.msk.bf16.vlgmr.msrb.gmra.mxu3 %vm357_vm0, %v513_v18 }
 0x3af   : > { %v473_v19 = vpop.f32.mrf.mxu3 }
 0x3b0   : > { %594 = vrot.lane.b32.xlu1 %v473_v19, %s867_s25 }
 0x3b7   : > { %v475_v20 = vpop.f32.mrf.mxu3 }
 0x3b8   : > { %v589_v21 = vpop.f32.mrf.mxu2 }
 0x3b9   : > { %602 = vrot.lane.b32.xlu1 %v589_v21, %s868_s26 }
 0x3bf   : > { %v531_v22 = vpop.f32.mrf.mxu3 }
 0x3c0   : > { %v591_v23 = vpop.f32.mrf.mxu2  ;;  %598 = vrot.lane.b32.xlu0 %v531_v22, %s869_s28 }
 0x3c7   : > { %v533_v24 = vpop.f32.mrf.mxu3 }
 0x422   : > { %v595_v27 = vpop.permute.xlu1 %594 }
 0x423   : > { %v605_v28 = vsel %vm357_vm0, %v957_v38, %v595_v27 }
 0x42b   : > { %v603_v30 = vpop.permute.xlu1 %602 }
 0x432   : > { %v599_v29 = vpop.permute.xlu0 %598 }
 0x433   : > { %v607_v31 = vsel %vm606_vm3, %v605_v28, %v599_v29 }
 0x434   : > { %v609_v32 = vsel %vm608_vm4, %v607_v31, %v603_v30 }
 0x435   : > { %v618_v33 = vpack.c.bf16 %v609_v32, %v609_v32 }
 0x437   : > { %805 = vmatmul.msk.bf16.vlgmr.msra.gmra.mxu1 %vm634_vm5, %v618_v33 }
 0x4b4   : > { %v647_v35 = vpop.f32.mrf.mxu1 }
 0x4b5   : > { %v648_v37 = vadd.f32 %v829_v34, %v647_v35 }
 0x4b7   : > { %v651_v38 = vadd.f32 %v648_v37, %v615_v36 }
 0x4b9   : > { %v652_v39 = vsel %vm634_vm5, %v651_v38, 0.0 }
 0x4ba   : > { %653 = vadd.xlane.f32.xlu2 %v652_v39 }
 0x4bc   : > { %v649_v40 = vpop.f32.mrf.mxu1 }
 0x52d   : > { %v654_v48 = vpop.xlane.xlu2 %653 }
 0x52e   : > { %v662_v49 = vmul.f32 %v661_v47, %v654_v48 }
 0x530   : > { %v663_v50 = vsub.f32 %v651_v38, %v662_v49 }
 0x532   : > { %v664_v51 = vmul.f32 %v663_v50, %v663_v50 }
 0x534   : > { %v665_v52 = vsel %vm634_vm5, %v664_v51, 0.0 }
 0x535   : > { %666 = vadd.xlane.f32.xlu0 %v665_v52 }
 0x5a8   : > { %v667_v53 = vpop.xlane.xlu0 %666 }
 0x5a9   : > { %v668_v54 = vmul.f32 %v667_v53, %v661_v47 }
 0x5ab   : > { %v669_v55 = vadd.f32 1e-05, %v668_v54 }
 0x5ad   : > { %850 = vrsqrt.f32 %v669_v55  ;;  %vm676_vm8 = vweird.f32 %v669_v55 }
 0x5b3   : > { %v851_v56 = vpop.eup %850 }
 0x5b4   : > { %v671_v57 = vmul.f32 %v851_v56, %v669_v55  ;;  %vm677_vm7 = vweird.f32 %v851_v56 }
 0x5b5   : > { %vm678_vm9 = vmor %vm676_vm8, %vm677_vm7 }
 0x5b6   : > { %v672_v58 = vmul.f32 %v851_v56, %v671_v57 }
 0x5b8   : > { %v673_v59 = vmul.f32 0.5, %v672_v58 }
 0x5ba   : > { %v674_v60 = vsub.f32 1.5, %v673_v59 }
 0x5bc   : > { %v675_v61 = vmul.f32 %v851_v56, %v674_v60 }
 0x5be   : > { %v679_v63 = vsel %vm678_vm9, %v851_v56, %v675_v61 }
 0x5bf   : > { %v680_v1 = vmul.f32 %v679_v63, %v663_v50 }
 0x5c1   : > { %v684_v2 = vmul.f32 %v830_v62, %v680_v1 }
 0x5c3   : > { %v688_v3 = vadd.f32 %v831_v0, %v684_v2 }
 0x5c5   : > { %689 = vst.msk [vmem:[%s351_s23] sm:$0xff] %vm634_vm5, %v688_v3 }
 0x5c6 PF: > { %s18_s27 = sadd.s32 1, %s858_s27  }
 0x5c7   : > { %p15_p4 = scmp.ge.s32.totalorder %s18_s27, 4  }
 0x5c9   :  { %17 = sbr.rel (!%p15_p4) target bundleno = 1 (0x1), region = 91 }

// kernel: transformer_forward.37
= control target key start
LH: loop header
LB: loop body
LE: loop exit
PB: predicated region body
PF: predicated region fallthrough
CT: control target
= control target key end

     0   :  { %s1304_s0 = inlined_call_operand.vmem [shape: bf16[2,8,32], index: 0, kind: input, shape index: {}]   ;;  %s1305_s1 = inlined_call_operand.vmem [shape: bf16[2,8,64], index: 1, kind: input, shape index: {}]   ;;  %s1306_s2 = inlined_call_operand.vmem [shape: s32[2,8,8], index: 2, kind: input, shape index: {}]   ;;  %s1307_s3 = inlined_call_operand.vmem [shape: f32[2,8,32], index: 3, kind: input, shape index: {}]   ;;  %s1308_s4 = inlined_call_operand.vmem [shape: bf16[32,32], index: 4, kind: input, shape index: {}]   ;;  %s1309_s5 = inlined_call_operand.vmem [shape: f32[1,32], index: 5, kind: input, shape index: {}]   ;;  %s1310_s6 = inlined_call_operand.vmem [shape: f32[1,32], index: 6, kind: input, shape index: {}]   ;;  %s1311_s7 = inlined_call_operand.vmem [shape: f32[1,32], index: 7, kind: input, shape index: {}]   ;;  %s1312_s8 = inlined_call_operand.vmem [shape: f32[2,8,32], index: 8, kind: output, shape index: {0}]   ;;  %s1313_s9 = inlined_call_operand.hbm [shape: f32[2,4,8,8], index: 9, kind: output, shape index: {1}]  }
   0x1   :  { %1315 = sst [smem:[#allocation5_spill]] %s1304_s0 }
   0x2   :  { %1316 = sst [smem:[#allocation6_spill]] %s1305_s1 }
   0x3   :  { %1317 = sst [smem:[#allocation7_spill]] %s1306_s2 }
   0x4   :  { %15 = vsyncpa [#allocation3], 0 }
   0x5   :  { %17 = vsyncpa [#allocation3 + $0x1], 0  ;;  %s1118_s30 = smov 0   ;;  %s1120_s10 = smov 0  }
   0x6   :  { %s1122_s11 = smov 0   ;;  %s1124_s12 = smov 0  }
   0x7 LB: > { %s1139_s13 = sadd.s32 4294967295, %s1054_s12   ;;  %s880_s14 = sadd.s32 4294967294, %s1054_s12   ;;  %s1054_s12 = sphi %s1124_s12, %s1327_s12   ;;  %s1050_s11 = sphi %s1122_s11, %s1326_s11   ;;  %s1046_s10 = sphi %s1120_s10, %s1325_s10   ;;  %s1042_s30 = sphi %s1118_s30, %s1324_s30  }
   0x8   : > { %s1143_s15 = sadd.s32 1, %s1054_s12   ;;  %s244_s16 = sadd.s32 1, %s1050_s11 }
   0x9   : > { %s241_s17 = ssub.s32 %s1054_s12, %s1143_s15  ;;  %p254_p0 = scmp.ne.s32.totalorder %s1050_s11, %s1046_s10 }
   0xa   : > { %p242_p1 = scmp.eq.s32.totalorder %s241_s17, 0  ;;  %p255_p2 = scmp.eq.s32.totalorder %s1139_s13, 1 }
   0xb   : > { %p260_p3 = scmp.ne.s32.totalorder %s1046_s10, %s1042_s30  ;;  %p261_p4 = scmp.eq.s32.totalorder %s880_s14, 1 }
   0xc   : > { %s1154_s18 = scalar_select %p242_p1, %s1050_s11, %s244_s16  }
   0xd   : > { %p1156_p5 = por %p255_p2, %p254_p0  ;;  %p1160_p6 = por %p261_p4, %p260_p3 }
   0xe   : > { %p883_p7 = scmp.ge.s32.totalorder %s1054_s12, 1  ;;  %p319_p8 = scmp.lt.s32.totalorder %s1054_s12, 3 }
  0x10   : > { %p320_p9 = pnand %p883_p7, %p319_p8 }
  0x11   : > { %p370_p10 = scmp.lt.s32.totalorder (!%p320_p9), %s1139_s13, 1  ;;  %s1320_s1 = sld [smem:[#allocation6_spill]] (!%p320_p9) }
  0x12   : > { %323 = sbr.rel (%p320_p9) target bundleno = 1491 (0x5d3), region = 52  ;;  %s1321_s0 = sld [smem:[#allocation5_spill]] (!%p320_p9) }
  0x13   : > { %s1056_s29 = smov (!%p320_p9), 96   ;;  %s1057_s14 = smov (!%p320_p9), 112  }
  0x14   : > { %s1058_s16 = smov (!%p320_p9), 104   ;;  %s1322_s2 = sld [smem:[#allocation7_spill]] (!%p320_p9) }
  0x15   : > { %s1065_s23 = smov (!%p320_p9), 16  }
  0x17   : > { %s371_s21 = scalar_select %p370_p10, %s1139_s13, 1  ;;  %vm395_vm0 = vcmask 64512   ;;  %vm438_vm2 = vcmask 1043456   ;;  %vm651_vm3 = vcmask 130048   ;;  %vm653_vm4 = vcmask 195584  }
  0x18   : > { %vm679_vm5 = vcmask 261120  }
  0x19   : > { %s885_s22 = sshll.u32 %s371_s21, 2  ;;  %s1181_s17 = sshll.u32 %s371_s21, 3 }
  0x1a   : > { %s377_s25 = scalar_lea.vmem %s1320_s1, %s885_s22  ;;  %s373_s28 = scalar_lea.vmem %s1321_s0, %s885_s22 }
  0x1b   : > { %v391_v0 = vld [vmem:[%s377_s25] sm:$0xf]  ;;  %s381_s24 = scalar_lea.vmem %s1322_s2, %s1181_s17  ;;  %s1059_s21 = smov 120  }
  0x1c   : > { %v400_v1 = vsel %vm395_vm0, %v391_v0, 0  ;;  %v392_v2 = vld [vmem:[%s373_s28] sm:$0xf]  ;;  %v431_v3 = vunpack.c.l.b16 %v391_v0  ;;  %s367_s25 = sand.u32 1, %s1046_s10   ;;  %s1060_s28 = smov 88  }
  0x1d   : > { %409 = vmatpush.bf16.xpose.msra.mxu0 %v400_v1  ;;  %v456_v5 = vunpack.c.l.b16 %v392_v2  ;;  %v1187_v7 = vld [vmem:[%s381_s24] sm:$0xff]  ;;  %s884_s26 = sshll.u32 %s367_s25, 5  ;;  %s1064_s22 = smov 24  }
  0x1e   : > { %v1176_v4 = vpack.c.b16 %v431_v3, %v431_v3  ;;  %vm394_vm1 = vcmp.ne.s32.totalorder %v1187_v7, 0  ;;  %s1203_s27 = scalar_lea.vmem [#allocation2], %s884_s26  ;;  %s385_s24 = scalar_lea.vmem %s1307_s3, %s1181_s17 }
  0x1f   : > { %v457_v6 = vpack.c.b16 %v456_v5, %v456_v5 }
  0x20   : > { %433 = vrot.lane.b32.xlu2 %v1176_v4, %s1056_s29  ;;  %s1061_s29 = smov 80  }
  0x24   : > { %890 = vmatmul.msk.bf16.vlgmr.msra.gmra.mxu0 %vm395_vm0, %v392_v2 }
  0x28   : > { %520 = vrot.lane.b32.xlu2 %v1176_v4, %s1057_s14 }
  0x30   : > { %580 = vrot.lane.b32.xlu2 %v1176_v4, %s1058_s16 }
  0x38   : > { %518 = vrot.lane.b32.xlu2 %v457_v6, %s1057_s14  ;;  %s1062_s14 = smov 72  }
  0x7a   : > { %v434_v13 = vpop.permute.xlu2 %433 }
  0x7b   : > { %v440_v24 = vsel %vm438_vm2, %v434_v13, 0 }
  0x7c   : > { %449 = vmatpush.bf16.msra.mxu1 %v440_v24 }
  0x82   : > { %v521_v14 = vpop.permute.xlu2 %520 }
  0x83   : > { %v526_v25 = vsel %vm395_vm0, %v521_v14, 0 }
  0x84   : > { %535 = vmatpush.bf16.xpose.msrb.mxu1 %v526_v25  ;;  %v916_v25 = vld [vmem:[%s1308_s4 + $0x8] sm:$0xff] }
  0x8a   : > { %v581_v18 = vpop.permute.xlu2 %580 }
  0x8b   : > { %v586_v19 = vsel %vm395_vm0, %v581_v18, 0 }
  0x8c   : > { %595 = vmatpush.bf16.xpose.msrb.mxu0 %v586_v19 }
  0x92   : > { %v519_v32 = vpop.permute.xlu2 %518 }
  0xa1   : > { %v411_v8 = vpop.f32.mrf.mxu0 }
  0xa2   : > { %v415_v9 = vmul.f32 0.35355338, %v411_v8 }
  0xa4   : > { %v416_v10 = vsel %vm394_vm1, %v415_v9, -1e+10 }
  0xa5   : > { %v417_v11 = vsel %vm395_vm0, %v416_v10, -inf }
  0xa6   : > { %418 = vmax.xlane.f32.xlu0 %v417_v11 }
  0xa9   : > { %v413_v12 = vpop.f32.mrf.mxu0 }
  0xba   : > { %460 = vrot.lane.b32.xlu0 %v1176_v4, %s1059_s21 }
  0xc2   : > { %578 = vrot.lane.b32.xlu0 %v457_v6, %s1058_s16  ;;  %s1314_s16 = smov 8  }
 0x119   : > { %v419_v15 = vpop.xlane.xlu0 %418 }
 0x11a   : > { %v420_v16 = vsub.f32 %v416_v10, %v419_v15 }
 0x11c   : > { %v421_v17 = vmul.f32 1.442695, %v420_v16 }
 0x11e   : > { %972 = vpow2.f32 %v421_v17 }
 0x124   : > { %v973_v20 = vpop.eup %972 }
 0x125   : > { %v423_v21 = vsel %vm395_vm0, %v973_v20, 0.0 }
 0x126   : > { %424 = vadd.xlane.f32.xlu1 %v423_v21 }
 0x12c   : > { %v461_v22 = vpop.permute.xlu0 %460 }
 0x12d   : > { %v466_v26 = vsel %vm395_vm0, %v461_v22, 0 }
 0x12e   : > { %475 = vmatpush.bf16.xpose.msra.mxu2 %v466_v26  ;;  %v915_v26 = vld [vmem:[%s1308_s4] sm:$0xff] }
 0x134   : > { %v579_v23 = vpop.permute.xlu0 %578 }
 0x135   : > { %898 = vmatmul.msk.bf16.vlgmr.msrb.gmra.mxu0 %vm395_vm0, %v579_v23 }
 0x13f   : > { %458 = vrot.lane.b32.xlu1 %v457_v6, %s1059_s21  ;;  %s917_s21 = sshll.u32 %s1139_s13, 5  ;;  %s1012_s13 = scalar_lea.hbm %s1313_s9, 64 }
 0x199   : > { %v425_v27 = vpop.xlane.xlu1 %424 }
 0x19a   : > { %974 = vrcp.f32 %v425_v27 }
 0x1a0   : > { %v975_v28 = vpop.eup %974 }
 0x1a1   : > { %v427_v29 = vmul.f32 %v975_v28, %v973_v20 }
 0x1a3   : > { %428 = vst.msk [vmem:[%s1203_s27] sm:$0xff] %vm395_vm0, %v427_v29  ;;  %v429_v30 = vpack.c.bf16 %v427_v29, %v427_v29 }
 0x1a5   : > { %891 = vmatmul.msk.bf16.vlgmr.msra.gmra.mxu1 %vm395_vm0, %v429_v30 }
 0x1a6   : > { %689 = vmatpush.bf16.msra.mxu1 %v916_v25 }
 0x1aa   : > { %690 = vmatpush.bf16.msra.mxu1 %v915_v26 }
 0x1b1   : > { %v459_v31 = vpop.permute.xlu1 %458 }
 0x1b2   : > { %892 = vmatmul.msk.bf16.vlgmr.msra.gmra.mxu2 %vm395_vm0, %v459_v31  ;;  %v597_v33 = vpop.f32.mrf.mxu0 }
 0x1b3   : > { %v601_v34 = vmul.f32 0.35355338, %v597_v33 }
 0x1b5   : > { %895 = vmatmul.msk.bf16.vlgmr.msrb.gmra.mxu1 %vm395_vm0, %v519_v32  ;;  %v602_v35 = vsel %vm394_vm1, %v601_v34, -1e+10  ;;  %v969_v34 = vld [vmem:[%s1309_s5] ss:$0 sm:$0xff] }
 0x1b6   : > { %v603_v36 = vsel %vm395_vm0, %v602_v35, -inf }
 0x1b7   : > { %604 = vmax.xlane.f32.xlu0 %v603_v36  ;;  %v660_v36 = vld [vmem:[%s385_s24] sm:$0xff] }
 0x1ba   : > { %v599_v37 = vpop.f32.mrf.mxu0 }
 0x222   : > { %v1213_v38 = vpop.f32.mrf.mxu1 }
 0x22a   : > { %v453_v39 = vpop.f32.mrf.mxu1  ;;  %v605_v52 = vpop.xlane.xlu0 %604 }
 0x22b   : > { %v606_v56 = vsub.f32 %v602_v35, %v605_v52 }
 0x22d   : > { %v607_v58 = vmul.f32 1.442695, %v606_v56 }
 0x232   : > { %v537_v40 = vpop.f32.mrf.mxu1 }
 0x233   : > { %v541_v41 = vmul.f32 0.35355338, %v537_v40 }
 0x235   : > { %v477_v42 = vpop.f32.mrf.mxu2  ;;  %v542_v43 = vsel %vm394_vm1, %v541_v41, -1e+10  ;;  %v1066_v41 = vmov 32.0  }
 0x236   : > { %v481_v44 = vmul.f32 0.35355338, %v477_v42  ;;  %v543_v45 = vsel %vm395_vm0, %v542_v43, -inf }
 0x237   : > { %544 = vmax.xlane.f32.xlu1 %v543_v45 }
 0x238   : > { %v482_v46 = vsel %vm394_vm1, %v481_v44, -1e+10 }
 0x239   : > { %v483_v47 = vsel %vm395_vm0, %v482_v46, -inf }
 0x23a   : > { %v539_v48 = vpop.f32.mrf.mxu1  ;;  %484 = vmax.xlane.f32.xlu2 %v483_v47 }
 0x23d   : > { %v479_v49 = vpop.f32.mrf.mxu2 }
 0x250   : > { %497 = vrot.lane.b32.xlu1 %v1176_v4, %s1060_s28 }
 0x2aa   : > { %v545_v50 = vpop.xlane.xlu1 %544 }
 0x2ab   : > { %v546_v51 = vsub.f32 %v542_v43, %v545_v50 }
 0x2ad   : > { %v547_v53 = vmul.f32 1.442695, %v546_v51  ;;  %v485_v54 = vpop.xlane.xlu2 %484 }
 0x2ae   : > { %v486_v55 = vsub.f32 %v482_v46, %v485_v54 }
 0x2af   : > { %976 = vpow2.f32 %v547_v53 }
 0x2b0   : > { %v487_v57 = vmul.f32 1.442695, %v486_v55 }
 0x2b2   : > { %978 = vpow2.f32 %v487_v57 }
 0x2b3   : > { %980 = vpow2.f32 %v607_v58 }
 0x2b5   : > { %v977_v59 = vpop.eup %976 }
 0x2b6   : > { %v549_v60 = vsel %vm395_vm0, %v977_v59, 0.0 }
 0x2b7   : > { %550 = vadd.xlane.f32.xlu0 %v549_v60 }
 0x2b8   : > { %v979_v61 = vpop.eup %978 }
 0x2b9   : > { %v489_v62 = vsel %vm395_vm0, %v979_v61, 0.0  ;;  %v981_v63 = vpop.eup %980 }
 0x2ba   : > { %490 = vadd.xlane.f32.xlu2 %v489_v62  ;;  %v609_v0 = vsel %vm395_vm0, %v981_v63, 0.0 }
 0x2c2   : > { %610 = vadd.xlane.f32.xlu2 %v609_v0  ;;  %v498_v1 = vpop.permute.xlu1 %497 }
 0x2c3   : > { %v503_v2 = vsel %vm438_vm2, %v498_v1, 0 }
 0x2c4   : > { %512 = vmatpush.bf16.msra.mxu3 %v503_v2 }
 0x2cb   : > { %557 = vrot.lane.b32.xlu0 %v1176_v4, %s1061_s29  ;;  %s754_s29 = scalar_lea.hbm %s1313_s9, %s917_s21 }
 0x2da   : > { %617 = vrot.lane.b32.xlu2 %v1176_v4, %s1062_s14  ;;  %s755_s14 = sshll.u32 %s1203_s27, 4  ;;  %s756_s14 = int_to_ptr.vmem [resolvable:$true] %s755_s14 }
 0x32a   : > { %v551_v3 = vpop.xlane.xlu0 %550 }
 0x32b   : > { %982 = vrcp.f32 %v551_v3 }
 0x32d   : > { %v491_v5 = vpop.xlane.xlu2 %490 }
 0x32e   : > { %984 = vrcp.f32 %v491_v5 }
 0x331   : > { %v983_v6 = vpop.eup %982 }
 0x332   : > { %v553_v7 = vmul.f32 %v983_v6, %v977_v59 }
 0x334   : > { %v985_v8 = vpop.eup %984  ;;  %896 = vst.msk [vmem:[%s1203_s27 + $0x10] sm:$0xff] %vm395_vm0, %v553_v7  ;;  %v556_v18 = vpack.c.bf16 %v553_v7, %v553_v7 }
 0x335   : > { %v611_v9 = vpop.xlane.xlu2 %610  ;;  %v493_v10 = vmul.f32 %v985_v8, %v979_v61 }
 0x336   : > { %986 = vrcp.f32 %v611_v9 }
 0x337   : > { %893 = vst.msk [vmem:[%s1203_s27 + $0x8] sm:$0xff] %vm395_vm0, %v493_v10  ;;  %v496_v4 = vpack.c.bf16 %v493_v10, %v493_v10  ;;  %988 = vrcp.f32 %v1066_v41 }
 0x339   : > { %894 = vmatmul.msk.bf16.vlgmr.msra.gmra.mxu3 %vm395_vm0, %v496_v4 }
 0x33c   : > { %v987_v11 = vpop.eup %986 }
 0x33d   : > { %v613_v12 = vmul.f32 %v987_v11, %v981_v63  ;;  %v618_v13 = vpop.permute.xlu2 %617  ;;  %v558_v14 = vpop.permute.xlu0 %557 }
 0x33e   : > { %v563_v15 = vsel %vm438_vm2, %v558_v14, 0  ;;  %v623_v16 = vsel %vm438_vm2, %v618_v13, 0  ;;  %v989_v42 = vpop.eup %988 }
 0x33f   : > { %899 = vst.msk [vmem:[%s1203_s27 + $0x18] sm:$0xff] %vm395_vm0, %v613_v12  ;;  %572 = vmatpush.bf16.msrb.mxu3 %v563_v15  ;;  %632 = vmatpush.bf16.msrb.mxu2 %v623_v16  ;;  %v616_v17 = vpack.c.bf16 %v613_v12, %v613_v12  ;;  %v701_v43 = vmul.f32 32.0, %v989_v42  ;;  %vm705_vm6 = vweird.f32 %v989_v42 }
 0x341   : > { %v702_v44 = vsub.f32 1.0, %v701_v43 }
 0x342   : > { %900 = vmatmul.msk.bf16.vlgmr.msrb.gmra.mxu2 %vm395_vm0, %v616_v17 }
 0x343   : > { %v703_v45 = vmul.f32 %v989_v42, %v702_v44 }
 0x345   : > { %v704_v46 = vadd.f32 %v989_v42, %v703_v45 }
 0x347   : > { %v706_v47 = vsel %vm705_vm6, %v989_v42, %v704_v46 }
 0x349   : > { %897 = vmatmul.msk.bf16.vlgmr.msrb.gmra.mxu3 %vm395_vm0, %v556_v18 }
 0x3bc   : > { %v514_v19 = vpop.f32.mrf.mxu3 }
 0x3bd   : > { %639 = vrot.lane.b32.xlu1 %v514_v19, %s1314_s16 }
 0x3c4   : > { %v516_v20 = vpop.f32.mrf.mxu3 }
 0x3c5   : > { %v634_v21 = vpop.f32.mrf.mxu2 }
 0x3c6   : > { %647 = vrot.lane.b32.xlu1 %v634_v21, %s1064_s22  ;;  %s757_s22 = sshll.u32 %s754_s29, 4  ;;  %s758_s22 = int_to_ptr.hbm [resolvable:$true] %s757_s22 }
 0x3c7   : > { %s1006_s24 = sshra.s32 %s758_s22, 4  ;;  %s1007_s24 = int_to_ptr.hbm [resolvable:$true] %s1006_s24 }
 0x3c8   : > { %s1008_s16 = scalar_lea.hbm %s1007_s24, 32  ;;  %p1013_p0 = scmp.lt.s32.totalorder %s1007_s24, %s1313_s9 }
 0x3c9   : > { %p1009_p11 = scmp.ne.s32.totalorder %s1007_s24, %s1008_s16  ;;  %p1014_p1 = scmp.lt.s32.totalorder %s1012_s13, %s1008_s16 }
 0x3cb   : > { %p1010_p12 = pnand %p1009_p11, %p1156_p5  ;;  %p1015_p2 = por %p1014_p1, %p1013_p0 }
 0x3cc   : > { %v574_v22 = vpop.f32.mrf.mxu3 }
 0x3cd   : > { %v636_v23 = vpop.f32.mrf.mxu2  ;;  %643 = vrot.lane.b32.xlu0 %v574_v22, %s1065_s23  ;;  %s740_s23 = scalar_lea.sflag [#allocation3], %s367_s25  ;;  %p1011_p13 = pneg %p1010_p12 }
 0x3cf   : > { %p1016_p3 = pnand %p1015_p2, %p1011_p13 }
 0x3d4   : > { %v576_v24 = vpop.f32.mrf.mxu3 }
 0x42f   : > { %v640_v27 = vpop.permute.xlu1 %639 }
 0x430   : > { %v650_v28 = vsel %vm395_vm0, %v1213_v38, %v640_v27 }
 0x438   : > { %v648_v30 = vpop.permute.xlu1 %647 }
 0x43f   : > { %v644_v29 = vpop.permute.xlu0 %643 }
 0x440   : > { %v652_v31 = vsel %vm651_vm3, %v650_v28, %v644_v29 }
 0x441   : > { %v654_v32 = vsel %vm653_vm4, %v652_v31, %v648_v30 }
 0x442   : > { %v663_v33 = vpack.c.bf16 %v654_v32, %v654_v32 }
 0x444   : > { %909 = vmatmul.msk.bf16.vlgmr.msra.gmra.mxu1 %vm679_vm5, %v663_v33 }
 0x4c1   : > { %v692_v35 = vpop.f32.mrf.mxu1 }
 0x4c2   : > { %v693_v37 = vadd.f32 %v969_v34, %v692_v35 }
 0x4c4   : > { %v696_v38 = vadd.f32 %v693_v37, %v660_v36 }
 0x4c6   : > { %v697_v39 = vsel %vm679_vm5, %v696_v38, 0.0 }
 0x4c7   : > { %698 = vadd.xlane.f32.xlu2 %v697_v39 }
 0x4c9   : > { %v694_v40 = vpop.f32.mrf.mxu1 }
 0x53a   : > { %v699_v48 = vpop.xlane.xlu2 %698 }
 0x53b   : > { %v707_v49 = vmul.f32 %v706_v47, %v699_v48 }
 0x53d   : > { %v708_v50 = vsub.f32 %v696_v38, %v707_v49 }
 0x53f   : > { %v709_v51 = vmul.f32 %v708_v50, %v708_v50 }
 0x541   : > { %v710_v52 = vsel %vm679_vm5, %v709_v51, 0.0 }
 0x542   : > { %711 = vadd.xlane.f32.xlu0 %v710_v52 }
 0x543   : > { %1019 = shalt.err (!%p1016_p3)
}
 0x544   : > { %s1067_s25 = smov 128   ;;  %s1323_s27 = smov 8   ;;  %v970_v62 = vld [vmem:[%s1310_s6] ss:$0 sm:$0xff] }
 0x545   : > { %918 = dma.vmem_to_hbm [thread:$0]  (%p1156_p5), %s756_s14, 512, %s758_s22, %s740_s23, %s1067_s25, %s1067_s25, %s1323_s27  }
 0x546   : > { %v971_v0 = vld [vmem:[%s1311_s7] ss:$0 sm:$0xff]  ;;  %s389_s28 = scalar_lea.vmem %s1312_s8, %s1181_s17 }
 0x5b5   : > { %v712_v53 = vpop.xlane.xlu0 %711 }
 0x5b6   : > { %v713_v54 = vmul.f32 %v712_v53, %v706_v47 }
 0x5b8   : > { %v714_v55 = vadd.f32 1e-05, %v713_v54 }
 0x5ba   : > { %990 = vrsqrt.f32 %v714_v55  ;;  %vm721_vm8 = vweird.f32 %v714_v55 }
 0x5c0   : > { %v991_v56 = vpop.eup %990 }
 0x5c1   : > { %v716_v57 = vmul.f32 %v991_v56, %v714_v55  ;;  %vm722_vm7 = vweird.f32 %v991_v56 }
 0x5c2   : > { %vm723_vm9 = vmor %vm721_vm8, %vm722_vm7 }
 0x5c3   : > { %v717_v58 = vmul.f32 %v991_v56, %v716_v57 }
 0x5c5   : > { %v718_v59 = vmul.f32 0.5, %v717_v58 }
 0x5c7   : > { %v719_v60 = vsub.f32 1.5, %v718_v59 }
 0x5c9   : > { %v720_v61 = vmul.f32 %v991_v56, %v719_v60 }
 0x5cb   : > { %v724_v63 = vsel %vm723_vm9, %v991_v56, %v720_v61 }
 0x5cc   : > { %v725_v1 = vmul.f32 %v724_v63, %v708_v50 }
 0x5ce   : > { %v729_v2 = vmul.f32 %v970_v62, %v725_v1 }
 0x5d0   : > { %v733_v3 = vadd.f32 %v971_v0, %v729_v2 }
 0x5d2   : > { %734 = vst.msk [vmem:[%s389_s28] sm:$0xff] %vm679_vm5, %v733_v3 }
 0x5d3 PF: > { %p924_p4 = scmp.ge.s32.totalorder %s1054_s12, 2  ;;  %s779_s29 = sand.u32 1, %s1042_s30  }
 0x5d4   : > { %s780_s14 = scalar_lea.sflag [#allocation3], %s779_s29 }
 0x5d5   : > { %p921_p5 = pnand %p924_p4, %p1160_p6 }
 0x5d7   : > { %p922_p7 = pneg %p921_p5 }
 0x5d9   : > { %1037 = dma.done.wait (%p922_p7), %s780_s14, 512  }
 0x5da   : > { %1039 = vsyncadd (%p922_p7), %s780_s14, 4294966784  ;;  %p20_p8 = scmp.ge.s32.totalorder %s1143_s15, 4   ;;  %s1324_s30 = smov %s1046_s10 }
 0x5db   : > { %s1325_s10 = smov %s1050_s11  ;;  %s1326_s11 = smov %s1154_s18 }
 0x5dc   : > { %s1327_s12 = smov %s1143_s15  ;;  %22 = sbr.rel (!%p20_p8) target bundleno = 7 (0x7), region = 111 }
 0x5e1   :  { %786 = vsyncpa [#allocation3], 1 }
 0x5e2   :  { %788 = vsyncpa [#allocation3 + $0x1], 1 }

</bundles_post_ra>
